<compile_context>
chip_gen: v7x
topology: tpu7x:2x2x1
jax: 0.10.0
libtpu: 0.0.40
codegen_flags: <defaults>
</compile_context>

<pallas_src>
import numpy as np

import jax
import jax.numpy as jnp
from jax import lax
from jax.experimental import pallas as pl
from jax.experimental.pallas import tpu as pltpu


def _silu(y):
    return y * jax.nn.sigmoid(y)


# 3x3 conv taps in (dh, dw) order; tap index t = (dh+1)*3 + (dw+1) matches the
# (kh, kw)-flattened, K-stacked weight layout built in prepare_block_params.
_TAPS = tuple((dh, dw) for dh in (-1, 0, 1) for dw in (-1, 0, 1))


# ---------------------------------------------------------------------------
# Fused Block kernel
# ---------------------------------------------------------------------------

def _make_block_kernel(n_cv3, ids_pos, c_hidden, H, W, batch_tile):
    M = H * W

    def kernel(*refs):
        x_ref, mask_ref, w12_ref, b12_ref = refs[:4]
        w3_refs = [refs[4 + 2 * i] for i in range(n_cv3)]
        b3_refs = [refs[5 + 2 * i] for i in range(n_cv3)]
        off = 4 + 2 * n_cv3
        w4_ref = refs[off]
        b4_ref = refs[off + 1]
        o_ref = refs[off + 2]

        # Per-tap zero-padding border masks, (1, M) each (center tap needs none).
        tap_mask = {}
        j = 0
        for t, (dh, dw) in enumerate(_TAPS):
            if dh == 0 and dw == 0:
                tap_mask[t] = None
            else:
                tap_mask[t] = mask_ref[j]          # (1, M) f32
                j += 1

        w12 = w12_ref[...]                          # (2*c_, c1) bf16
        b12 = b12_ref[...]                          # (2*c_, 1)  f32
        w4 = w4_ref[...]                            # (c3, sum_ch) bf16
        b4 = b4_ref[...]                            # (c3, 1) f32

        for bi in range(batch_tile):
            x = x_ref[bi].astype(jnp.bfloat16)      # (c1, M), lanes = M

            # --- cv1 + cv2 merged into one pointwise matmul (BN folded) ------
            z = jnp.dot(w12, x, preferred_element_type=jnp.float32)
            x12 = _silu(z + b12)                    # (2*c_, M) f32
            x1 = x12[:c_hidden, :]                  # split in f32 (8-row aligned)
            x2 = x12[c_hidden:, :]

            # --- cv3 chain: 3x3 conv = tap-stacked single matmul per layer ---
            sources = [x1, x2]
            cur = x2
            for i in range(n_cv3):
                pieces = []
                for t, (dh, dw) in enumerate(_TAPS):
                    offset = dh * W + dw
                    if offset == 0:
                        shifted = cur
                    else:
                        # shifted[:, m] = cur[:, (m + offset) % M]
                        shifted = pltpu.roll(cur, shift=(-offset) % M, axis=1)
                    m = tap_mask[t]
                    pieces.append(shifted if m is None else shifted * m)
                # (9*cin, M): sublane-aligned f32 concat, then one bf16 cast.
                stacked = jnp.concatenate(pieces, axis=0).astype(jnp.bfloat16)
                z3 = jnp.dot(w3_refs[i][...], stacked,
                             preferred_element_type=jnp.float32)
                cur = _silu(z3 + b3_refs[i][...])   # (cout, M) f32
                sources.append(cur)

            # --- cv4: single matmul against the in-VMEM concat of sources ----
            cat = jnp.concatenate([sources[s] for s in ids_pos],
                                  axis=0).astype(jnp.bfloat16)   # (sum_ch, M)
            z4 = jnp.dot(w4, cat, preferred_element_type=jnp.float32)
            o_ref[bi] = _silu(z4 + b4).astype(o_ref.dtype)

    return kernel


def block_forward(prep, x_nchw, *, batch_tile=1):
    """Fused Block forward.  x: (N, c1, H, W) NCHW -> (N, c3, H, W) NCHW."""
    N, c1, H, W = x_nchw.shape
    M = H * W
    assert N % batch_tile == 0
    x3 = x_nchw.reshape(N, c1, M)                   # free reshape, no transpose

    # 8 non-center zero-padding border masks, built on the host once: (8, 1, M).
    pos = np.arange(M)
    hh, ww = pos // W, pos % W
    mask_rows = []
    for dh, dw in _TAPS:
        if dh == 0 and dw == 0:
            continue
        mask_rows.append(((hh + dh >= 0) & (hh + dh < H) &
                          (ww + dw >= 0) & (ww + dw < W)).astype(np.float32))
    mask8 = jnp.asarray(np.stack(mask_rows).reshape(8, 1, M))

    n_cv3 = len(prep["cv3"])
    ids_pos = tuple(prep["ids_pos"])
    c3_out = prep["b4"].shape[0]

    operands = [x3, mask8, prep["w12"], prep["b12"]]
    for w_stk, b3 in prep["cv3"]:
        operands += [w_stk, b3]
    operands += [prep["w4"], prep["b4"]]

    kernel = _make_block_kernel(n_cv3, ids_pos, prep["c_"], H, W, batch_tile)
    grid = (N // batch_tile,)

    def build(vmem_resident_consts):
        if vmem_resident_consts:
            # Single VMEM-resident copy, no pipelining / double-buffering.
            const_specs = [pl.BlockSpec(memory_space=pltpu.MemorySpace.VMEM)
                           for _ in operands[1:]]
        else:
            # Fallback: full-array, grid-invariant blocks (DMA'd once).
            const_specs = [pl.BlockSpec(a.shape, lambda b, _nd=a.ndim: (0,) * _nd)
                           for a in operands[1:]]
        in_specs = [pl.BlockSpec((batch_tile, c1, M),
                                 lambda b: (b, 0, 0))] + const_specs
        return pl.pallas_call(
            kernel,
            out_shape=jax.ShapeDtypeStruct((N, c3_out, M), jnp.float32),
            grid=grid,
            in_specs=in_specs,
            out_specs=pl.BlockSpec((batch_tile, c3_out, M), lambda b: (b, 0, 0)),
            compiler_params=pltpu.CompilerParams(
                dimension_semantics=("parallel",),
                vmem_limit_bytes=32 * 1024 * 1024),
        )

    try:
        out = jax.block_until_ready(build(True)(*operands))
    except Exception:
        out = jax.block_until_ready(build(False)(*operands))
    return out.reshape(N, c3_out, H, W)


# ---------------------------------------------------------------------------
# Parameter construction (deterministic, synthetic) + BN folding
# ---------------------------------------------------------------------------

def init_conv(key, cin, cout, k):
    kw, kg, kb, km, kv = jax.random.split(key, 5)
    w = 0.1 * jax.random.normal(kw, (cout, cin, k, k), jnp.float32)  # PyTorch OIHW
    gamma = 1.0 + 0.1 * jax.random.normal(kg, (cout,), jnp.float32)
    beta = 0.1 * jax.random.normal(kb, (cout,), jnp.float32)
    mean = 0.1 * jax.random.normal(km, (cout,), jnp.float32)
    var = jax.random.uniform(kv, (cout,), jnp.float32, minval=0.5, maxval=1.5)
    eps = 1e-3
    scale = gamma / jnp.sqrt(var + eps)
    bias = beta - mean * scale
    return {"w": w, "scale": scale, "bias": bias, "k": k}


def init_block(key, c1, c2, c3, n, e, ids):
    c_ = int(c2 * e)
    keys = jax.random.split(key, 3 + n)
    return {
        "ids": list(ids),
        "cv1": init_conv(keys[0], c1, c_, 1),
        "cv2": init_conv(keys[1], c1, c_, 1),
        "cv3": [init_conv(keys[2 + i], c_ if i == 0 else c2, c2, 3)
                for i in range(n)],
        "cv4": init_conv(keys[2 + n], c_ * 2 + c2 * (len(ids) - 2), c3, 1),
    }


def prepare_block_params(params):
    """One-time prep: fold BN (inference), merge cv1+cv2, K-stack 3x3 weights,
    cast matmul weights to bf16 (biases stay f32)."""
    n = len(params["cv3"])
    ids = params["ids"]
    n_src = n + 2
    ids_pos = [int(i) % n_src for i in ids]

    def fold_pw(conv):
        w = conv["w"][:, :, 0, 0] * conv["scale"][:, None]          # (cout, cin)
        return w, conv["bias"][:, None]                             # bias (cout, 1)

    def fold_3x3_stacked(conv):
        w = conv["w"] * conv["scale"][:, None, None, None]          # (cout,cin,3,3)
        cout, cin = w.shape[0], w.shape[1]
        # Column block t = kh*3 + kw matches the in-kernel tap-stack order.
        w_stk = jnp.transpose(w, (0, 2, 3, 1)).reshape(cout, 9 * cin)
        return w_stk.astype(jnp.bfloat16), conv["bias"][:, None]

    w1, b1 = fold_pw(params["cv1"])
    w2, b2 = fold_pw(params["cv2"])
    c_hidden = int(w1.shape[0])
    w12 = jnp.concatenate([w1, w2], axis=0).astype(jnp.bfloat16)    # (2*c_, c1)
    b12 = jnp.concatenate([b1, b2], axis=0)                         # (2*c_, 1)

    cv3 = [fold_3x3_stacked(conv) for conv in params["cv3"]]

    w4, b4 = fold_pw(params["cv4"])                                 # (c3, sum_ch)
    src_ch = [c_hidden, c_hidden] + [int(c["w"].shape[0]) for c in params["cv3"]]
    assert int(w4.shape[1]) == sum(src_ch[i] for i in ids_pos)

    return {"ids_pos": ids_pos, "c_": c_hidden, "w12": w12, "b12": b12,
            "cv3": cv3, "w4": w4.astype(jnp.bfloat16), "b4": b4}


# ---------------------------------------------------------------------------
# Pure-JAX reference (mirrors the PyTorch module exactly, f32 throughout)
# ---------------------------------------------------------------------------

def reference_forward(params, x):
    def cbs(a, conv):
        k = conv["w"].shape[2]
        pad = k // 2
        y = lax.conv_general_dilated(
            a, conv["w"], window_strides=(1, 1),
            padding=[(pad, pad), (pad, pad)],
            dimension_numbers=("NCHW", "OIHW", "NCHW"))
        y = y * conv["scale"][None, :, None, None] + conv["bias"][None, :, None, None]
        return y * jax.nn.sigmoid(y)

    x1 = cbs(x, params["cv1"])
    x2 = cbs(x, params["cv2"])
    x_all = [x1, x2]
    cur = x2
    for conv in params["cv3"]:
        cur = cbs(cur, conv)
        x_all.append(cur)
    cat = jnp.concatenate([x_all[i] for i in params["ids"]], axis=1)
    return cbs(cat, params["cv4"])


# ---------------------------------------------------------------------------

if __name__ == "__main__":
    # Block(c1=4, c2=8, c3=16, n=4, e=1, ids=[-1, -3, -5, -6])
    c1, c2, c3, n, e = 4, 8, 16, 4, 1
    ids = [-1, -3, -5, -6]

    key = jax.random.PRNGKey(0)
    k_params, k_x = jax.random.split(key)
    params = init_block(k_params, c1, c2, c3, n, e, ids)
    prep = prepare_block_params(params)

    N, H, W = 2, 16, 16
    x = jax.random.normal(k_x, (N, c1, H, W), jnp.float32)   # NCHW, PyTorch layout

    # Whole batch in one grid step at demo scale (amortizes per-step overhead).
    out = jax.block_until_ready(block_forward(prep, x, batch_tile=N))
    assert out.shape == (N, c3, H, W), out.shape

    ref = jax.block_until_ready(reference_forward(params, x))
    err = float(jnp.max(jnp.abs(out - ref)))
    # bf16 MXU operands (f32 accumulate): loosened from the pure-f32 2e-3 bound.
    assert err < 5e-2, f"max abs err {err}"

    print("KERNEL_OK")
</pallas_src>

<mosaic_0001>
module attributes {stable_mosaic.version = 11 : i64} {
  func.func @kernel(%arg0: i32, %arg1: memref<2x4x256xf32, #tpu.memory_space<vmem>>, %arg2: memref<8x1x256xf32, #tpu.memory_space<vmem>>, %arg3: memref<16x4xbf16, #tpu.memory_space<vmem>>, %arg4: memref<16x1xf32, #tpu.memory_space<vmem>>, %arg5: memref<8x72xbf16, #tpu.memory_space<vmem>>, %arg6: memref<8x1xf32, #tpu.memory_space<vmem>>, %arg7: memref<8x72xbf16, #tpu.memory_space<vmem>>, %arg8: memref<8x1xf32, #tpu.memory_space<vmem>>, %arg9: memref<8x72xbf16, #tpu.memory_space<vmem>>, %arg10: memref<8x1xf32, #tpu.memory_space<vmem>>, %arg11: memref<8x72xbf16, #tpu.memory_space<vmem>>, %arg12: memref<8x1xf32, #tpu.memory_space<vmem>>, %arg13: memref<16x32xbf16, #tpu.memory_space<vmem>>, %arg14: memref<16x1xf32, #tpu.memory_space<vmem>>, %arg15: memref<2x16x256xf32, #tpu.memory_space<vmem>>) attributes {dimension_semantics = [#tpu.dimension_semantics<parallel>], iteration_bounds = array<i64: 1>, scalar_prefetch = 0 : i64, scratch_operands = 0 : i64, tpu.core_type = #tpu.core_type<tc>, window_params = [{transform_indices = @transform_0, window_bounds = array<i64: 2, 4, 256>}, {pipeline_mode = #tpu.pipeline_mode<synchronous>, transform_indices = @transform_1, window_bounds = array<i64: 8, 1, 256>}, {pipeline_mode = #tpu.pipeline_mode<synchronous>, transform_indices = @transform_2, window_bounds = array<i64: 16, 4>}, {pipeline_mode = #tpu.pipeline_mode<synchronous>, transform_indices = @transform_3, window_bounds = array<i64: 16, 1>}, {pipeline_mode = #tpu.pipeline_mode<synchronous>, transform_indices = @transform_4, window_bounds = array<i64: 8, 72>}, {pipeline_mode = #tpu.pipeline_mode<synchronous>, transform_indices = @transform_5, window_bounds = array<i64: 8, 1>}, {pipeline_mode = #tpu.pipeline_mode<synchronous>, transform_indices = @transform_6, window_bounds = array<i64: 8, 72>}, {pipeline_mode = #tpu.pipeline_mode<synchronous>, transform_indices = @transform_7, window_bounds = array<i64: 8, 1>}, {pipeline_mode = #tpu.pipeline_mode<synchronous>, transform_indices = @transform_8, window_bounds = array<i64: 8, 72>}, {pipeline_mode = #tpu.pipeline_mode<synchronous>, transform_indices = @transform_9, window_bounds = array<i64: 8, 1>}, {pipeline_mode = #tpu.pipeline_mode<synchronous>, transform_indices = @transform_10, window_bounds = array<i64: 8, 72>}, {pipeline_mode = #tpu.pipeline_mode<synchronous>, transform_indices = @transform_11, window_bounds = array<i64: 8, 1>}, {pipeline_mode = #tpu.pipeline_mode<synchronous>, transform_indices = @transform_12, window_bounds = array<i64: 16, 32>}, {pipeline_mode = #tpu.pipeline_mode<synchronous>, transform_indices = @transform_13, window_bounds = array<i64: 16, 1>}, {transform_indices = @transform_14, window_bounds = array<i64: 2, 16, 256>}]} {
    %c0 = arith.constant 0 : index
    %c0_0 = arith.constant 0 : index
    %c0_1 = arith.constant 0 : index
    %0 = vector.load %arg2[%c0, %c0_0, %c0_1] : memref<8x1x256xf32, #tpu.memory_space<vmem>>, vector<1x1x256xf32>
    %1 = vector.shape_cast %0 : vector<1x1x256xf32> to vector<1x256xf32>
    %c1 = arith.constant 1 : index
    %c0_2 = arith.constant 0 : index
    %c0_3 = arith.constant 0 : index
    %2 = vector.load %arg2[%c1, %c0_2, %c0_3] : memref<8x1x256xf32, #tpu.memory_space<vmem>>, vector<1x1x256xf32>
    %3 = vector.shape_cast %2 : vector<1x1x256xf32> to vector<1x256xf32>
    %c2 = arith.constant 2 : index
    %c0_4 = arith.constant 0 : index
    %c0_5 = arith.constant 0 : index
    %4 = vector.load %arg2[%c2, %c0_4, %c0_5] : memref<8x1x256xf32, #tpu.memory_space<vmem>>, vector<1x1x256xf32>
    %5 = vector.shape_cast %4 : vector<1x1x256xf32> to vector<1x256xf32>
    %c3 = arith.constant 3 : index
    %c0_6 = arith.constant 0 : index
    %c0_7 = arith.constant 0 : index
    %6 = vector.load %arg2[%c3, %c0_6, %c0_7] : memref<8x1x256xf32, #tpu.memory_space<vmem>>, vector<1x1x256xf32>
    %7 = vector.shape_cast %6 : vector<1x1x256xf32> to vector<1x256xf32>
    %c4 = arith.constant 4 : index
    %c0_8 = arith.constant 0 : index
    %c0_9 = arith.constant 0 : index
    %8 = vector.load %arg2[%c4, %c0_8, %c0_9] : memref<8x1x256xf32, #tpu.memory_space<vmem>>, vector<1x1x256xf32>
    %9 = vector.shape_cast %8 : vector<1x1x256xf32> to vector<1x256xf32>
    %c5 = arith.constant 5 : index
    %c0_10 = arith.constant 0 : index
    %c0_11 = arith.constant 0 : index
    %10 = vector.load %arg2[%c5, %c0_10, %c0_11] : memref<8x1x256xf32, #tpu.memory_space<vmem>>, vector<1x1x256xf32>
    %11 = vector.shape_cast %10 : vector<1x1x256xf32> to vector<1x256xf32>
    %c6 = arith.constant 6 : index
    %c0_12 = arith.constant 0 : index
    %c0_13 = arith.constant 0 : index
    %12 = vector.load %arg2[%c6, %c0_12, %c0_13] : memref<8x1x256xf32, #tpu.memory_space<vmem>>, vector<1x1x256xf32>
    %13 = vector.shape_cast %12 : vector<1x1x256xf32> to vector<1x256xf32>
    %c7 = arith.constant 7 : index
    %c0_14 = arith.constant 0 : index
    %c0_15 = arith.constant 0 : index
    %14 = vector.load %arg2[%c7, %c0_14, %c0_15] : memref<8x1x256xf32, #tpu.memory_space<vmem>>, vector<1x1x256xf32>
    %15 = vector.shape_cast %14 : vector<1x1x256xf32> to vector<1x256xf32>
    %c0_16 = arith.constant 0 : index
    %c0_17 = arith.constant 0 : index
    %16 = vector.load %arg3[%c0_16, %c0_17] : memref<16x4xbf16, #tpu.memory_space<vmem>>, vector<16x4xbf16>
    %c0_18 = arith.constant 0 : index
    %c0_19 = arith.constant 0 : index
    %17 = vector.load %arg4[%c0_18, %c0_19] : memref<16x1xf32, #tpu.memory_space<vmem>>, vector<16x1xf32>
    %c0_20 = arith.constant 0 : index
    %c0_21 = arith.constant 0 : index
    %18 = vector.load %arg13[%c0_20, %c0_21] : memref<16x32xbf16, #tpu.memory_space<vmem>>, vector<16x32xbf16>
    %c0_22 = arith.constant 0 : index
    %c0_23 = arith.constant 0 : index
    %19 = vector.load %arg14[%c0_22, %c0_23] : memref<16x1xf32, #tpu.memory_space<vmem>>, vector<16x1xf32>
    %c0_24 = arith.constant 0 : index
    %c0_25 = arith.constant 0 : index
    %c0_26 = arith.constant 0 : index
    %20 = vector.load %arg1[%c0_24, %c0_25, %c0_26] : memref<2x4x256xf32, #tpu.memory_space<vmem>>, vector<1x4x256xf32>
    %21 = vector.shape_cast %20 : vector<1x4x256xf32> to vector<4x256xf32>
    %22 = arith.truncf %21 : vector<4x256xf32> to vector<4x256xbf16>
    %cst = arith.constant dense<0.000000e+00> : vector<16x256xf32>
    %23 = tpu.matmul %16, %22, %cst {dimension_numbers = #tpu.dot_dimension_numbers<[1], [0], [0], [1], [0, 0, 1, 1], [], []>} : vector<16x4xbf16>, vector<4x256xbf16>, vector<16x256xf32> -> vector<16x256xf32>
    %24 = vector.broadcast %17 : vector<16x1xf32> to vector<16x256xf32>
    %25 = arith.addf %23, %24 : vector<16x256xf32>
    %26 = arith.negf %25 : vector<16x256xf32>
    %27 = math.exp %26 : vector<16x256xf32>
    %cst_27 = arith.constant 1.000000e+00 : f32
    %28 = vector.broadcast %cst_27 : f32 to vector<16x256xf32>
    %29 = arith.addf %28, %27 : vector<16x256xf32>
    %30 = arith.divf %28, %29 : vector<16x256xf32>
    %31 = arith.mulf %25, %30 : vector<16x256xf32>
    %32 = vector.extract_strided_slice %31 {offsets = [0, 0], sizes = [8, 256], strides = [1, 1]} : vector<16x256xf32> to vector<8x256xf32>
    %33 = vector.extract_strided_slice %31 {offsets = [8, 0], sizes = [8, 256], strides = [1, 1]} : vector<16x256xf32> to vector<8x256xf32>
    %c17_i32 = arith.constant 17 : i32
    %34 = tpu.dynamic_rotate %33 by %c17_i32 dim 1 : vector<8x256xf32>, i32 -> vector<8x256xf32>
    %35 = vector.broadcast %1 : vector<1x256xf32> to vector<8x256xf32>
    %36 = arith.mulf %34, %35 : vector<8x256xf32>
    %c16_i32 = arith.constant 16 : i32
    %37 = tpu.dynamic_rotate %33 by %c16_i32 dim 1 : vector<8x256xf32>, i32 -> vector<8x256xf32>
    %38 = vector.broadcast %3 : vector<1x256xf32> to vector<8x256xf32>
    %39 = arith.mulf %37, %38 : vector<8x256xf32>
    %c15_i32 = arith.constant 15 : i32
    %40 = tpu.dynamic_rotate %33 by %c15_i32 dim 1 : vector<8x256xf32>, i32 -> vector<8x256xf32>
    %41 = vector.broadcast %5 : vector<1x256xf32> to vector<8x256xf32>
    %42 = arith.mulf %40, %41 : vector<8x256xf32>
    %c1_i32 = arith.constant 1 : i32
    %43 = tpu.dynamic_rotate %33 by %c1_i32 dim 1 : vector<8x256xf32>, i32 -> vector<8x256xf32>
    %44 = vector.broadcast %7 : vector<1x256xf32> to vector<8x256xf32>
    %45 = arith.mulf %43, %44 : vector<8x256xf32>
    %c255_i32 = arith.constant 255 : i32
    %46 = tpu.dynamic_rotate %33 by %c255_i32 dim 1 : vector<8x256xf32>, i32 -> vector<8x256xf32>
    %47 = vector.broadcast %9 : vector<1x256xf32> to vector<8x256xf32>
    %48 = arith.mulf %46, %47 : vector<8x256xf32>
    %c241_i32 = arith.constant 241 : i32
    %49 = tpu.dynamic_rotate %33 by %c241_i32 dim 1 : vector<8x256xf32>, i32 -> vector<8x256xf32>
    %50 = vector.broadcast %11 : vector<1x256xf32> to vector<8x256xf32>
    %51 = arith.mulf %49, %50 : vector<8x256xf32>
    %c240_i32 = arith.constant 240 : i32
    %52 = tpu.dynamic_rotate %33 by %c240_i32 dim 1 : vector<8x256xf32>, i32 -> vector<8x256xf32>
    %53 = vector.broadcast %13 : vector<1x256xf32> to vector<8x256xf32>
    %54 = arith.mulf %52, %53 : vector<8x256xf32>
    %c239_i32 = arith.constant 239 : i32
    %55 = tpu.dynamic_rotate %33 by %c239_i32 dim 1 : vector<8x256xf32>, i32 -> vector<8x256xf32>
    %56 = vector.broadcast %15 : vector<1x256xf32> to vector<8x256xf32>
    %57 = arith.mulf %55, %56 : vector<8x256xf32>
    %58 = tpu.concatenate %36, %39, %42, %45, %33, %48, %51, %54, %57 in 0 : vector<8x256xf32>, vector<8x256xf32>, vector<8x256xf32>, vector<8x256xf32>, vector<8x256xf32>, vector<8x256xf32>, vector<8x256xf32>, vector<8x256xf32>, vector<8x256xf32> -> vector<72x256xf32>
    %59 = arith.truncf %58 : vector<72x256xf32> to vector<72x256xbf16>
    %c0_28 = arith.constant 0 : index
    %c0_29 = arith.constant 0 : index
    %60 = vector.load %arg5[%c0_28, %c0_29] : memref<8x72xbf16, #tpu.memory_space<vmem>>, vector<8x72xbf16>
    %cst_30 = arith.constant dense<0.000000e+00> : vector<8x256xf32>
    %61 = tpu.matmul %60, %59, %cst_30 {dimension_numbers = #tpu.dot_dimension_numbers<[1], [0], [0], [1], [0, 0, 1, 1], [], []>} : vector<8x72xbf16>, vector<72x256xbf16>, vector<8x256xf32> -> vector<8x256xf32>
    %c0_31 = arith.constant 0 : index
    %c0_32 = arith.constant 0 : index
    %62 = vector.load %arg6[%c0_31, %c0_32] : memref<8x1xf32, #tpu.memory_space<vmem>>, vector<8x1xf32>
    %63 = vector.broadcast %62 : vector<8x1xf32> to vector<8x256xf32>
    %64 = arith.addf %61, %63 : vector<8x256xf32>
    %65 = arith.negf %64 : vector<8x256xf32>
    %66 = math.exp %65 : vector<8x256xf32>
    %cst_33 = arith.constant 1.000000e+00 : f32
    %67 = vector.broadcast %cst_33 : f32 to vector<8x256xf32>
    %68 = arith.addf %67, %66 : vector<8x256xf32>
    %69 = arith.divf %67, %68 : vector<8x256xf32>
    %70 = arith.mulf %64, %69 : vector<8x256xf32>
    %c17_i32_34 = arith.constant 17 : i32
    %71 = tpu.dynamic_rotate %70 by %c17_i32_34 dim 1 : vector<8x256xf32>, i32 -> vector<8x256xf32>
    %72 = vector.broadcast %1 : vector<1x256xf32> to vector<8x256xf32>
    %73 = arith.mulf %71, %72 : vector<8x256xf32>
    %c16_i32_35 = arith.constant 16 : i32
    %74 = tpu.dynamic_rotate %70 by %c16_i32_35 dim 1 : vector<8x256xf32>, i32 -> vector<8x256xf32>
    %75 = vector.broadcast %3 : vector<1x256xf32> to vector<8x256xf32>
    %76 = arith.mulf %74, %75 : vector<8x256xf32>
    %c15_i32_36 = arith.constant 15 : i32
    %77 = tpu.dynamic_rotate %70 by %c15_i32_36 dim 1 : vector<8x256xf32>, i32 -> vector<8x256xf32>
    %78 = vector.broadcast %5 : vector<1x256xf32> to vector<8x256xf32>
    %79 = arith.mulf %77, %78 : vector<8x256xf32>
    %c1_i32_37 = arith.constant 1 : i32
    %80 = tpu.dynamic_rotate %70 by %c1_i32_37 dim 1 : vector<8x256xf32>, i32 -> vector<8x256xf32>
    %81 = vector.broadcast %7 : vector<1x256xf32> to vector<8x256xf32>
    %82 = arith.mulf %80, %81 : vector<8x256xf32>
    %c255_i32_38 = arith.constant 255 : i32
    %83 = tpu.dynamic_rotate %70 by %c255_i32_38 dim 1 : vector<8x256xf32>, i32 -> vector<8x256xf32>
    %84 = vector.broadcast %9 : vector<1x256xf32> to vector<8x256xf32>
    %85 = arith.mulf %83, %84 : vector<8x256xf32>
    %c241_i32_39 = arith.constant 241 : i32
    %86 = tpu.dynamic_rotate %70 by %c241_i32_39 dim 1 : vector<8x256xf32>, i32 -> vector<8x256xf32>
    %87 = vector.broadcast %11 : vector<1x256xf32> to vector<8x256xf32>
    %88 = arith.mulf %86, %87 : vector<8x256xf32>
    %c240_i32_40 = arith.constant 240 : i32
    %89 = tpu.dynamic_rotate %70 by %c240_i32_40 dim 1 : vector<8x256xf32>, i32 -> vector<8x256xf32>
    %90 = vector.broadcast %13 : vector<1x256xf32> to vector<8x256xf32>
    %91 = arith.mulf %89, %90 : vector<8x256xf32>
    %c239_i32_41 = arith.constant 239 : i32
    %92 = tpu.dynamic_rotate %70 by %c239_i32_41 dim 1 : vector<8x256xf32>, i32 -> vector<8x256xf32>
    %93 = vector.broadcast %15 : vector<1x256xf32> to vector<8x256xf32>
    %94 = arith.mulf %92, %93 : vector<8x256xf32>
    %95 = tpu.concatenate %73, %76, %79, %82, %70, %85, %88, %91, %94 in 0 : vector<8x256xf32>, vector<8x256xf32>, vector<8x256xf32>, vector<8x256xf32>, vector<8x256xf32>, vector<8x256xf32>, vector<8x256xf32>, vector<8x256xf32>, vector<8x256xf32> -> vector<72x256xf32>
    %96 = arith.truncf %95 : vector<72x256xf32> to vector<72x256xbf16>
    %c0_42 = arith.constant 0 : index
    %c0_43 = arith.constant 0 : index
    %97 = vector.load %arg7[%c0_42, %c0_43] : memref<8x72xbf16, #tpu.memory_space<vmem>>, vector<8x72xbf16>
    %cst_44 = arith.constant dense<0.000000e+00> : vector<8x256xf32>
    %98 = tpu.matmul %97, %96, %cst_44 {dimension_numbers = #tpu.dot_dimension_numbers<[1], [0], [0], [1], [0, 0, 1, 1], [], []>} : vector<8x72xbf16>, vector<72x256xbf16>, vector<8x256xf32> -> vector<8x256xf32>
    %c0_45 = arith.constant 0 : index
    %c0_46 = arith.constant 0 : index
    %99 = vector.load %arg8[%c0_45, %c0_46] : memref<8x1xf32, #tpu.memory_space<vmem>>, vector<8x1xf32>
    %100 = vector.broadcast %99 : vector<8x1xf32> to vector<8x256xf32>
    %101 = arith.addf %98, %100 : vector<8x256xf32>
    %102 = arith.negf %101 : vector<8x256xf32>
    %103 = math.exp %102 : vector<8x256xf32>
    %cst_47 = arith.constant 1.000000e+00 : f32
    %104 = vector.broadcast %cst_47 : f32 to vector<8x256xf32>
    %105 = arith.addf %104, %103 : vector<8x256xf32>
    %106 = arith.divf %104, %105 : vector<8x256xf32>
    %107 = arith.mulf %101, %106 : vector<8x256xf32>
    %c17_i32_48 = arith.constant 17 : i32
    %108 = tpu.dynamic_rotate %107 by %c17_i32_48 dim 1 : vector<8x256xf32>, i32 -> vector<8x256xf32>
    %109 = vector.broadcast %1 : vector<1x256xf32> to vector<8x256xf32>
    %110 = arith.mulf %108, %109 : vector<8x256xf32>
    %c16_i32_49 = arith.constant 16 : i32
    %111 = tpu.dynamic_rotate %107 by %c16_i32_49 dim 1 : vector<8x256xf32>, i32 -> vector<8x256xf32>
    %112 = vector.broadcast %3 : vector<1x256xf32> to vector<8x256xf32>
    %113 = arith.mulf %111, %112 : vector<8x256xf32>
    %c15_i32_50 = arith.constant 15 : i32
    %114 = tpu.dynamic_rotate %107 by %c15_i32_50 dim 1 : vector<8x256xf32>, i32 -> vector<8x256xf32>
    %115 = vector.broadcast %5 : vector<1x256xf32> to vector<8x256xf32>
    %116 = arith.mulf %114, %115 : vector<8x256xf32>
    %c1_i32_51 = arith.constant 1 : i32
    %117 = tpu.dynamic_rotate %107 by %c1_i32_51 dim 1 : vector<8x256xf32>, i32 -> vector<8x256xf32>
    %118 = vector.broadcast %7 : vector<1x256xf32> to vector<8x256xf32>
    %119 = arith.mulf %117, %118 : vector<8x256xf32>
    %c255_i32_52 = arith.constant 255 : i32
    %120 = tpu.dynamic_rotate %107 by %c255_i32_52 dim 1 : vector<8x256xf32>, i32 -> vector<8x256xf32>
    %121 = vector.broadcast %9 : vector<1x256xf32> to vector<8x256xf32>
    %122 = arith.mulf %120, %121 : vector<8x256xf32>
    %c241_i32_53 = arith.constant 241 : i32
    %123 = tpu.dynamic_rotate %107 by %c241_i32_53 dim 1 : vector<8x256xf32>, i32 -> vector<8x256xf32>
    %124 = vector.broadcast %11 : vector<1x256xf32> to vector<8x256xf32>
    %125 = arith.mulf %123, %124 : vector<8x256xf32>
    %c240_i32_54 = arith.constant 240 : i32
    %126 = tpu.dynamic_rotate %107 by %c240_i32_54 dim 1 : vector<8x256xf32>, i32 -> vector<8x256xf32>
    %127 = vector.broadcast %13 : vector<1x256xf32> to vector<8x256xf32>
    %128 = arith.mulf %126, %127 : vector<8x256xf32>
    %c239_i32_55 = arith.constant 239 : i32
    %129 = tpu.dynamic_rotate %107 by %c239_i32_55 dim 1 : vector<8x256xf32>, i32 -> vector<8x256xf32>
    %130 = vector.broadcast %15 : vector<1x256xf32> to vector<8x256xf32>
    %131 = arith.mulf %129, %130 : vector<8x256xf32>
    %132 = tpu.concatenate %110, %113, %116, %119, %107, %122, %125, %128, %131 in 0 : vector<8x256xf32>, vector<8x256xf32>, vector<8x256xf32>, vector<8x256xf32>, vector<8x256xf32>, vector<8x256xf32>, vector<8x256xf32>, vector<8x256xf32>, vector<8x256xf32> -> vector<72x256xf32>
    %133 = arith.truncf %132 : vector<72x256xf32> to vector<72x256xbf16>
    %c0_56 = arith.constant 0 : index
    %c0_57 = arith.constant 0 : index
    %134 = vector.load %arg9[%c0_56, %c0_57] : memref<8x72xbf16, #tpu.memory_space<vmem>>, vector<8x72xbf16>
    %cst_58 = arith.constant dense<0.000000e+00> : vector<8x256xf32>
    %135 = tpu.matmul %134, %133, %cst_58 {dimension_numbers = #tpu.dot_dimension_numbers<[1], [0], [0], [1], [0, 0, 1, 1], [], []>} : vector<8x72xbf16>, vector<72x256xbf16>, vector<8x256xf32> -> vector<8x256xf32>
    %c0_59 = arith.constant 0 : index
    %c0_60 = arith.constant 0 : index
    %136 = vector.load %arg10[%c0_59, %c0_60] : memref<8x1xf32, #tpu.memory_space<vmem>>, vector<8x1xf32>
    %137 = vector.broadcast %136 : vector<8x1xf32> to vector<8x256xf32>
    %138 = arith.addf %135, %137 : vector<8x256xf32>
    %139 = arith.negf %138 : vector<8x256xf32>
    %140 = math.exp %139 : vector<8x256xf32>
    %cst_61 = arith.constant 1.000000e+00 : f32
    %141 = vector.broadcast %cst_61 : f32 to vector<8x256xf32>
    %142 = arith.addf %141, %140 : vector<8x256xf32>
    %143 = arith.divf %141, %142 : vector<8x256xf32>
    %144 = arith.mulf %138, %143 : vector<8x256xf32>
    %c17_i32_62 = arith.constant 17 : i32
    %145 = tpu.dynamic_rotate %144 by %c17_i32_62 dim 1 : vector<8x256xf32>, i32 -> vector<8x256xf32>
    %146 = vector.broadcast %1 : vector<1x256xf32> to vector<8x256xf32>
    %147 = arith.mulf %145, %146 : vector<8x256xf32>
    %c16_i32_63 = arith.constant 16 : i32
    %148 = tpu.dynamic_rotate %144 by %c16_i32_63 dim 1 : vector<8x256xf32>, i32 -> vector<8x256xf32>
    %149 = vector.broadcast %3 : vector<1x256xf32> to vector<8x256xf32>
    %150 = arith.mulf %148, %149 : vector<8x256xf32>
    %c15_i32_64 = arith.constant 15 : i32
    %151 = tpu.dynamic_rotate %144 by %c15_i32_64 dim 1 : vector<8x256xf32>, i32 -> vector<8x256xf32>
    %152 = vector.broadcast %5 : vector<1x256xf32> to vector<8x256xf32>
    %153 = arith.mulf %151, %152 : vector<8x256xf32>
    %c1_i32_65 = arith.constant 1 : i32
    %154 = tpu.dynamic_rotate %144 by %c1_i32_65 dim 1 : vector<8x256xf32>, i32 -> vector<8x256xf32>
    %155 = vector.broadcast %7 : vector<1x256xf32> to vector<8x256xf32>
    %156 = arith.mulf %154, %155 : vector<8x256xf32>
    %c255_i32_66 = arith.constant 255 : i32
    %157 = tpu.dynamic_rotate %144 by %c255_i32_66 dim 1 : vector<8x256xf32>, i32 -> vector<8x256xf32>
    %158 = vector.broadcast %9 : vector<1x256xf32> to vector<8x256xf32>
    %159 = arith.mulf %157, %158 : vector<8x256xf32>
    %c241_i32_67 = arith.constant 241 : i32
    %160 = tpu.dynamic_rotate %144 by %c241_i32_67 dim 1 : vector<8x256xf32>, i32 -> vector<8x256xf32>
    %161 = vector.broadcast %11 : vector<1x256xf32> to vector<8x256xf32>
    %162 = arith.mulf %160, %161 : vector<8x256xf32>
    %c240_i32_68 = arith.constant 240 : i32
    %163 = tpu.dynamic_rotate %144 by %c240_i32_68 dim 1 : vector<8x256xf32>, i32 -> vector<8x256xf32>
    %164 = vector.broadcast %13 : vector<1x256xf32> to vector<8x256xf32>
    %165 = arith.mulf %163, %164 : vector<8x256xf32>
    %c239_i32_69 = arith.constant 239 : i32
    %166 = tpu.dynamic_rotate %144 by %c239_i32_69 dim 1 : vector<8x256xf32>, i32 -> vector<8x256xf32>
    %167 = vector.broadcast %15 : vector<1x256xf32> to vector<8x256xf32>
    %168 = arith.mulf %166, %167 : vector<8x256xf32>
    %169 = tpu.concatenate %147, %150, %153, %156, %144, %159, %162, %165, %168 in 0 : vector<8x256xf32>, vector<8x256xf32>, vector<8x256xf32>, vector<8x256xf32>, vector<8x256xf32>, vector<8x256xf32>, vector<8x256xf32>, vector<8x256xf32>, vector<8x256xf32> -> vector<72x256xf32>
    %170 = arith.truncf %169 : vector<72x256xf32> to vector<72x256xbf16>
    %c0_70 = arith.constant 0 : index
    %c0_71 = arith.constant 0 : index
    %171 = vector.load %arg11[%c0_70, %c0_71] : memref<8x72xbf16, #tpu.memory_space<vmem>>, vector<8x72xbf16>
    %cst_72 = arith.constant dense<0.000000e+00> : vector<8x256xf32>
    %172 = tpu.matmul %171, %170, %cst_72 {dimension_numbers = #tpu.dot_dimension_numbers<[1], [0], [0], [1], [0, 0, 1, 1], [], []>} : vector<8x72xbf16>, vector<72x256xbf16>, vector<8x256xf32> -> vector<8x256xf32>
    %c0_73 = arith.constant 0 : index
    %c0_74 = arith.constant 0 : index
    %173 = vector.load %arg12[%c0_73, %c0_74] : memref<8x1xf32, #tpu.memory_space<vmem>>, vector<8x1xf32>
    %174 = vector.broadcast %173 : vector<8x1xf32> to vector<8x256xf32>
    %175 = arith.addf %172, %174 : vector<8x256xf32>
    %176 = arith.negf %175 : vector<8x256xf32>
    %177 = math.exp %176 : vector<8x256xf32>
    %cst_75 = arith.constant 1.000000e+00 : f32
    %178 = vector.broadcast %cst_75 : f32 to vector<8x256xf32>
    %179 = arith.addf %178, %177 : vector<8x256xf32>
    %180 = arith.divf %178, %179 : vector<8x256xf32>
    %181 = arith.mulf %175, %180 : vector<8x256xf32>
    %182 = tpu.concatenate %181, %107, %33, %32 in 0 : vector<8x256xf32>, vector<8x256xf32>, vector<8x256xf32>, vector<8x256xf32> -> vector<32x256xf32>
    %183 = arith.truncf %182 : vector<32x256xf32> to vector<32x256xbf16>
    %cst_76 = arith.constant dense<0.000000e+00> : vector<16x256xf32>
    %184 = tpu.matmul %18, %183, %cst_76 {dimension_numbers = #tpu.dot_dimension_numbers<[1], [0], [0], [1], [0, 0, 1, 1], [], []>} : vector<16x32xbf16>, vector<32x256xbf16>, vector<16x256xf32> -> vector<16x256xf32>
    %185 = vector.broadcast %19 : vector<16x1xf32> to vector<16x256xf32>
    %186 = arith.addf %184, %185 : vector<16x256xf32>
    %187 = arith.negf %186 : vector<16x256xf32>
    %188 = math.exp %187 : vector<16x256xf32>
    %cst_77 = arith.constant 1.000000e+00 : f32
    %189 = vector.broadcast %cst_77 : f32 to vector<16x256xf32>
    %190 = arith.addf %189, %188 : vector<16x256xf32>
    %191 = arith.divf %189, %190 : vector<16x256xf32>
    %192 = arith.mulf %186, %191 : vector<16x256xf32>
    %c0_78 = arith.constant 0 : index
    %c0_79 = arith.constant 0 : index
    %c0_80 = arith.constant 0 : index
    %193 = vector.load %arg15[%c0_78, %c0_79, %c0_80] : memref<2x16x256xf32, #tpu.memory_space<vmem>>, vector<1x16x256xf32>
    %194 = vector.shape_cast %193 : vector<1x16x256xf32> to vector<16x256xf32>
    %195 = vector.shape_cast %192 : vector<16x256xf32> to vector<1x16x256xf32>
    tpu.vector_store %arg15[%c0_78, %c0_79, %c0_80], %195 {strides = array<i32>} : memref<2x16x256xf32, #tpu.memory_space<vmem>>, vector<1x16x256xf32>,
    %c1_81 = arith.constant 1 : index
    %c0_82 = arith.constant 0 : index
    %c0_83 = arith.constant 0 : index
    %196 = vector.load %arg1[%c1_81, %c0_82, %c0_83] : memref<2x4x256xf32, #tpu.memory_space<vmem>>, vector<1x4x256xf32>
    %197 = vector.shape_cast %196 : vector<1x4x256xf32> to vector<4x256xf32>
    %198 = arith.truncf %197 : vector<4x256xf32> to vector<4x256xbf16>
    %cst_84 = arith.constant dense<0.000000e+00> : vector<16x256xf32>
    %199 = tpu.matmul %16, %198, %cst_84 {dimension_numbers = #tpu.dot_dimension_numbers<[1], [0], [0], [1], [0, 0, 1, 1], [], []>} : vector<16x4xbf16>, vector<4x256xbf16>, vector<16x256xf32> -> vector<16x256xf32>
    %200 = vector.broadcast %17 : vector<16x1xf32> to vector<16x256xf32>
    %201 = arith.addf %199, %200 : vector<16x256xf32>
    %202 = arith.negf %201 : vector<16x256xf32>
    %203 = math.exp %202 : vector<16x256xf32>
    %cst_85 = arith.constant 1.000000e+00 : f32
    %204 = vector.broadcast %cst_85 : f32 to vector<16x256xf32>
    %205 = arith.addf %204, %203 : vector<16x256xf32>
    %206 = arith.divf %204, %205 : vector<16x256xf32>
    %207 = arith.mulf %201, %206 : vector<16x256xf32>
    %208 = vector.extract_strided_slice %207 {offsets = [0, 0], sizes = [8, 256], strides = [1, 1]} : vector<16x256xf32> to vector<8x256xf32>
    %209 = vector.extract_strided_slice %207 {offsets = [8, 0], sizes = [8, 256], strides = [1, 1]} : vector<16x256xf32> to vector<8x256xf32>
    %c17_i32_86 = arith.constant 17 : i32
    %210 = tpu.dynamic_rotate %209 by %c17_i32_86 dim 1 : vector<8x256xf32>, i32 -> vector<8x256xf32>
    %211 = vector.broadcast %1 : vector<1x256xf32> to vector<8x256xf32>
    %212 = arith.mulf %210, %211 : vector<8x256xf32>
    %c16_i32_87 = arith.constant 16 : i32
    %213 = tpu.dynamic_rotate %209 by %c16_i32_87 dim 1 : vector<8x256xf32>, i32 -> vector<8x256xf32>
    %214 = vector.broadcast %3 : vector<1x256xf32> to vector<8x256xf32>
    %215 = arith.mulf %213, %214 : vector<8x256xf32>
    %c15_i32_88 = arith.constant 15 : i32
    %216 = tpu.dynamic_rotate %209 by %c15_i32_88 dim 1 : vector<8x256xf32>, i32 -> vector<8x256xf32>
    %217 = vector.broadcast %5 : vector<1x256xf32> to vector<8x256xf32>
    %218 = arith.mulf %216, %217 : vector<8x256xf32>
    %c1_i32_89 = arith.constant 1 : i32
    %219 = tpu.dynamic_rotate %209 by %c1_i32_89 dim 1 : vector<8x256xf32>, i32 -> vector<8x256xf32>
    %220 = vector.broadcast %7 : vector<1x256xf32> to vector<8x256xf32>
    %221 = arith.mulf %219, %220 : vector<8x256xf32>
    %c255_i32_90 = arith.constant 255 : i32
    %222 = tpu.dynamic_rotate %209 by %c255_i32_90 dim 1 : vector<8x256xf32>, i32 -> vector<8x256xf32>
    %223 = vector.broadcast %9 : vector<1x256xf32> to vector<8x256xf32>
    %224 = arith.mulf %222, %223 : vector<8x256xf32>
    %c241_i32_91 = arith.constant 241 : i32
    %225 = tpu.dynamic_rotate %209 by %c241_i32_91 dim 1 : vector<8x256xf32>, i32 -> vector<8x256xf32>
    %226 = vector.broadcast %11 : vector<1x256xf32> to vector<8x256xf32>
    %227 = arith.mulf %225, %226 : vector<8x256xf32>
    %c240_i32_92 = arith.constant 240 : i32
    %228 = tpu.dynamic_rotate %209 by %c240_i32_92 dim 1 : vector<8x256xf32>, i32 -> vector<8x256xf32>
    %229 = vector.broadcast %13 : vector<1x256xf32> to vector<8x256xf32>
    %230 = arith.mulf %228, %229 : vector<8x256xf32>
    %c239_i32_93 = arith.constant 239 : i32
    %231 = tpu.dynamic_rotate %209 by %c239_i32_93 dim 1 : vector<8x256xf32>, i32 -> vector<8x256xf32>
    %232 = vector.broadcast %15 : vector<1x256xf32> to vector<8x256xf32>
    %233 = arith.mulf %231, %232 : vector<8x256xf32>
    %234 = tpu.concatenate %212, %215, %218, %221, %209, %224, %227, %230, %233 in 0 : vector<8x256xf32>, vector<8x256xf32>, vector<8x256xf32>, vector<8x256xf32>, vector<8x256xf32>, vector<8x256xf32>, vector<8x256xf32>, vector<8x256xf32>, vector<8x256xf32> -> vector<72x256xf32>
    %235 = arith.truncf %234 : vector<72x256xf32> to vector<72x256xbf16>
    %c0_94 = arith.constant 0 : index
    %c0_95 = arith.constant 0 : index
    %236 = vector.load %arg5[%c0_94, %c0_95] : memref<8x72xbf16, #tpu.memory_space<vmem>>, vector<8x72xbf16>
    %cst_96 = arith.constant dense<0.000000e+00> : vector<8x256xf32>
    %237 = tpu.matmul %236, %235, %cst_96 {dimension_numbers = #tpu.dot_dimension_numbers<[1], [0], [0], [1], [0, 0, 1, 1], [], []>} : vector<8x72xbf16>, vector<72x256xbf16>, vector<8x256xf32> -> vector<8x256xf32>
    %c0_97 = arith.constant 0 : index
    %c0_98 = arith.constant 0 : index
    %238 = vector.load %arg6[%c0_97, %c0_98] : memref<8x1xf32, #tpu.memory_space<vmem>>, vector<8x1xf32>
    %239 = vector.broadcast %238 : vector<8x1xf32> to vector<8x256xf32>
    %240 = arith.addf %237, %239 : vector<8x256xf32>
    %241 = arith.negf %240 : vector<8x256xf32>
    %242 = math.exp %241 : vector<8x256xf32>
    %cst_99 = arith.constant 1.000000e+00 : f32
    %243 = vector.broadcast %cst_99 : f32 to vector<8x256xf32>
    %244 = arith.addf %243, %242 : vector<8x256xf32>
    %245 = arith.divf %243, %244 : vector<8x256xf32>
    %246 = arith.mulf %240, %245 : vector<8x256xf32>
    %c17_i32_100 = arith.constant 17 : i32
    %247 = tpu.dynamic_rotate %246 by %c17_i32_100 dim 1 : vector<8x256xf32>, i32 -> vector<8x256xf32>
    %248 = vector.broadcast %1 : vector<1x256xf32> to vector<8x256xf32>
    %249 = arith.mulf %247, %248 : vector<8x256xf32>
    %c16_i32_101 = arith.constant 16 : i32
    %250 = tpu.dynamic_rotate %246 by %c16_i32_101 dim 1 : vector<8x256xf32>, i32 -> vector<8x256xf32>
    %251 = vector.broadcast %3 : vector<1x256xf32> to vector<8x256xf32>
    %252 = arith.mulf %250, %251 : vector<8x256xf32>
    %c15_i32_102 = arith.constant 15 : i32
    %253 = tpu.dynamic_rotate %246 by %c15_i32_102 dim 1 : vector<8x256xf32>, i32 -> vector<8x256xf32>
    %254 = vector.broadcast %5 : vector<1x256xf32> to vector<8x256xf32>
    %255 = arith.mulf %253, %254 : vector<8x256xf32>
    %c1_i32_103 = arith.constant 1 : i32
    %256 = tpu.dynamic_rotate %246 by %c1_i32_103 dim 1 : vector<8x256xf32>, i32 -> vector<8x256xf32>
    %257 = vector.broadcast %7 : vector<1x256xf32> to vector<8x256xf32>
    %258 = arith.mulf %256, %257 : vector<8x256xf32>
    %c255_i32_104 = arith.constant 255 : i32
    %259 = tpu.dynamic_rotate %246 by %c255_i32_104 dim 1 : vector<8x256xf32>, i32 -> vector<8x256xf32>
    %260 = vector.broadcast %9 : vector<1x256xf32> to vector<8x256xf32>
    %261 = arith.mulf %259, %260 : vector<8x256xf32>
    %c241_i32_105 = arith.constant 241 : i32
    %262 = tpu.dynamic_rotate %246 by %c241_i32_105 dim 1 : vector<8x256xf32>, i32 -> vector<8x256xf32>
    %263 = vector.broadcast %11 : vector<1x256xf32> to vector<8x256xf32>
    %264 = arith.mulf %262, %263 : vector<8x256xf32>
    %c240_i32_106 = arith.constant 240 : i32
    %265 = tpu.dynamic_rotate %246 by %c240_i32_106 dim 1 : vector<8x256xf32>, i32 -> vector<8x256xf32>
    %266 = vector.broadcast %13 : vector<1x256xf32> to vector<8x256xf32>
    %267 = arith.mulf %265, %266 : vector<8x256xf32>
    %c239_i32_107 = arith.constant 239 : i32
    %268 = tpu.dynamic_rotate %246 by %c239_i32_107 dim 1 : vector<8x256xf32>, i32 -> vector<8x256xf32>
    %269 = vector.broadcast %15 : vector<1x256xf32> to vector<8x256xf32>
    %270 = arith.mulf %268, %269 : vector<8x256xf32>
    %271 = tpu.concatenate %249, %252, %255, %258, %246, %261, %264, %267, %270 in 0 : vector<8x256xf32>, vector<8x256xf32>, vector<8x256xf32>, vector<8x256xf32>, vector<8x256xf32>, vector<8x256xf32>, vector<8x256xf32>, vector<8x256xf32>, vector<8x256xf32> -> vector<72x256xf32>
    %272 = arith.truncf %271 : vector<72x256xf32> to vector<72x256xbf16>
    %c0_108 = arith.constant 0 : index
    %c0_109 = arith.constant 0 : index
    %273 = vector.load %arg7[%c0_108, %c0_109] : memref<8x72xbf16, #tpu.memory_space<vmem>>, vector<8x72xbf16>
    %cst_110 = arith.constant dense<0.000000e+00> : vector<8x256xf32>
    %274 = tpu.matmul %273, %272, %cst_110 {dimension_numbers = #tpu.dot_dimension_numbers<[1], [0], [0], [1], [0, 0, 1, 1], [], []>} : vector<8x72xbf16>, vector<72x256xbf16>, vector<8x256xf32> -> vector<8x256xf32>
    %c0_111 = arith.constant 0 : index
    %c0_112 = arith.constant 0 : index
    %275 = vector.load %arg8[%c0_111, %c0_112] : memref<8x1xf32, #tpu.memory_space<vmem>>, vector<8x1xf32>
    %276 = vector.broadcast %275 : vector<8x1xf32> to vector<8x256xf32>
    %277 = arith.addf %274, %276 : vector<8x256xf32>
    %278 = arith.negf %277 : vector<8x256xf32>
    %279 = math.exp %278 : vector<8x256xf32>
    %cst_113 = arith.constant 1.000000e+00 : f32
    %280 = vector.broadcast %cst_113 : f32 to vector<8x256xf32>
    %281 = arith.addf %280, %279 : vector<8x256xf32>
    %282 = arith.divf %280, %281 : vector<8x256xf32>
    %283 = arith.mulf %277, %282 : vector<8x256xf32>
    %c17_i32_114 = arith.constant 17 : i32
    %284 = tpu.dynamic_rotate %283 by %c17_i32_114 dim 1 : vector<8x256xf32>, i32 -> vector<8x256xf32>
    %285 = vector.broadcast %1 : vector<1x256xf32> to vector<8x256xf32>
    %286 = arith.mulf %284, %285 : vector<8x256xf32>
    %c16_i32_115 = arith.constant 16 : i32
    %287 = tpu.dynamic_rotate %283 by %c16_i32_115 dim 1 : vector<8x256xf32>, i32 -> vector<8x256xf32>
    %288 = vector.broadcast %3 : vector<1x256xf32> to vector<8x256xf32>
    %289 = arith.mulf %287, %288 : vector<8x256xf32>
    %c15_i32_116 = arith.constant 15 : i32
    %290 = tpu.dynamic_rotate %283 by %c15_i32_116 dim 1 : vector<8x256xf32>, i32 -> vector<8x256xf32>
    %291 = vector.broadcast %5 : vector<1x256xf32> to vector<8x256xf32>
    %292 = arith.mulf %290, %291 : vector<8x256xf32>
    %c1_i32_117 = arith.constant 1 : i32
    %293 = tpu.dynamic_rotate %283 by %c1_i32_117 dim 1 : vector<8x256xf32>, i32 -> vector<8x256xf32>
    %294 = vector.broadcast %7 : vector<1x256xf32> to vector<8x256xf32>
    %295 = arith.mulf %293, %294 : vector<8x256xf32>
    %c255_i32_118 = arith.constant 255 : i32
    %296 = tpu.dynamic_rotate %283 by %c255_i32_118 dim 1 : vector<8x256xf32>, i32 -> vector<8x256xf32>
    %297 = vector.broadcast %9 : vector<1x256xf32> to vector<8x256xf32>
    %298 = arith.mulf %296, %297 : vector<8x256xf32>
    %c241_i32_119 = arith.constant 241 : i32
    %299 = tpu.dynamic_rotate %283 by %c241_i32_119 dim 1 : vector<8x256xf32>, i32 -> vector<8x256xf32>
    %300 = vector.broadcast %11 : vector<1x256xf32> to vector<8x256xf32>
    %301 = arith.mulf %299, %300 : vector<8x256xf32>
    %c240_i32_120 = arith.constant 240 : i32
    %302 = tpu.dynamic_rotate %283 by %c240_i32_120 dim 1 : vector<8x256xf32>, i32 -> vector<8x256xf32>
    %303 = vector.broadcast %13 : vector<1x256xf32> to vector<8x256xf32>
    %304 = arith.mulf %302, %303 : vector<8x256xf32>
    %c239_i32_121 = arith.constant 239 : i32
    %305 = tpu.dynamic_rotate %283 by %c239_i32_121 dim 1 : vector<8x256xf32>, i32 -> vector<8x256xf32>
    %306 = vector.broadcast %15 : vector<1x256xf32> to vector<8x256xf32>
    %307 = arith.mulf %305, %306 : vector<8x256xf32>
    %308 = tpu.concatenate %286, %289, %292, %295, %283, %298, %301, %304, %307 in 0 : vector<8x256xf32>, vector<8x256xf32>, vector<8x256xf32>, vector<8x256xf32>, vector<8x256xf32>, vector<8x256xf32>, vector<8x256xf32>, vector<8x256xf32>, vector<8x256xf32> -> vector<72x256xf32>
    %309 = arith.truncf %308 : vector<72x256xf32> to vector<72x256xbf16>
    %c0_122 = arith.constant 0 : index
    %c0_123 = arith.constant 0 : index
    %310 = vector.load %arg9[%c0_122, %c0_123] : memref<8x72xbf16, #tpu.memory_space<vmem>>, vector<8x72xbf16>
    %cst_124 = arith.constant dense<0.000000e+00> : vector<8x256xf32>
    %311 = tpu.matmul %310, %309, %cst_124 {dimension_numbers = #tpu.dot_dimension_numbers<[1], [0], [0], [1], [0, 0, 1, 1], [], []>} : vector<8x72xbf16>, vector<72x256xbf16>, vector<8x256xf32> -> vector<8x256xf32>
    %c0_125 = arith.constant 0 : index
    %c0_126 = arith.constant 0 : index
    %312 = vector.load %arg10[%c0_125, %c0_126] : memref<8x1xf32, #tpu.memory_space<vmem>>, vector<8x1xf32>
    %313 = vector.broadcast %312 : vector<8x1xf32> to vector<8x256xf32>
    %314 = arith.addf %311, %313 : vector<8x256xf32>
    %315 = arith.negf %314 : vector<8x256xf32>
    %316 = math.exp %315 : vector<8x256xf32>
    %cst_127 = arith.constant 1.000000e+00 : f32
    %317 = vector.broadcast %cst_127 : f32 to vector<8x256xf32>
    %318 = arith.addf %317, %316 : vector<8x256xf32>
    %319 = arith.divf %317, %318 : vector<8x256xf32>
    %320 = arith.mulf %314, %319 : vector<8x256xf32>
    %c17_i32_128 = arith.constant 17 : i32
    %321 = tpu.dynamic_rotate %320 by %c17_i32_128 dim 1 : vector<8x256xf32>, i32 -> vector<8x256xf32>
    %322 = vector.broadcast %1 : vector<1x256xf32> to vector<8x256xf32>
    %323 = arith.mulf %321, %322 : vector<8x256xf32>
    %c16_i32_129 = arith.constant 16 : i32
    %324 = tpu.dynamic_rotate %320 by %c16_i32_129 dim 1 : vector<8x256xf32>, i32 -> vector<8x256xf32>
    %325 = vector.broadcast %3 : vector<1x256xf32> to vector<8x256xf32>
    %326 = arith.mulf %324, %325 : vector<8x256xf32>
    %c15_i32_130 = arith.constant 15 : i32
    %327 = tpu.dynamic_rotate %320 by %c15_i32_130 dim 1 : vector<8x256xf32>, i32 -> vector<8x256xf32>
    %328 = vector.broadcast %5 : vector<1x256xf32> to vector<8x256xf32>
    %329 = arith.mulf %327, %328 : vector<8x256xf32>
    %c1_i32_131 = arith.constant 1 : i32
    %330 = tpu.dynamic_rotate %320 by %c1_i32_131 dim 1 : vector<8x256xf32>, i32 -> vector<8x256xf32>
    %331 = vector.broadcast %7 : vector<1x256xf32> to vector<8x256xf32>
    %332 = arith.mulf %330, %331 : vector<8x256xf32>
    %c255_i32_132 = arith.constant 255 : i32
    %333 = tpu.dynamic_rotate %320 by %c255_i32_132 dim 1 : vector<8x256xf32>, i32 -> vector<8x256xf32>
    %334 = vector.broadcast %9 : vector<1x256xf32> to vector<8x256xf32>
    %335 = arith.mulf %333, %334 : vector<8x256xf32>
    %c241_i32_133 = arith.constant 241 : i32
    %336 = tpu.dynamic_rotate %320 by %c241_i32_133 dim 1 : vector<8x256xf32>, i32 -> vector<8x256xf32>
    %337 = vector.broadcast %11 : vector<1x256xf32> to vector<8x256xf32>
    %338 = arith.mulf %336, %337 : vector<8x256xf32>
    %c240_i32_134 = arith.constant 240 : i32
    %339 = tpu.dynamic_rotate %320 by %c240_i32_134 dim 1 : vector<8x256xf32>, i32 -> vector<8x256xf32>
    %340 = vector.broadcast %13 : vector<1x256xf32> to vector<8x256xf32>
    %341 = arith.mulf %339, %340 : vector<8x256xf32>
    %c239_i32_135 = arith.constant 239 : i32
    %342 = tpu.dynamic_rotate %320 by %c239_i32_135 dim 1 : vector<8x256xf32>, i32 -> vector<8x256xf32>
    %343 = vector.broadcast %15 : vector<1x256xf32> to vector<8x256xf32>
    %344 = arith.mulf %342, %343 : vector<8x256xf32>
    %345 = tpu.concatenate %323, %326, %329, %332, %320, %335, %338, %341, %344 in 0 : vector<8x256xf32>, vector<8x256xf32>, vector<8x256xf32>, vector<8x256xf32>, vector<8x256xf32>, vector<8x256xf32>, vector<8x256xf32>, vector<8x256xf32>, vector<8x256xf32> -> vector<72x256xf32>
    %346 = arith.truncf %345 : vector<72x256xf32> to vector<72x256xbf16>
    %c0_136 = arith.constant 0 : index
    %c0_137 = arith.constant 0 : index
    %347 = vector.load %arg11[%c0_136, %c0_137] : memref<8x72xbf16, #tpu.memory_space<vmem>>, vector<8x72xbf16>
    %cst_138 = arith.constant dense<0.000000e+00> : vector<8x256xf32>
    %348 = tpu.matmul %347, %346, %cst_138 {dimension_numbers = #tpu.dot_dimension_numbers<[1], [0], [0], [1], [0, 0, 1, 1], [], []>} : vector<8x72xbf16>, vector<72x256xbf16>, vector<8x256xf32> -> vector<8x256xf32>
    %c0_139 = arith.constant 0 : index
    %c0_140 = arith.constant 0 : index
    %349 = vector.load %arg12[%c0_139, %c0_140] : memref<8x1xf32, #tpu.memory_space<vmem>>, vector<8x1xf32>
    %350 = vector.broadcast %349 : vector<8x1xf32> to vector<8x256xf32>
    %351 = arith.addf %348, %350 : vector<8x256xf32>
    %352 = arith.negf %351 : vector<8x256xf32>
    %353 = math.exp %352 : vector<8x256xf32>
    %cst_141 = arith.constant 1.000000e+00 : f32
    %354 = vector.broadcast %cst_141 : f32 to vector<8x256xf32>
    %355 = arith.addf %354, %353 : vector<8x256xf32>
    %356 = arith.divf %354, %355 : vector<8x256xf32>
    %357 = arith.mulf %351, %356 : vector<8x256xf32>
    %358 = tpu.concatenate %357, %283, %209, %208 in 0 : vector<8x256xf32>, vector<8x256xf32>, vector<8x256xf32>, vector<8x256xf32> -> vector<32x256xf32>
    %359 = arith.truncf %358 : vector<32x256xf32> to vector<32x256xbf16>
    %cst_142 = arith.constant dense<0.000000e+00> : vector<16x256xf32>
    %360 = tpu.matmul %18, %359, %cst_142 {dimension_numbers = #tpu.dot_dimension_numbers<[1], [0], [0], [1], [0, 0, 1, 1], [], []>} : vector<16x32xbf16>, vector<32x256xbf16>, vector<16x256xf32> -> vector<16x256xf32>
    %361 = vector.broadcast %19 : vector<16x1xf32> to vector<16x256xf32>
    %362 = arith.addf %360, %361 : vector<16x256xf32>
    %363 = arith.negf %362 : vector<16x256xf32>
    %364 = math.exp %363 : vector<16x256xf32>
    %cst_143 = arith.constant 1.000000e+00 : f32
    %365 = vector.broadcast %cst_143 : f32 to vector<16x256xf32>
    %366 = arith.addf %365, %364 : vector<16x256xf32>
    %367 = arith.divf %365, %366 : vector<16x256xf32>
    %368 = arith.mulf %362, %367 : vector<16x256xf32>
    %c1_144 = arith.constant 1 : index
    %c0_145 = arith.constant 0 : index
    %c0_146 = arith.constant 0 : index
    %369 = vector.load %arg15[%c1_144, %c0_145, %c0_146] : memref<2x16x256xf32, #tpu.memory_space<vmem>>, vector<1x16x256xf32>
    %370 = vector.shape_cast %369 : vector<1x16x256xf32> to vector<16x256xf32>
    %371 = vector.shape_cast %368 : vector<16x256xf32> to vector<1x16x256xf32>
    tpu.vector_store %arg15[%c1_144, %c0_145, %c0_146], %371 {strides = array<i32>} : memref<2x16x256xf32, #tpu.memory_space<vmem>>, vector<1x16x256xf32>,
    return
  }
  func.func @transform_0(%arg0: i32) -> (i32, i32, i32) {
    %c0_i32 = arith.constant 0 : i32
    %c0_i32_0 = arith.constant 0 : i32
    %c0_i32_1 = arith.constant 0 : i32
    return %arg0, %c0_i32, %c0_i32_0 : i32, i32, i32
  }
  func.func @transform_1(%arg0: i32) -> (i32, i32, i32) {
    %c0_i32 = arith.constant 0 : i32
    %c0_i32_0 = arith.constant 0 : i32
    %c0_i32_1 = arith.constant 0 : i32
    %c0_i32_2 = arith.constant 0 : i32
    return %c0_i32, %c0_i32_0, %c0_i32_1 : i32, i32, i32
  }
  func.func @transform_2(%arg0: i32) -> (i32, i32) {
    %c0_i32 = arith.constant 0 : i32
    %c0_i32_0 = arith.constant 0 : i32
    %c0_i32_1 = arith.constant 0 : i32
    return %c0_i32, %c0_i32_0 : i32, i32
  }
  func.func @transform_3(%arg0: i32) -> (i32, i32) {
    %c0_i32 = arith.constant 0 : i32
    %c0_i32_0 = arith.constant 0 : i32
    %c0_i32_1 = arith.constant 0 : i32
    return %c0_i32, %c0_i32_0 : i32, i32
  }
  func.func @transform_4(%arg0: i32) -> (i32, i32) {
    %c0_i32 = arith.constant 0 : i32
    %c0_i32_0 = arith.constant 0 : i32
    %c0_i32_1 = arith.constant 0 : i32
    return %c0_i32, %c0_i32_0 : i32, i32
  }
  func.func @transform_5(%arg0: i32) -> (i32, i32) {
    %c0_i32 = arith.constant 0 : i32
    %c0_i32_0 = arith.constant 0 : i32
    %c0_i32_1 = arith.constant 0 : i32
    return %c0_i32, %c0_i32_0 : i32, i32
  }
  func.func @transform_6(%arg0: i32) -> (i32, i32) {
    %c0_i32 = arith.constant 0 : i32
    %c0_i32_0 = arith.constant 0 : i32
    %c0_i32_1 = arith.constant 0 : i32
    return %c0_i32, %c0_i32_0 : i32, i32
  }
  func.func @transform_7(%arg0: i32) -> (i32, i32) {
    %c0_i32 = arith.constant 0 : i32
    %c0_i32_0 = arith.constant 0 : i32
    %c0_i32_1 = arith.constant 0 : i32
    return %c0_i32, %c0_i32_0 : i32, i32
  }
  func.func @transform_8(%arg0: i32) -> (i32, i32) {
    %c0_i32 = arith.constant 0 : i32
    %c0_i32_0 = arith.constant 0 : i32
    %c0_i32_1 = arith.constant 0 : i32
    return %c0_i32, %c0_i32_0 : i32, i32
  }
  func.func @transform_9(%arg0: i32) -> (i32, i32) {
    %c0_i32 = arith.constant 0 : i32
    %c0_i32_0 = arith.constant 0 : i32
    %c0_i32_1 = arith.constant 0 : i32
    return %c0_i32, %c0_i32_0 : i32, i32
  }
  func.func @transform_10(%arg0: i32) -> (i32, i32) {
    %c0_i32 = arith.constant 0 : i32
    %c0_i32_0 = arith.constant 0 : i32
    %c0_i32_1 = arith.constant 0 : i32
    return %c0_i32, %c0_i32_0 : i32, i32
  }
  func.func @transform_11(%arg0: i32) -> (i32, i32) {
    %c0_i32 = arith.constant 0 : i32
    %c0_i32_0 = arith.constant 0 : i32
    %c0_i32_1 = arith.constant 0 : i32
    return %c0_i32, %c0_i32_0 : i32, i32
  }
  func.func @transform_12(%arg0: i32) -> (i32, i32) {
    %c0_i32 = arith.constant 0 : i32
    %c0_i32_0 = arith.constant 0 : i32
    %c0_i32_1 = arith.constant 0 : i32
    return %c0_i32, %c0_i32_0 : i32, i32
  }
  func.func @transform_13(%arg0: i32) -> (i32, i32) {
    %c0_i32 = arith.constant 0 : i32
    %c0_i32_0 = arith.constant 0 : i32
    %c0_i32_1 = arith.constant 0 : i32
    return %c0_i32, %c0_i32_0 : i32, i32
  }
  func.func @transform_14(%arg0: i32) -> (i32, i32, i32) {
    %c0_i32 = arith.constant 0 : i32
    %c0_i32_0 = arith.constant 0 : i32
    %c0_i32_1 = arith.constant 0 : i32
    return %arg0, %c0_i32, %c0_i32_0 : i32, i32, i32
  }
}

module attributes {stable_mosaic.version = 11 : i64} {
  func.func @kernel(%arg0: i32, %arg1: memref<2x4x256xf32, #tpu.memory_space<vmem>>, %arg2: memref<8x1x256xf32, #tpu.memory_space<vmem>>, %arg3: memref<16x4xbf16, #tpu.memory_space<vmem>>, %arg4: memref<16x1xf32, #tpu.memory_space<vmem>>, %arg5: memref<8x72xbf16, #tpu.memory_space<vmem>>, %arg6: memref<8x1xf32, #tpu.memory_space<vmem>>, %arg7: memref<8x72xbf16, #tpu.memory_space<vmem>>, %arg8: memref<8x1xf32, #tpu.memory_space<vmem>>, %arg9: memref<8x72xbf16, #tpu.memory_space<vmem>>, %arg10: memref<8x1xf32, #tpu.memory_space<vmem>>, %arg11: memref<8x72xbf16, #tpu.memory_space<vmem>>, %arg12: memref<8x1xf32, #tpu.memory_space<vmem>>, %arg13: memref<16x32xbf16, #tpu.memory_space<vmem>>, %arg14: memref<16x1xf32, #tpu.memory_space<vmem>>, %arg15: memref<2x16x256xf32, #tpu.memory_space<vmem>>) attributes {dimension_semantics = [#tpu.dimension_semantics<parallel>], iteration_bounds = array<i64: 1>, scalar_prefetch = 0 : i64, scratch_operands = 0 : i64, tpu.core_type = #tpu.core_type<tc>, window_params = [{transform_indices = @transform_0, window_bounds = array<i64: 2, 4, 256>}, {pipeline_mode = #tpu.pipeline_mode<synchronous>, transform_indices = @transform_1, window_bounds = array<i64: 8, 1, 256>}, {pipeline_mode = #tpu.pipeline_mode<synchronous>, transform_indices = @transform_2, window_bounds = array<i64: 16, 4>}, {pipeline_mode = #tpu.pipeline_mode<synchronous>, transform_indices = @transform_3, window_bounds = array<i64: 16, 1>}, {pipeline_mode = #tpu.pipeline_mode<synchronous>, transform_indices = @transform_4, window_bounds = array<i64: 8, 72>}, {pipeline_mode = #tpu.pipeline_mode<synchronous>, transform_indices = @transform_5, window_bounds = array<i64: 8, 1>}, {pipeline_mode = #tpu.pipeline_mode<synchronous>, transform_indices = @transform_6, window_bounds = array<i64: 8, 72>}, {pipeline_mode = #tpu.pipeline_mode<synchronous>, transform_indices = @transform_7, window_bounds = array<i64: 8, 1>}, {pipeline_mode = #tpu.pipeline_mode<synchronous>, transform_indices = @transform_8, window_bounds = array<i64: 8, 72>}, {pipeline_mode = #tpu.pipeline_mode<synchronous>, transform_indices = @transform_9, window_bounds = array<i64: 8, 1>}, {pipeline_mode = #tpu.pipeline_mode<synchronous>, transform_indices = @transform_10, window_bounds = array<i64: 8, 72>}, {pipeline_mode = #tpu.pipeline_mode<synchronous>, transform_indices = @transform_11, window_bounds = array<i64: 8, 1>}, {pipeline_mode = #tpu.pipeline_mode<synchronous>, transform_indices = @transform_12, window_bounds = array<i64: 16, 32>}, {pipeline_mode = #tpu.pipeline_mode<synchronous>, transform_indices = @transform_13, window_bounds = array<i64: 16, 1>}, {transform_indices = @transform_14, window_bounds = array<i64: 2, 16, 256>}]} {
    %c0 = arith.constant 0 : index
    %c0_0 = arith.constant 0 : index
    %c0_1 = arith.constant 0 : index
    %0 = vector.load %arg2[%c0, %c0_0, %c0_1] : memref<8x1x256xf32, #tpu.memory_space<vmem>>, vector<1x1x256xf32>
    %1 = vector.shape_cast %0 : vector<1x1x256xf32> to vector<1x256xf32>
    %c1 = arith.constant 1 : index
    %c0_2 = arith.constant 0 : index
    %c0_3 = arith.constant 0 : index
    %2 = vector.load %arg2[%c1, %c0_2, %c0_3] : memref<8x1x256xf32, #tpu.memory_space<vmem>>, vector<1x1x256xf32>
    %3 = vector.shape_cast %2 : vector<1x1x256xf32> to vector<1x256xf32>
    %c2 = arith.constant 2 : index
    %c0_4 = arith.constant 0 : index
    %c0_5 = arith.constant 0 : index
    %4 = vector.load %arg2[%c2, %c0_4, %c0_5] : memref<8x1x256xf32, #tpu.memory_space<vmem>>, vector<1x1x256xf32>
    %5 = vector.shape_cast %4 : vector<1x1x256xf32> to vector<1x256xf32>
    %c3 = arith.constant 3 : index
    %c0_6 = arith.constant 0 : index
    %c0_7 = arith.constant 0 : index
    %6 = vector.load %arg2[%c3, %c0_6, %c0_7] : memref<8x1x256xf32, #tpu.memory_space<vmem>>, vector<1x1x256xf32>
    %7 = vector.shape_cast %6 : vector<1x1x256xf32> to vector<1x256xf32>
    %c4 = arith.constant 4 : index
    %c0_8 = arith.constant 0 : index
    %c0_9 = arith.constant 0 : index
    %8 = vector.load %arg2[%c4, %c0_8, %c0_9] : memref<8x1x256xf32, #tpu.memory_space<vmem>>, vector<1x1x256xf32>
    %9 = vector.shape_cast %8 : vector<1x1x256xf32> to vector<1x256xf32>
    %c5 = arith.constant 5 : index
    %c0_10 = arith.constant 0 : index
    %c0_11 = arith.constant 0 : index
    %10 = vector.load %arg2[%c5, %c0_10, %c0_11] : memref<8x1x256xf32, #tpu.memory_space<vmem>>, vector<1x1x256xf32>
    %11 = vector.shape_cast %10 : vector<1x1x256xf32> to vector<1x256xf32>
    %c6 = arith.constant 6 : index
    %c0_12 = arith.constant 0 : index
    %c0_13 = arith.constant 0 : index
    %12 = vector.load %arg2[%c6, %c0_12, %c0_13] : memref<8x1x256xf32, #tpu.memory_space<vmem>>, vector<1x1x256xf32>
    %13 = vector.shape_cast %12 : vector<1x1x256xf32> to vector<1x256xf32>
    %c7 = arith.constant 7 : index
    %c0_14 = arith.constant 0 : index
    %c0_15 = arith.constant 0 : index
    %14 = vector.load %arg2[%c7, %c0_14, %c0_15] : memref<8x1x256xf32, #tpu.memory_space<vmem>>, vector<1x1x256xf32>
    %15 = vector.shape_cast %14 : vector<1x1x256xf32> to vector<1x256xf32>
    %c0_16 = arith.constant 0 : index
    %c0_17 = arith.constant 0 : index
    %16 = vector.load %arg3[%c0_16, %c0_17] : memref<16x4xbf16, #tpu.memory_space<vmem>>, vector<16x4xbf16>
    %c0_18 = arith.constant 0 : index
    %c0_19 = arith.constant 0 : index
    %17 = vector.load %arg4[%c0_18, %c0_19] : memref<16x1xf32, #tpu.memory_space<vmem>>, vector<16x1xf32>
    %c0_20 = arith.constant 0 : index
    %c0_21 = arith.constant 0 : index
    %18 = vector.load %arg13[%c0_20, %c0_21] : memref<16x32xbf16, #tpu.memory_space<vmem>>, vector<16x32xbf16>
    %c0_22 = arith.constant 0 : index
    %c0_23 = arith.constant 0 : index
    %19 = vector.load %arg14[%c0_22, %c0_23] : memref<16x1xf32, #tpu.memory_space<vmem>>, vector<16x1xf32>
    %c0_24 = arith.constant 0 : index
    %c0_25 = arith.constant 0 : index
    %c0_26 = arith.constant 0 : index
    %20 = vector.load %arg1[%c0_24, %c0_25, %c0_26] : memref<2x4x256xf32, #tpu.memory_space<vmem>>, vector<1x4x256xf32>
    %21 = vector.shape_cast %20 : vector<1x4x256xf32> to vector<4x256xf32>
    %22 = arith.truncf %21 : vector<4x256xf32> to vector<4x256xbf16>
    %cst = arith.constant dense<0.000000e+00> : vector<16x256xf32>
    %23 = tpu.matmul %16, %22, %cst {dimension_numbers = #tpu.dot_dimension_numbers<[1], [0], [0], [1], [0, 0, 1, 1], [], []>} : vector<16x4xbf16>, vector<4x256xbf16>, vector<16x256xf32> -> vector<16x256xf32>
    %24 = vector.broadcast %17 : vector<16x1xf32> to vector<16x256xf32>
    %25 = arith.addf %23, %24 : vector<16x256xf32>
    %26 = arith.negf %25 : vector<16x256xf32>
    %27 = math.exp %26 : vector<16x256xf32>
    %cst_27 = arith.constant 1.000000e+00 : f32
    %28 = vector.broadcast %cst_27 : f32 to vector<16x256xf32>
    %29 = arith.addf %28, %27 : vector<16x256xf32>
    %30 = arith.divf %28, %29 : vector<16x256xf32>
    %31 = arith.mulf %25, %30 : vector<16x256xf32>
    %32 = vector.extract_strided_slice %31 {offsets = [0, 0], sizes = [8, 256], strides = [1, 1]} : vector<16x256xf32> to vector<8x256xf32>
    %33 = vector.extract_strided_slice %31 {offsets = [8, 0], sizes = [8, 256], strides = [1, 1]} : vector<16x256xf32> to vector<8x256xf32>
    %c17_i32 = arith.constant 17 : i32
    %34 = tpu.dynamic_rotate %33 by %c17_i32 dim 1 : vector<8x256xf32>, i32 -> vector<8x256xf32>
    %35 = vector.broadcast %1 : vector<1x256xf32> to vector<8x256xf32>
    %36 = arith.mulf %34, %35 : vector<8x256xf32>
    %c16_i32 = arith.constant 16 : i32
    %37 = tpu.dynamic_rotate %33 by %c16_i32 dim 1 : vector<8x256xf32>, i32 -> vector<8x256xf32>
    %38 = vector.broadcast %3 : vector<1x256xf32> to vector<8x256xf32>
    %39 = arith.mulf %37, %38 : vector<8x256xf32>
    %c15_i32 = arith.constant 15 : i32
    %40 = tpu.dynamic_rotate %33 by %c15_i32 dim 1 : vector<8x256xf32>, i32 -> vector<8x256xf32>
    %41 = vector.broadcast %5 : vector<1x256xf32> to vector<8x256xf32>
    %42 = arith.mulf %40, %41 : vector<8x256xf32>
    %c1_i32 = arith.constant 1 : i32
    %43 = tpu.dynamic_rotate %33 by %c1_i32 dim 1 : vector<8x256xf32>, i32 -> vector<8x256xf32>
    %44 = vector.broadcast %7 : vector<1x256xf32> to vector<8x256xf32>
    %45 = arith.mulf %43, %44 : vector<8x256xf32>
    %c255_i32 = arith.constant 255 : i32
    %46 = tpu.dynamic_rotate %33 by %c255_i32 dim 1 : vector<8x256xf32>, i32 -> vector<8x256xf32>
    %47 = vector.broadcast %9 : vector<1x256xf32> to vector<8x256xf32>
    %48 = arith.mulf %46, %47 : vector<8x256xf32>
    %c241_i32 = arith.constant 241 : i32
    %49 = tpu.dynamic_rotate %33 by %c241_i32 dim 1 : vector<8x256xf32>, i32 -> vector<8x256xf32>
    %50 = vector.broadcast %11 : vector<1x256xf32> to vector<8x256xf32>
    %51 = arith.mulf %49, %50 : vector<8x256xf32>
    %c240_i32 = arith.constant 240 : i32
    %52 = tpu.dynamic_rotate %33 by %c240_i32 dim 1 : vector<8x256xf32>, i32 -> vector<8x256xf32>
    %53 = vector.broadcast %13 : vector<1x256xf32> to vector<8x256xf32>
    %54 = arith.mulf %52, %53 : vector<8x256xf32>
    %c239_i32 = arith.constant 239 : i32
    %55 = tpu.dynamic_rotate %33 by %c239_i32 dim 1 : vector<8x256xf32>, i32 -> vector<8x256xf32>
    %56 = vector.broadcast %15 : vector<1x256xf32> to vector<8x256xf32>
    %57 = arith.mulf %55, %56 : vector<8x256xf32>
    %58 = tpu.concatenate %36, %39, %42, %45, %33, %48, %51, %54, %57 in 0 : vector<8x256xf32>, vector<8x256xf32>, vector<8x256xf32>, vector<8x256xf32>, vector<8x256xf32>, vector<8x256xf32>, vector<8x256xf32>, vector<8x256xf32>, vector<8x256xf32> -> vector<72x256xf32>
    %59 = arith.truncf %58 : vector<72x256xf32> to vector<72x256xbf16>
    %c0_28 = arith.constant 0 : index
    %c0_29 = arith.constant 0 : index
    %60 = vector.load %arg5[%c0_28, %c0_29] : memref<8x72xbf16, #tpu.memory_space<vmem>>, vector<8x72xbf16>
    %cst_30 = arith.constant dense<0.000000e+00> : vector<8x256xf32>
    %61 = tpu.matmul %60, %59, %cst_30 {dimension_numbers = #tpu.dot_dimension_numbers<[1], [0], [0], [1], [0, 0, 1, 1], [], []>} : vector<8x72xbf16>, vector<72x256xbf16>, vector<8x256xf32> -> vector<8x256xf32>
    %c0_31 = arith.constant 0 : index
    %c0_32 = arith.constant 0 : index
    %62 = vector.load %arg6[%c0_31, %c0_32] : memref<8x1xf32, #tpu.memory_space<vmem>>, vector<8x1xf32>
    %63 = vector.broadcast %62 : vector<8x1xf32> to vector<8x256xf32>
    %64 = arith.addf %61, %63 : vector<8x256xf32>
    %65 = arith.negf %64 : vector<8x256xf32>
    %66 = math.exp %65 : vector<8x256xf32>
    %cst_33 = arith.constant 1.000000e+00 : f32
    %67 = vector.broadcast %cst_33 : f32 to vector<8x256xf32>
    %68 = arith.addf %67, %66 : vector<8x256xf32>
    %69 = arith.divf %67, %68 : vector<8x256xf32>
    %70 = arith.mulf %64, %69 : vector<8x256xf32>
    %c17_i32_34 = arith.constant 17 : i32
    %71 = tpu.dynamic_rotate %70 by %c17_i32_34 dim 1 : vector<8x256xf32>, i32 -> vector<8x256xf32>
    %72 = vector.broadcast %1 : vector<1x256xf32> to vector<8x256xf32>
    %73 = arith.mulf %71, %72 : vector<8x256xf32>
    %c16_i32_35 = arith.constant 16 : i32
    %74 = tpu.dynamic_rotate %70 by %c16_i32_35 dim 1 : vector<8x256xf32>, i32 -> vector<8x256xf32>
    %75 = vector.broadcast %3 : vector<1x256xf32> to vector<8x256xf32>
    %76 = arith.mulf %74, %75 : vector<8x256xf32>
    %c15_i32_36 = arith.constant 15 : i32
    %77 = tpu.dynamic_rotate %70 by %c15_i32_36 dim 1 : vector<8x256xf32>, i32 -> vector<8x256xf32>
    %78 = vector.broadcast %5 : vector<1x256xf32> to vector<8x256xf32>
    %79 = arith.mulf %77, %78 : vector<8x256xf32>
    %c1_i32_37 = arith.constant 1 : i32
    %80 = tpu.dynamic_rotate %70 by %c1_i32_37 dim 1 : vector<8x256xf32>, i32 -> vector<8x256xf32>
    %81 = vector.broadcast %7 : vector<1x256xf32> to vector<8x256xf32>
    %82 = arith.mulf %80, %81 : vector<8x256xf32>
    %c255_i32_38 = arith.constant 255 : i32
    %83 = tpu.dynamic_rotate %70 by %c255_i32_38 dim 1 : vector<8x256xf32>, i32 -> vector<8x256xf32>
    %84 = vector.broadcast %9 : vector<1x256xf32> to vector<8x256xf32>
    %85 = arith.mulf %83, %84 : vector<8x256xf32>
    %c241_i32_39 = arith.constant 241 : i32
    %86 = tpu.dynamic_rotate %70 by %c241_i32_39 dim 1 : vector<8x256xf32>, i32 -> vector<8x256xf32>
    %87 = vector.broadcast %11 : vector<1x256xf32> to vector<8x256xf32>
    %88 = arith.mulf %86, %87 : vector<8x256xf32>
    %c240_i32_40 = arith.constant 240 : i32
    %89 = tpu.dynamic_rotate %70 by %c240_i32_40 dim 1 : vector<8x256xf32>, i32 -> vector<8x256xf32>
    %90 = vector.broadcast %13 : vector<1x256xf32> to vector<8x256xf32>
    %91 = arith.mulf %89, %90 : vector<8x256xf32>
    %c239_i32_41 = arith.constant 239 : i32
    %92 = tpu.dynamic_rotate %70 by %c239_i32_41 dim 1 : vector<8x256xf32>, i32 -> vector<8x256xf32>
    %93 = vector.broadcast %15 : vector<1x256xf32> to vector<8x256xf32>
    %94 = arith.mulf %92, %93 : vector<8x256xf32>
    %95 = tpu.concatenate %73, %76, %79, %82, %70, %85, %88, %91, %94 in 0 : vector<8x256xf32>, vector<8x256xf32>, vector<8x256xf32>, vector<8x256xf32>, vector<8x256xf32>, vector<8x256xf32>, vector<8x256xf32>, vector<8x256xf32>, vector<8x256xf32> -> vector<72x256xf32>
    %96 = arith.truncf %95 : vector<72x256xf32> to vector<72x256xbf16>
    %c0_42 = arith.constant 0 : index
    %c0_43 = arith.constant 0 : index
    %97 = vector.load %arg7[%c0_42, %c0_43] : memref<8x72xbf16, #tpu.memory_space<vmem>>, vector<8x72xbf16>
    %cst_44 = arith.constant dense<0.000000e+00> : vector<8x256xf32>
    %98 = tpu.matmul %97, %96, %cst_44 {dimension_numbers = #tpu.dot_dimension_numbers<[1], [0], [0], [1], [0, 0, 1, 1], [], []>} : vector<8x72xbf16>, vector<72x256xbf16>, vector<8x256xf32> -> vector<8x256xf32>
    %c0_45 = arith.constant 0 : index
    %c0_46 = arith.constant 0 : index
    %99 = vector.load %arg8[%c0_45, %c0_46] : memref<8x1xf32, #tpu.memory_space<vmem>>, vector<8x1xf32>
    %100 = vector.broadcast %99 : vector<8x1xf32> to vector<8x256xf32>
    %101 = arith.addf %98, %100 : vector<8x256xf32>
    %102 = arith.negf %101 : vector<8x256xf32>
    %103 = math.exp %102 : vector<8x256xf32>
    %cst_47 = arith.constant 1.000000e+00 : f32
    %104 = vector.broadcast %cst_47 : f32 to vector<8x256xf32>
    %105 = arith.addf %104, %103 : vector<8x256xf32>
    %106 = arith.divf %104, %105 : vector<8x256xf32>
    %107 = arith.mulf %101, %106 : vector<8x256xf32>
    %c17_i32_48 = arith.constant 17 : i32
    %108 = tpu.dynamic_rotate %107 by %c17_i32_48 dim 1 : vector<8x256xf32>, i32 -> vector<8x256xf32>
    %109 = vector.broadcast %1 : vector<1x256xf32> to vector<8x256xf32>
    %110 = arith.mulf %108, %109 : vector<8x256xf32>
    %c16_i32_49 = arith.constant 16 : i32
    %111 = tpu.dynamic_rotate %107 by %c16_i32_49 dim 1 : vector<8x256xf32>, i32 -> vector<8x256xf32>
    %112 = vector.broadcast %3 : vector<1x256xf32> to vector<8x256xf32>
    %113 = arith.mulf %111, %112 : vector<8x256xf32>
    %c15_i32_50 = arith.constant 15 : i32
    %114 = tpu.dynamic_rotate %107 by %c15_i32_50 dim 1 : vector<8x256xf32>, i32 -> vector<8x256xf32>
    %115 = vector.broadcast %5 : vector<1x256xf32> to vector<8x256xf32>
    %116 = arith.mulf %114, %115 : vector<8x256xf32>
    %c1_i32_51 = arith.constant 1 : i32
    %117 = tpu.dynamic_rotate %107 by %c1_i32_51 dim 1 : vector<8x256xf32>, i32 -> vector<8x256xf32>
    %118 = vector.broadcast %7 : vector<1x256xf32> to vector<8x256xf32>
    %119 = arith.mulf %117, %118 : vector<8x256xf32>
    %c255_i32_52 = arith.constant 255 : i32
    %120 = tpu.dynamic_rotate %107 by %c255_i32_52 dim 1 : vector<8x256xf32>, i32 -> vector<8x256xf32>
    %121 = vector.broadcast %9 : vector<1x256xf32> to vector<8x256xf32>
    %122 = arith.mulf %120, %121 : vector<8x256xf32>
    %c241_i32_53 = arith.constant 241 : i32
    %123 = tpu.dynamic_rotate %107 by %c241_i32_53 dim 1 : vector<8x256xf32>, i32 -> vector<8x256xf32>
    %124 = vector.broadcast %11 : vector<1x256xf32> to vector<8x256xf32>
    %125 = arith.mulf %123, %124 : vector<8x256xf32>
    %c240_i32_54 = arith.constant 240 : i32
    %126 = tpu.dynamic_rotate %107 by %c240_i32_54 dim 1 : vector<8x256xf32>, i32 -> vector<8x256xf32>
    %127 = vector.broadcast %13 : vector<1x256xf32> to vector<8x256xf32>
    %128 = arith.mulf %126, %127 : vector<8x256xf32>
    %c239_i32_55 = arith.constant 239 : i32
    %129 = tpu.dynamic_rotate %107 by %c239_i32_55 dim 1 : vector<8x256xf32>, i32 -> vector<8x256xf32>
    %130 = vector.broadcast %15 : vector<1x256xf32> to vector<8x256xf32>
    %131 = arith.mulf %129, %130 : vector<8x256xf32>
    %132 = tpu.concatenate %110, %113, %116, %119, %107, %122, %125, %128, %131 in 0 : vector<8x256xf32>, vector<8x256xf32>, vector<8x256xf32>, vector<8x256xf32>, vector<8x256xf32>, vector<8x256xf32>, vector<8x256xf32>, vector<8x256xf32>, vector<8x256xf32> -> vector<72x256xf32>
    %133 = arith.truncf %132 : vector<72x256xf32> to vector<72x256xbf16>
    %c0_56 = arith.constant 0 : index
    %c0_57 = arith.constant 0 : index
    %134 = vector.load %arg9[%c0_56, %c0_57] : memref<8x72xbf16, #tpu.memory_space<vmem>>, vector<8x72xbf16>
    %cst_58 = arith.constant dense<0.000000e+00> : vector<8x256xf32>
    %135 = tpu.matmul %134, %133, %cst_58 {dimension_numbers = #tpu.dot_dimension_numbers<[1], [0], [0], [1], [0, 0, 1, 1], [], []>} : vector<8x72xbf16>, vector<72x256xbf16>, vector<8x256xf32> -> vector<8x256xf32>
    %c0_59 = arith.constant 0 : index
    %c0_60 = arith.constant 0 : index
    %136 = vector.load %arg10[%c0_59, %c0_60] : memref<8x1xf32, #tpu.memory_space<vmem>>, vector<8x1xf32>
    %137 = vector.broadcast %136 : vector<8x1xf32> to vector<8x256xf32>
    %138 = arith.addf %135, %137 : vector<8x256xf32>
    %139 = arith.negf %138 : vector<8x256xf32>
    %140 = math.exp %139 : vector<8x256xf32>
    %cst_61 = arith.constant 1.000000e+00 : f32
    %141 = vector.broadcast %cst_61 : f32 to vector<8x256xf32>
    %142 = arith.addf %141, %140 : vector<8x256xf32>
    %143 = arith.divf %141, %142 : vector<8x256xf32>
    %144 = arith.mulf %138, %143 : vector<8x256xf32>
    %c17_i32_62 = arith.constant 17 : i32
    %145 = tpu.dynamic_rotate %144 by %c17_i32_62 dim 1 : vector<8x256xf32>, i32 -> vector<8x256xf32>
    %146 = vector.broadcast %1 : vector<1x256xf32> to vector<8x256xf32>
    %147 = arith.mulf %145, %146 : vector<8x256xf32>
    %c16_i32_63 = arith.constant 16 : i32
    %148 = tpu.dynamic_rotate %144 by %c16_i32_63 dim 1 : vector<8x256xf32>, i32 -> vector<8x256xf32>
    %149 = vector.broadcast %3 : vector<1x256xf32> to vector<8x256xf32>
    %150 = arith.mulf %148, %149 : vector<8x256xf32>
    %c15_i32_64 = arith.constant 15 : i32
    %151 = tpu.dynamic_rotate %144 by %c15_i32_64 dim 1 : vector<8x256xf32>, i32 -> vector<8x256xf32>
    %152 = vector.broadcast %5 : vector<1x256xf32> to vector<8x256xf32>
    %153 = arith.mulf %151, %152 : vector<8x256xf32>
    %c1_i32_65 = arith.constant 1 : i32
    %154 = tpu.dynamic_rotate %144 by %c1_i32_65 dim 1 : vector<8x256xf32>, i32 -> vector<8x256xf32>
    %155 = vector.broadcast %7 : vector<1x256xf32> to vector<8x256xf32>
    %156 = arith.mulf %154, %155 : vector<8x256xf32>
    %c255_i32_66 = arith.constant 255 : i32
    %157 = tpu.dynamic_rotate %144 by %c255_i32_66 dim 1 : vector<8x256xf32>, i32 -> vector<8x256xf32>
    %158 = vector.broadcast %9 : vector<1x256xf32> to vector<8x256xf32>
    %159 = arith.mulf %157, %158 : vector<8x256xf32>
    %c241_i32_67 = arith.constant 241 : i32
    %160 = tpu.dynamic_rotate %144 by %c241_i32_67 dim 1 : vector<8x256xf32>, i32 -> vector<8x256xf32>
    %161 = vector.broadcast %11 : vector<1x256xf32> to vector<8x256xf32>
    %162 = arith.mulf %160, %161 : vector<8x256xf32>
    %c240_i32_68 = arith.constant 240 : i32
    %163 = tpu.dynamic_rotate %144 by %c240_i32_68 dim 1 : vector<8x256xf32>, i32 -> vector<8x256xf32>
    %164 = vector.broadcast %13 : vector<1x256xf32> to vector<8x256xf32>
    %165 = arith.mulf %163, %164 : vector<8x256xf32>
    %c239_i32_69 = arith.constant 239 : i32
    %166 = tpu.dynamic_rotate %144 by %c239_i32_69 dim 1 : vector<8x256xf32>, i32 -> vector<8x256xf32>
    %167 = vector.broadcast %15 : vector<1x256xf32> to vector<8x256xf32>
    %168 = arith.mulf %166, %167 : vector<8x256xf32>
    %169 = tpu.concatenate %147, %150, %153, %156, %144, %159, %162, %165, %168 in 0 : vector<8x256xf32>, vector<8x256xf32>, vector<8x256xf32>, vector<8x256xf32>, vector<8x256xf32>, vector<8x256xf32>, vector<8x256xf32>, vector<8x256xf32>, vector<8x256xf32> -> vector<72x256xf32>
    %170 = arith.truncf %169 : vector<72x256xf32> to vector<72x256xbf16>
    %c0_70 = arith.constant 0 : index
    %c0_71 = arith.constant 0 : index
    %171 = vector.load %arg11[%c0_70, %c0_71] : memref<8x72xbf16, #tpu.memory_space<vmem>>, vector<8x72xbf16>
    %cst_72 = arith.constant dense<0.000000e+00> : vector<8x256xf32>
    %172 = tpu.matmul %171, %170, %cst_72 {dimension_numbers = #tpu.dot_dimension_numbers<[1], [0], [0], [1], [0, 0, 1, 1], [], []>} : vector<8x72xbf16>, vector<72x256xbf16>, vector<8x256xf32> -> vector<8x256xf32>
    %c0_73 = arith.constant 0 : index
    %c0_74 = arith.constant 0 : index
    %173 = vector.load %arg12[%c0_73, %c0_74] : memref<8x1xf32, #tpu.memory_space<vmem>>, vector<8x1xf32>
    %174 = vector.broadcast %173 : vector<8x1xf32> to vector<8x256xf32>
    %175 = arith.addf %172, %174 : vector<8x256xf32>
    %176 = arith.negf %175 : vector<8x256xf32>
    %177 = math.exp %176 : vector<8x256xf32>
    %cst_75 = arith.constant 1.000000e+00 : f32
    %178 = vector.broadcast %cst_75 : f32 to vector<8x256xf32>
    %179 = arith.addf %178, %177 : vector<8x256xf32>
    %180 = arith.divf %178, %179 : vector<8x256xf32>
    %181 = arith.mulf %175, %180 : vector<8x256xf32>
    %182 = tpu.concatenate %181, %107, %33, %32 in 0 : vector<8x256xf32>, vector<8x256xf32>, vector<8x256xf32>, vector<8x256xf32> -> vector<32x256xf32>
    %183 = arith.truncf %182 : vector<32x256xf32> to vector<32x256xbf16>
    %cst_76 = arith.constant dense<0.000000e+00> : vector<16x256xf32>
    %184 = tpu.matmul %18, %183, %cst_76 {dimension_numbers = #tpu.dot_dimension_numbers<[1], [0], [0], [1], [0, 0, 1, 1], [], []>} : vector<16x32xbf16>, vector<32x256xbf16>, vector<16x256xf32> -> vector<16x256xf32>
    %185 = vector.broadcast %19 : vector<16x1xf32> to vector<16x256xf32>
    %186 = arith.addf %184, %185 : vector<16x256xf32>
    %187 = arith.negf %186 : vector<16x256xf32>
    %188 = math.exp %187 : vector<16x256xf32>
    %cst_77 = arith.constant 1.000000e+00 : f32
    %189 = vector.broadcast %cst_77 : f32 to vector<16x256xf32>
    %190 = arith.addf %189, %188 : vector<16x256xf32>
    %191 = arith.divf %189, %190 : vector<16x256xf32>
    %192 = arith.mulf %186, %191 : vector<16x256xf32>
    %c0_78 = arith.constant 0 : index
    %c0_79 = arith.constant 0 : index
    %c0_80 = arith.constant 0 : index
    %193 = vector.load %arg15[%c0_78, %c0_79, %c0_80] : memref<2x16x256xf32, #tpu.memory_space<vmem>>, vector<1x16x256xf32>
    %194 = vector.shape_cast %193 : vector<1x16x256xf32> to vector<16x256xf32>
    %195 = vector.shape_cast %192 : vector<16x256xf32> to vector<1x16x256xf32>
    tpu.vector_store %arg15[%c0_78, %c0_79, %c0_80], %195 {strides = array<i32>} : memref<2x16x256xf32, #tpu.memory_space<vmem>>, vector<1x16x256xf32>,
    %c1_81 = arith.constant 1 : index
    %c0_82 = arith.constant 0 : index
    %c0_83 = arith.constant 0 : index
    %196 = vector.load %arg1[%c1_81, %c0_82, %c0_83] : memref<2x4x256xf32, #tpu.memory_space<vmem>>, vector<1x4x256xf32>
    %197 = vector.shape_cast %196 : vector<1x4x256xf32> to vector<4x256xf32>
    %198 = arith.truncf %197 : vector<4x256xf32> to vector<4x256xbf16>
    %cst_84 = arith.constant dense<0.000000e+00> : vector<16x256xf32>
    %199 = tpu.matmul %16, %198, %cst_84 {dimension_numbers = #tpu.dot_dimension_numbers<[1], [0], [0], [1], [0, 0, 1, 1], [], []>} : vector<16x4xbf16>, vector<4x256xbf16>, vector<16x256xf32> -> vector<16x256xf32>
    %200 = vector.broadcast %17 : vector<16x1xf32> to vector<16x256xf32>
    %201 = arith.addf %199, %200 : vector<16x256xf32>
    %202 = arith.negf %201 : vector<16x256xf32>
    %203 = math.exp %202 : vector<16x256xf32>
    %cst_85 = arith.constant 1.000000e+00 : f32
    %204 = vector.broadcast %cst_85 : f32 to vector<16x256xf32>
    %205 = arith.addf %204, %203 : vector<16x256xf32>
    %206 = arith.divf %204, %205 : vector<16x256xf32>
    %207 = arith.mulf %201, %206 : vector<16x256xf32>
    %208 = vector.extract_strided_slice %207 {offsets = [0, 0], sizes = [8, 256], strides = [1, 1]} : vector<16x256xf32> to vector<8x256xf32>
    %209 = vector.extract_strided_slice %207 {offsets = [8, 0], sizes = [8, 256], strides = [1, 1]} : vector<16x256xf32> to vector<8x256xf32>
    %c17_i32_86 = arith.constant 17 : i32
    %210 = tpu.dynamic_rotate %209 by %c17_i32_86 dim 1 : vector<8x256xf32>, i32 -> vector<8x256xf32>
    %211 = vector.broadcast %1 : vector<1x256xf32> to vector<8x256xf32>
    %212 = arith.mulf %210, %211 : vector<8x256xf32>
    %c16_i32_87 = arith.constant 16 : i32
    %213 = tpu.dynamic_rotate %209 by %c16_i32_87 dim 1 : vector<8x256xf32>, i32 -> vector<8x256xf32>
    %214 = vector.broadcast %3 : vector<1x256xf32> to vector<8x256xf32>
    %215 = arith.mulf %213, %214 : vector<8x256xf32>
    %c15_i32_88 = arith.constant 15 : i32
    %216 = tpu.dynamic_rotate %209 by %c15_i32_88 dim 1 : vector<8x256xf32>, i32 -> vector<8x256xf32>
    %217 = vector.broadcast %5 : vector<1x256xf32> to vector<8x256xf32>
    %218 = arith.mulf %216, %217 : vector<8x256xf32>
    %c1_i32_89 = arith.constant 1 : i32
    %219 = tpu.dynamic_rotate %209 by %c1_i32_89 dim 1 : vector<8x256xf32>, i32 -> vector<8x256xf32>
    %220 = vector.broadcast %7 : vector<1x256xf32> to vector<8x256xf32>
    %221 = arith.mulf %219, %220 : vector<8x256xf32>
    %c255_i32_90 = arith.constant 255 : i32
    %222 = tpu.dynamic_rotate %209 by %c255_i32_90 dim 1 : vector<8x256xf32>, i32 -> vector<8x256xf32>
    %223 = vector.broadcast %9 : vector<1x256xf32> to vector<8x256xf32>
    %224 = arith.mulf %222, %223 : vector<8x256xf32>
    %c241_i32_91 = arith.constant 241 : i32
    %225 = tpu.dynamic_rotate %209 by %c241_i32_91 dim 1 : vector<8x256xf32>, i32 -> vector<8x256xf32>
    %226 = vector.broadcast %11 : vector<1x256xf32> to vector<8x256xf32>
    %227 = arith.mulf %225, %226 : vector<8x256xf32>
    %c240_i32_92 = arith.constant 240 : i32
    %228 = tpu.dynamic_rotate %209 by %c240_i32_92 dim 1 : vector<8x256xf32>, i32 -> vector<8x256xf32>
    %229 = vector.broadcast %13 : vector<1x256xf32> to vector<8x256xf32>
    %230 = arith.mulf %228, %229 : vector<8x256xf32>
    %c239_i32_93 = arith.constant 239 : i32
    %231 = tpu.dynamic_rotate %209 by %c239_i32_93 dim 1 : vector<8x256xf32>, i32 -> vector<8x256xf32>
    %232 = vector.broadcast %15 : vector<1x256xf32> to vector<8x256xf32>
    %233 = arith.mulf %231, %232 : vector<8x256xf32>
    %234 = tpu.concatenate %212, %215, %218, %221, %209, %224, %227, %230, %233 in 0 : vector<8x256xf32>, vector<8x256xf32>, vector<8x256xf32>, vector<8x256xf32>, vector<8x256xf32>, vector<8x256xf32>, vector<8x256xf32>, vector<8x256xf32>, vector<8x256xf32> -> vector<72x256xf32>
    %235 = arith.truncf %234 : vector<72x256xf32> to vector<72x256xbf16>
    %c0_94 = arith.constant 0 : index
    %c0_95 = arith.constant 0 : index
    %236 = vector.load %arg5[%c0_94, %c0_95] : memref<8x72xbf16, #tpu.memory_space<vmem>>, vector<8x72xbf16>
    %cst_96 = arith.constant dense<0.000000e+00> : vector<8x256xf32>
    %237 = tpu.matmul %236, %235, %cst_96 {dimension_numbers = #tpu.dot_dimension_numbers<[1], [0], [0], [1], [0, 0, 1, 1], [], []>} : vector<8x72xbf16>, vector<72x256xbf16>, vector<8x256xf32> -> vector<8x256xf32>
    %c0_97 = arith.constant 0 : index
    %c0_98 = arith.constant 0 : index
    %238 = vector.load %arg6[%c0_97, %c0_98] : memref<8x1xf32, #tpu.memory_space<vmem>>, vector<8x1xf32>
    %239 = vector.broadcast %238 : vector<8x1xf32> to vector<8x256xf32>
    %240 = arith.addf %237, %239 : vector<8x256xf32>
    %241 = arith.negf %240 : vector<8x256xf32>
    %242 = math.exp %241 : vector<8x256xf32>
    %cst_99 = arith.constant 1.000000e+00 : f32
    %243 = vector.broadcast %cst_99 : f32 to vector<8x256xf32>
    %244 = arith.addf %243, %242 : vector<8x256xf32>
    %245 = arith.divf %243, %244 : vector<8x256xf32>
    %246 = arith.mulf %240, %245 : vector<8x256xf32>
    %c17_i32_100 = arith.constant 17 : i32
    %247 = tpu.dynamic_rotate %246 by %c17_i32_100 dim 1 : vector<8x256xf32>, i32 -> vector<8x256xf32>
    %248 = vector.broadcast %1 : vector<1x256xf32> to vector<8x256xf32>
    %249 = arith.mulf %247, %248 : vector<8x256xf32>
    %c16_i32_101 = arith.constant 16 : i32
    %250 = tpu.dynamic_rotate %246 by %c16_i32_101 dim 1 : vector<8x256xf32>, i32 -> vector<8x256xf32>
    %251 = vector.broadcast %3 : vector<1x256xf32> to vector<8x256xf32>
    %252 = arith.mulf %250, %251 : vector<8x256xf32>
    %c15_i32_102 = arith.constant 15 : i32
    %253 = tpu.dynamic_rotate %246 by %c15_i32_102 dim 1 : vector<8x256xf32>, i32 -> vector<8x256xf32>
    %254 = vector.broadcast %5 : vector<1x256xf32> to vector<8x256xf32>
    %255 = arith.mulf %253, %254 : vector<8x256xf32>
    %c1_i32_103 = arith.constant 1 : i32
    %256 = tpu.dynamic_rotate %246 by %c1_i32_103 dim 1 : vector<8x256xf32>, i32 -> vector<8x256xf32>
    %257 = vector.broadcast %7 : vector<1x256xf32> to vector<8x256xf32>
    %258 = arith.mulf %256, %257 : vector<8x256xf32>
    %c255_i32_104 = arith.constant 255 : i32
    %259 = tpu.dynamic_rotate %246 by %c255_i32_104 dim 1 : vector<8x256xf32>, i32 -> vector<8x256xf32>
    %260 = vector.broadcast %9 : vector<1x256xf32> to vector<8x256xf32>
    %261 = arith.mulf %259, %260 : vector<8x256xf32>
    %c241_i32_105 = arith.constant 241 : i32
    %262 = tpu.dynamic_rotate %246 by %c241_i32_105 dim 1 : vector<8x256xf32>, i32 -> vector<8x256xf32>
    %263 = vector.broadcast %11 : vector<1x256xf32> to vector<8x256xf32>
    %264 = arith.mulf %262, %263 : vector<8x256xf32>
    %c240_i32_106 = arith.constant 240 : i32
    %265 = tpu.dynamic_rotate %246 by %c240_i32_106 dim 1 : vector<8x256xf32>, i32 -> vector<8x256xf32>
    %266 = vector.broadcast %13 : vector<1x256xf32> to vector<8x256xf32>
    %267 = arith.mulf %265, %266 : vector<8x256xf32>
    %c239_i32_107 = arith.constant 239 : i32
    %268 = tpu.dynamic_rotate %246 by %c239_i32_107 dim 1 : vector<8x256xf32>, i32 -> vector<8x256xf32>
    %269 = vector.broadcast %15 : vector<1x256xf32> to vector<8x256xf32>
    %270 = arith.mulf %268, %269 : vector<8x256xf32>
    %271 = tpu.concatenate %249, %252, %255, %258, %246, %261, %264, %267, %270 in 0 : vector<8x256xf32>, vector<8x256xf32>, vector<8x256xf32>, vector<8x256xf32>, vector<8x256xf32>, vector<8x256xf32>, vector<8x256xf32>, vector<8x256xf32>, vector<8x256xf32> -> vector<72x256xf32>
    %272 = arith.truncf %271 : vector<72x256xf32> to vector<72x256xbf16>
    %c0_108 = arith.constant 0 : index
    %c0_109 = arith.constant 0 : index
    %273 = vector.load %arg7[%c0_108, %c0_109] : memref<8x72xbf16, #tpu.memory_space<vmem>>, vector<8x72xbf16>
    %cst_110 = arith.constant dense<0.000000e+00> : vector<8x256xf32>
    %274 = tpu.matmul %273, %272, %cst_110 {dimension_numbers = #tpu.dot_dimension_numbers<[1], [0], [0], [1], [0, 0, 1, 1], [], []>} : vector<8x72xbf16>, vector<72x256xbf16>, vector<8x256xf32> -> vector<8x256xf32>
    %c0_111 = arith.constant 0 : index
    %c0_112 = arith.constant 0 : index
    %275 = vector.load %arg8[%c0_111, %c0_112] : memref<8x1xf32, #tpu.memory_space<vmem>>, vector<8x1xf32>
    %276 = vector.broadcast %275 : vector<8x1xf32> to vector<8x256xf32>
    %277 = arith.addf %274, %276 : vector<8x256xf32>
    %278 = arith.negf %277 : vector<8x256xf32>
    %279 = math.exp %278 : vector<8x256xf32>
    %cst_113 = arith.constant 1.000000e+00 : f32
    %280 = vector.broadcast %cst_113 : f32 to vector<8x256xf32>
    %281 = arith.addf %280, %279 : vector<8x256xf32>
    %282 = arith.divf %280, %281 : vector<8x256xf32>
    %283 = arith.mulf %277, %282 : vector<8x256xf32>
    %c17_i32_114 = arith.constant 17 : i32
    %284 = tpu.dynamic_rotate %283 by %c17_i32_114 dim 1 : vector<8x256xf32>, i32 -> vector<8x256xf32>
    %285 = vector.broadcast %1 : vector<1x256xf32> to vector<8x256xf32>
    %286 = arith.mulf %284, %285 : vector<8x256xf32>
    %c16_i32_115 = arith.constant 16 : i32
    %287 = tpu.dynamic_rotate %283 by %c16_i32_115 dim 1 : vector<8x256xf32>, i32 -> vector<8x256xf32>
    %288 = vector.broadcast %3 : vector<1x256xf32> to vector<8x256xf32>
    %289 = arith.mulf %287, %288 : vector<8x256xf32>
    %c15_i32_116 = arith.constant 15 : i32
    %290 = tpu.dynamic_rotate %283 by %c15_i32_116 dim 1 : vector<8x256xf32>, i32 -> vector<8x256xf32>
    %291 = vector.broadcast %5 : vector<1x256xf32> to vector<8x256xf32>
    %292 = arith.mulf %290, %291 : vector<8x256xf32>
    %c1_i32_117 = arith.constant 1 : i32
    %293 = tpu.dynamic_rotate %283 by %c1_i32_117 dim 1 : vector<8x256xf32>, i32 -> vector<8x256xf32>
    %294 = vector.broadcast %7 : vector<1x256xf32> to vector<8x256xf32>
    %295 = arith.mulf %293, %294 : vector<8x256xf32>
    %c255_i32_118 = arith.constant 255 : i32
    %296 = tpu.dynamic_rotate %283 by %c255_i32_118 dim 1 : vector<8x256xf32>, i32 -> vector<8x256xf32>
    %297 = vector.broadcast %9 : vector<1x256xf32> to vector<8x256xf32>
    %298 = arith.mulf %296, %297 : vector<8x256xf32>
    %c241_i32_119 = arith.constant 241 : i32
    %299 = tpu.dynamic_rotate %283 by %c241_i32_119 dim 1 : vector<8x256xf32>, i32 -> vector<8x256xf32>
    %300 = vector.broadcast %11 : vector<1x256xf32> to vector<8x256xf32>
    %301 = arith.mulf %299, %300 : vector<8x256xf32>
    %c240_i32_120 = arith.constant 240 : i32
    %302 = tpu.dynamic_rotate %283 by %c240_i32_120 dim 1 : vector<8x256xf32>, i32 -> vector<8x256xf32>
    %303 = vector.broadcast %13 : vector<1x256xf32> to vector<8x256xf32>
    %304 = arith.mulf %302, %303 : vector<8x256xf32>
    %c239_i32_121 = arith.constant 239 : i32
    %305 = tpu.dynamic_rotate %283 by %c239_i32_121 dim 1 : vector<8x256xf32>, i32 -> vector<8x256xf32>
    %306 = vector.broadcast %15 : vector<1x256xf32> to vector<8x256xf32>
    %307 = arith.mulf %305, %306 : vector<8x256xf32>
    %308 = tpu.concatenate %286, %289, %292, %295, %283, %298, %301, %304, %307 in 0 : vector<8x256xf32>, vector<8x256xf32>, vector<8x256xf32>, vector<8x256xf32>, vector<8x256xf32>, vector<8x256xf32>, vector<8x256xf32>, vector<8x256xf32>, vector<8x256xf32> -> vector<72x256xf32>
    %309 = arith.truncf %308 : vector<72x256xf32> to vector<72x256xbf16>
    %c0_122 = arith.constant 0 : index
    %c0_123 = arith.constant 0 : index
    %310 = vector.load %arg9[%c0_122, %c0_123] : memref<8x72xbf16, #tpu.memory_space<vmem>>, vector<8x72xbf16>
    %cst_124 = arith.constant dense<0.000000e+00> : vector<8x256xf32>
    %311 = tpu.matmul %310, %309, %cst_124 {dimension_numbers = #tpu.dot_dimension_numbers<[1], [0], [0], [1], [0, 0, 1, 1], [], []>} : vector<8x72xbf16>, vector<72x256xbf16>, vector<8x256xf32> -> vector<8x256xf32>
    %c0_125 = arith.constant 0 : index
    %c0_126 = arith.constant 0 : index
    %312 = vector.load %arg10[%c0_125, %c0_126] : memref<8x1xf32, #tpu.memory_space<vmem>>, vector<8x1xf32>
    %313 = vector.broadcast %312 : vector<8x1xf32> to vector<8x256xf32>
    %314 = arith.addf %311, %313 : vector<8x256xf32>
    %315 = arith.negf %314 : vector<8x256xf32>
    %316 = math.exp %315 : vector<8x256xf32>
    %cst_127 = arith.constant 1.000000e+00 : f32
    %317 = vector.broadcast %cst_127 : f32 to vector<8x256xf32>
    %318 = arith.addf %317, %316 : vector<8x256xf32>
    %319 = arith.divf %317, %318 : vector<8x256xf32>
    %320 = arith.mulf %314, %319 : vector<8x256xf32>
    %c17_i32_128 = arith.constant 17 : i32
    %321 = tpu.dynamic_rotate %320 by %c17_i32_128 dim 1 : vector<8x256xf32>, i32 -> vector<8x256xf32>
    %322 = vector.broadcast %1 : vector<1x256xf32> to vector<8x256xf32>
    %323 = arith.mulf %321, %322 : vector<8x256xf32>
    %c16_i32_129 = arith.constant 16 : i32
    %324 = tpu.dynamic_rotate %320 by %c16_i32_129 dim 1 : vector<8x256xf32>, i32 -> vector<8x256xf32>
    %325 = vector.broadcast %3 : vector<1x256xf32> to vector<8x256xf32>
    %326 = arith.mulf %324, %325 : vector<8x256xf32>
    %c15_i32_130 = arith.constant 15 : i32
    %327 = tpu.dynamic_rotate %320 by %c15_i32_130 dim 1 : vector<8x256xf32>, i32 -> vector<8x256xf32>
    %328 = vector.broadcast %5 : vector<1x256xf32> to vector<8x256xf32>
    %329 = arith.mulf %327, %328 : vector<8x256xf32>
    %c1_i32_131 = arith.constant 1 : i32
    %330 = tpu.dynamic_rotate %320 by %c1_i32_131 dim 1 : vector<8x256xf32>, i32 -> vector<8x256xf32>
    %331 = vector.broadcast %7 : vector<1x256xf32> to vector<8x256xf32>
    %332 = arith.mulf %330, %331 : vector<8x256xf32>
    %c255_i32_132 = arith.constant 255 : i32
    %333 = tpu.dynamic_rotate %320 by %c255_i32_132 dim 1 : vector<8x256xf32>, i32 -> vector<8x256xf32>
    %334 = vector.broadcast %9 : vector<1x256xf32> to vector<8x256xf32>
    %335 = arith.mulf %333, %334 : vector<8x256xf32>
    %c241_i32_133 = arith.constant 241 : i32
    %336 = tpu.dynamic_rotate %320 by %c241_i32_133 dim 1 : vector<8x256xf32>, i32 -> vector<8x256xf32>
    %337 = vector.broadcast %11 : vector<1x256xf32> to vector<8x256xf32>
    %338 = arith.mulf %336, %337 : vector<8x256xf32>
    %c240_i32_134 = arith.constant 240 : i32
    %339 = tpu.dynamic_rotate %320 by %c240_i32_134 dim 1 : vector<8x256xf32>, i32 -> vector<8x256xf32>
    %340 = vector.broadcast %13 : vector<1x256xf32> to vector<8x256xf32>
    %341 = arith.mulf %339, %340 : vector<8x256xf32>
    %c239_i32_135 = arith.constant 239 : i32
    %342 = tpu.dynamic_rotate %320 by %c239_i32_135 dim 1 : vector<8x256xf32>, i32 -> vector<8x256xf32>
    %343 = vector.broadcast %15 : vector<1x256xf32> to vector<8x256xf32>
    %344 = arith.mulf %342, %343 : vector<8x256xf32>
    %345 = tpu.concatenate %323, %326, %329, %332, %320, %335, %338, %341, %344 in 0 : vector<8x256xf32>, vector<8x256xf32>, vector<8x256xf32>, vector<8x256xf32>, vector<8x256xf32>, vector<8x256xf32>, vector<8x256xf32>, vector<8x256xf32>, vector<8x256xf32> -> vector<72x256xf32>
    %346 = arith.truncf %345 : vector<72x256xf32> to vector<72x256xbf16>
    %c0_136 = arith.constant 0 : index
    %c0_137 = arith.constant 0 : index
    %347 = vector.load %arg11[%c0_136, %c0_137] : memref<8x72xbf16, #tpu.memory_space<vmem>>, vector<8x72xbf16>
    %cst_138 = arith.constant dense<0.000000e+00> : vector<8x256xf32>
    %348 = tpu.matmul %347, %346, %cst_138 {dimension_numbers = #tpu.dot_dimension_numbers<[1], [0], [0], [1], [0, 0, 1, 1], [], []>} : vector<8x72xbf16>, vector<72x256xbf16>, vector<8x256xf32> -> vector<8x256xf32>
    %c0_139 = arith.constant 0 : index
    %c0_140 = arith.constant 0 : index
    %349 = vector.load %arg12[%c0_139, %c0_140] : memref<8x1xf32, #tpu.memory_space<vmem>>, vector<8x1xf32>
    %350 = vector.broadcast %349 : vector<8x1xf32> to vector<8x256xf32>
    %351 = arith.addf %348, %350 : vector<8x256xf32>
    %352 = arith.negf %351 : vector<8x256xf32>
    %353 = math.exp %352 : vector<8x256xf32>
    %cst_141 = arith.constant 1.000000e+00 : f32
    %354 = vector.broadcast %cst_141 : f32 to vector<8x256xf32>
    %355 = arith.addf %354, %353 : vector<8x256xf32>
    %356 = arith.divf %354, %355 : vector<8x256xf32>
    %357 = arith.mulf %351, %356 : vector<8x256xf32>
    %358 = tpu.concatenate %357, %283, %209, %208 in 0 : vector<8x256xf32>, vector<8x256xf32>, vector<8x256xf32>, vector<8x256xf32> -> vector<32x256xf32>
    %359 = arith.truncf %358 : vector<32x256xf32> to vector<32x256xbf16>
    %cst_142 = arith.constant dense<0.000000e+00> : vector<16x256xf32>
    %360 = tpu.matmul %18, %359, %cst_142 {dimension_numbers = #tpu.dot_dimension_numbers<[1], [0], [0], [1], [0, 0, 1, 1], [], []>} : vector<16x32xbf16>, vector<32x256xbf16>, vector<16x256xf32> -> vector<16x256xf32>
    %361 = vector.broadcast %19 : vector<16x1xf32> to vector<16x256xf32>
    %362 = arith.addf %360, %361 : vector<16x256xf32>
    %363 = arith.negf %362 : vector<16x256xf32>
    %364 = math.exp %363 : vector<16x256xf32>
    %cst_143 = arith.constant 1.000000e+00 : f32
    %365 = vector.broadcast %cst_143 : f32 to vector<16x256xf32>
    %366 = arith.addf %365, %364 : vector<16x256xf32>
    %367 = arith.divf %365, %366 : vector<16x256xf32>
    %368 = arith.mulf %362, %367 : vector<16x256xf32>
    %c1_144 = arith.constant 1 : index
    %c0_145 = arith.constant 0 : index
    %c0_146 = arith.constant 0 : index
    %369 = vector.load %arg15[%c1_144, %c0_145, %c0_146] : memref<2x16x256xf32, #tpu.memory_space<vmem>>, vector<1x16x256xf32>
    %370 = vector.shape_cast %369 : vector<1x16x256xf32> to vector<16x256xf32>
    %371 = vector.shape_cast %368 : vector<16x256xf32> to vector<1x16x256xf32>
    tpu.vector_store %arg15[%c1_144, %c0_145, %c0_146], %371 {strides = array<i32>} : memref<2x16x256xf32, #tpu.memory_space<vmem>>, vector<1x16x256xf32>,
    return
  }
  func.func @transform_0(%arg0: i32) -> (i32, i32, i32) {
    %c0_i32 = arith.constant 0 : i32
    %c0_i32_0 = arith.constant 0 : i32
    %c0_i32_1 = arith.constant 0 : i32
    return %arg0, %c0_i32, %c0_i32_0 : i32, i32, i32
  }
  func.func @transform_1(%arg0: i32) -> (i32, i32, i32) {
    %c0_i32 = arith.constant 0 : i32
    %c0_i32_0 = arith.constant 0 : i32
    %c0_i32_1 = arith.constant 0 : i32
    %c0_i32_2 = arith.constant 0 : i32
    return %c0_i32, %c0_i32_0, %c0_i32_1 : i32, i32, i32
  }
  func.func @transform_2(%arg0: i32) -> (i32, i32) {
    %c0_i32 = arith.constant 0 : i32
    %c0_i32_0 = arith.constant 0 : i32
    %c0_i32_1 = arith.constant 0 : i32
    return %c0_i32, %c0_i32_0 : i32, i32
  }
  func.func @transform_3(%arg0: i32) -> (i32, i32) {
    %c0_i32 = arith.constant 0 : i32
    %c0_i32_0 = arith.constant 0 : i32
    %c0_i32_1 = arith.constant 0 : i32
    return %c0_i32, %c0_i32_0 : i32, i32
  }
  func.func @transform_4(%arg0: i32) -> (i32, i32) {
    %c0_i32 = arith.constant 0 : i32
    %c0_i32_0 = arith.constant 0 : i32
    %c0_i32_1 = arith.constant 0 : i32
    return %c0_i32, %c0_i32_0 : i32, i32
  }
  func.func @transform_5(%arg0: i32) -> (i32, i32) {
    %c0_i32 = arith.constant 0 : i32
    %c0_i32_0 = arith.constant 0 : i32
    %c0_i32_1 = arith.constant 0 : i32
    return %c0_i32, %c0_i32_0 : i32, i32
  }
  func.func @transform_6(%arg0: i32) -> (i32, i32) {
    %c0_i32 = arith.constant 0 : i32
    %c0_i32_0 = arith.constant 0 : i32
    %c0_i32_1 = arith.constant 0 : i32
    return %c0_i32, %c0_i32_0 : i32, i32
  }
  func.func @transform_7(%arg0: i32) -> (i32, i32) {
    %c0_i32 = arith.constant 0 : i32
    %c0_i32_0 = arith.constant 0 : i32
    %c0_i32_1 = arith.constant 0 : i32
    return %c0_i32, %c0_i32_0 : i32, i32
  }
  func.func @transform_8(%arg0: i32) -> (i32, i32) {
    %c0_i32 = arith.constant 0 : i32
    %c0_i32_0 = arith.constant 0 : i32
    %c0_i32_1 = arith.constant 0 : i32
    return %c0_i32, %c0_i32_0 : i32, i32
  }
  func.func @transform_9(%arg0: i32) -> (i32, i32) {
    %c0_i32 = arith.constant 0 : i32
    %c0_i32_0 = arith.constant 0 : i32
    %c0_i32_1 = arith.constant 0 : i32
    return %c0_i32, %c0_i32_0 : i32, i32
  }
  func.func @transform_10(%arg0: i32) -> (i32, i32) {
    %c0_i32 = arith.constant 0 : i32
    %c0_i32_0 = arith.constant 0 : i32
    %c0_i32_1 = arith.constant 0 : i32
    return %c0_i32, %c0_i32_0 : i32, i32
  }
  func.func @transform_11(%arg0: i32) -> (i32, i32) {
    %c0_i32 = arith.constant 0 : i32
    %c0_i32_0 = arith.constant 0 : i32
    %c0_i32_1 = arith.constant 0 : i32
    return %c0_i32, %c0_i32_0 : i32, i32
  }
  func.func @transform_12(%arg0: i32) -> (i32, i32) {
    %c0_i32 = arith.constant 0 : i32
    %c0_i32_0 = arith.constant 0 : i32
    %c0_i32_1 = arith.constant 0 : i32
    return %c0_i32, %c0_i32_0 : i32, i32
  }
  func.func @transform_13(%arg0: i32) -> (i32, i32) {
    %c0_i32 = arith.constant 0 : i32
    %c0_i32_0 = arith.constant 0 : i32
    %c0_i32_1 = arith.constant 0 : i32
    return %c0_i32, %c0_i32_0 : i32, i32
  }
  func.func @transform_14(%arg0: i32) -> (i32, i32, i32) {
    %c0_i32 = arith.constant 0 : i32
    %c0_i32_0 = arith.constant 0 : i32
    %c0_i32_1 = arith.constant 0 : i32
    return %arg0, %c0_i32, %c0_i32_0 : i32, i32, i32
  }
}

</mosaic_0001>

<bundles_post_ra>
// kernel: tpu_custom_call.1
= control target key start
LH: loop header
LB: loop body
LE: loop exit
PB: predicated region body
PF: predicated region fallthrough
CT: control target
= control target key end

     0   :  { %vm97_vm0 = vcmask 1041408   ;;  %v1948_v3 = vmov 0   ;;  %s2983_s0 = inlined_call_operand.vmem [shape: f32[2,4,256], index: 0, kind: input, shape index: {}]   ;;  %s2984_s1 = inlined_call_operand.vmem [shape: f32[8,1,256], index: 1, kind: input, shape index: {}]   ;;  %s2985_s2 = inlined_call_operand.vmem [shape: bf16[16,4], index: 2, kind: input, shape index: {}]   ;;  %s2986_s3 = inlined_call_operand.vmem [shape: f32[16,1], index: 3, kind: input, shape index: {}]   ;;  %s2987_s4 = inlined_call_operand.vmem [shape: bf16[8,72], index: 4, kind: input, shape index: {}]   ;;  %s2988_s5 = inlined_call_operand.vmem [shape: f32[8,1], index: 5, kind: input, shape index: {}]   ;;  %s2989_s6 = inlined_call_operand.vmem [shape: bf16[8,72], index: 6, kind: input, shape index: {}]   ;;  %s2990_s7 = inlined_call_operand.vmem [shape: f32[8,1], index: 7, kind: input, shape index: {}]   ;;  %s2991_s8 = inlined_call_operand.vmem [shape: bf16[8,72], index: 8, kind: input, shape index: {}]   ;;  %s2992_s9 = inlined_call_operand.vmem [shape: f32[8,1], index: 9, kind: input, shape index: {}]   ;;  %s2993_s10 = inlined_call_operand.vmem [shape: bf16[8,72], index: 10, kind: input, shape index: {}]   ;;  %s2994_s11 = inlined_call_operand.vmem [shape: f32[8,1], index: 11, kind: input, shape index: {}]   ;;  %s2995_s12 = inlined_call_operand.vmem [shape: bf16[16,32], index: 12, kind: input, shape index: {}]   ;;  %s2996_s13 = inlined_call_operand.vmem [shape: f32[16,1], index: 13, kind: input, shape index: {}]   ;;  %s2997_s14 = inlined_call_operand.hbm [shape: f32[2,16,256], index: 14, kind: output, shape index: {}]  }
   0x1   :  { %v72_v0 = vld [vmem:[%s2983_s0] sm:$0xff]  ;;  %136 = vmatprep.mubr.bf16.mxu0 %v1948_v3  ;;  %1788 = vset.pattern.permute.xlu0 %v1948_v3  ;;  %v67_v4 = vld [vmem:[%s2986_s3 + $0x8] sm:$0xff] }
   0x2   :  { %v74_v1 = vcombine.high %v72_v0, %v72_v0  ;;  %v76_v2 = vpack.c.bf16 %v72_v0, %v72_v0  ;;  %85 = vperm.xlu0 %1788, %v67_v4   ;;  %397 = vmatprep.mubr.bf16.mxu1 %v1948_v3 }
   0x3   :  { %19 = vsyncpa [#allocation3], 0  ;;  %1789 = vset.pattern.permute.xlu1 %v1948_v3  ;;  %v2049_v7 = vld [vmem:[%s2985_s2] sm:$0xff]   ;;  %vm93_vm1 = vcmask 31744   ;;  %s1949_s2 = smov 16   ;;  %s1950_s19 = smov 17   ;;  %v179_v26 = vlaneseq }
   0x4   :  { %v77_v5 = vpack.c.bf16 %v74_v1, %v74_v1  ;;  %v99_v6 = vsel %vm97_vm0, %v76_v2, 0  ;;  %s1951_s20 = smov 15   ;;  %s1952_s21 = smov 1   ;;  %v348_v25 = vld [vmem:[%s2988_s5] sm:$0xff]  ;;  %v1716_v44 = vld [vmem:[%s2984_s1 + $0x8] sm:$0x3] }
   0x5   :  { %s1953_s22 = smov 127   ;;  %s1954_s23 = smov 113   ;;  %v186_v29 = vshrl.u32 %v179_v26, 7  ;;  %v2101_v30 = vand.u32 127, %v179_v26  ;;  %v1713_v35 = vld [vmem:[%s2984_s1 + $0x2] sm:$0x3] }
   0x6   :  { %1721 = vmatprep.subr.msk.bf16.mxu0 %vm97_vm0, %v77_v5  ;;  %s1955_s24 = smov 112   ;;  %s1956_s25 = smov 111   ;;  %v1715_v36 = vld [vmem:[%s2984_s1 + $0x6] sm:$0x3]  ;;  %v49_v37 = vld [vmem:[%s2984_s1] sm:$0x3] }
   0x7   :  { %105 = vmatpush1.bf16.msra.mxu0 %v99_v6  ;;  %v2103_v33 = vsub.s32 0, %v186_v29  ;;  %v2105_v34 = vsub.s32 1, %v186_v29  ;;  %vm201_vm2 = vcmp.lt.s32.totalorder %v2101_v30, 16  ;;  %v1714_v40 = vld [vmem:[%s2984_s1 + $0x4] sm:$0x3]  ;;  %vm221_vm3 = vcmp.lt.s32.totalorder %v2101_v30, 15 }
   0x8   :  { %vm181_vm4 = vcmp.lt.s32.totalorder %v2101_v30, 17  ;;  %vm241_vm5 = vcmp.lt.s32.totalorder %v2101_v30, 1  ;;  %vm261_vm6 = vcmp.lt.s32.totalorder %v2101_v30, 127  ;;  %vm281_vm7 = vcmp.lt.s32.totalorder %v2101_v30, 113  ;;  %v1719_v29 = vld [vmem:[%s2984_s1 + $0xe] sm:$0x3] }
   0x9   :  { %v2121_v41 = vrot.slane %v1713_v35, %v2105_v34  ;;  %v2124_v42 = vrot.slane %v1713_v35, %v2103_v33  ;;  %v2137_v46 = vrot.slane %v1715_v36, %v2105_v34  ;;  %v2140_v47 = vrot.slane %v49_v37, %v2105_v34 }
   0xa   :  { %1722 = vmatmul.mubr.msk.bf16.vlgmr.msra.gmra.mrb[0].mxu0 %vm93_vm1, %v2049_v7  ;;  %v2143_v48 = vrot.slane %v49_v37, %v2103_v33  ;;  %v2146_v49 = vrot.slane %v1714_v40, %v2105_v34  ;;  %v2149_v50 = vrot.slane %v1715_v36, %v2103_v33  ;;  %v2153_v53 = vrot.slane %v1716_v44, %v2105_v34 }
   0xb   :  { %542 = vmatprep.mubr.bf16.mxu0 %v1948_v3  ;;  %v2171_v0 = vrot.slane %v1714_v40, %v2103_v33  ;;  %vm301_vm8 = vcmp.lt.s32.totalorder %v2101_v30, 112  ;;  %vm321_vm9 = vcmp.lt.s32.totalorder %v2101_v30, 111  ;;  %v2217_v40 = vrot.slane %v1719_v29, %v2105_v34 }
   0xc   :  { %vm358_vm10 = vcmask 1043456   ;;  %vm354_vm11 = vcmask 588800   ;;  %vm874_vm12 = vcmask 261120  }
  0x81   :  { %v2056_v9 = vpop.permute.xlu0 %85 }
  0xdd   :  { %v2054_v8 = vpop.f32.mrb[0].mxu0 }
  0xde   :  { %v2058_v10 = vpop.f32.mrb[1].mxu0 }
  0xdf   :  { %v142_v11 = vpop.f32.mrb[2].mxu0 }
  0xe0   :  { %v143_v12 = vadd.f32 %v142_v11, %v2056_v9  ;;  %v144_v13 = vpop.f32.mrb[3].mxu0 }
  0xe1   :  { %v145_v14 = vadd.f32 %v144_v13, %v2056_v9 }
  0xe2   :  { %v1725_v15 = vmul.f32 -1.442695, %v143_v12 }
  0xe3   :  { %v1726_v16 = vmul.f32 -1.442695, %v145_v14 }
  0xe4   :  { %1794 = vpow2.f32 %v1725_v15 }
  0xe5   :  { %1796 = vpow2.f32 %v1726_v16 }
  0xee   :  { %v1795_v17 = vpop.eup %1794 }
  0xef   :  { %v1797_v18 = vpop.eup %1796  ;;  %v161_v19 = vadd.f32 1.0, %v1795_v17  ;;  %v1717_v17 = vld [vmem:[%s2984_s1 + $0xa] sm:$0x3] }
  0xf0   :  { %v162_v20 = vadd.f32 1.0, %v1797_v18  ;;  %v2195_v26 = vrot.slane %v1717_v17, %v2103_v33 }
  0xf1   :  { %1798 = vrcp.f32 %v161_v19 }
  0xf2   :  { %1800 = vrcp.f32 %v162_v20  ;;  %v1718_v20 = vld [vmem:[%s2984_s1 + $0xc] sm:$0x3] }
  0xfb   :  { %v1799_v21 = vpop.eup %1798 }
  0xfc   :  { %v2062_v22 = vmul.f32 %v1799_v21, %v143_v12  ;;  %v1801_v23 = vpop.eup %1800 }
  0xfd   :  { %v2068_v24 = vmul.f32 %v1801_v23, %v145_v14  ;;  %v2180_v14 = vrot.slane %v1716_v44, %v2103_v33 }
  0xfe   :  { %197 = vrot.lane.b32.xlu1 %v2062_v22, %s1949_s2  ;;  %175 = vrot.lane.b32.xlu0 %v2062_v22, %s1950_s19 }
 0x102   :  { %217 = vrot.lane.b32.xlu1 %v2062_v22, %s1951_s20  ;;  %199 = vrot.lane.b32.xlu0 %v2068_v24, %s1949_s2 }
 0x106   :  { %237 = vrot.lane.b32.xlu1 %v2062_v22, %s1952_s21  ;;  %219 = vrot.lane.b32.xlu0 %v2068_v24, %s1951_s20 }
 0x10a   :  { %177 = vrot.lane.b32.xlu1 %v2068_v24, %s1950_s19  ;;  %239 = vrot.lane.b32.xlu0 %v2068_v24, %s1952_s21 }
 0x10e   :  { %257 = vrot.lane.b32.xlu1 %v2062_v22, %s1953_s22  ;;  %259 = vrot.lane.b32.xlu0 %v2068_v24, %s1953_s22 }
 0x112   :  { %277 = vrot.lane.b32.xlu1 %v2062_v22, %s1954_s23  ;;  %279 = vrot.lane.b32.xlu0 %v2068_v24, %s1954_s23 }
 0x116   :  { %297 = vrot.lane.b32.xlu1 %v2062_v22, %s1955_s24  ;;  %299 = vrot.lane.b32.xlu0 %v2068_v24, %s1955_s24 }
 0x11a   :  { %317 = vrot.lane.b32.xlu1 %v2062_v22, %s1956_s25  ;;  %319 = vrot.lane.b32.xlu0 %v2068_v24, %s1956_s25 }
 0x11e   :  { %351 = vperm.xlu1 %1789, %v348_v25  }
 0x170   :  { %v198_v27 = vpop.permute.xlu1 %197  ;;  %v176_v28 = vpop.permute.xlu0 %175 }
 0x174   :  { %v218_v31 = vpop.permute.xlu1 %217  ;;  %v200_v32 = vpop.permute.xlu0 %199 }
 0x175   :  { %v203_v43 = vsel %vm201_vm2, %v200_v32, %v198_v27  ;;  %v202_v45 = vsel %vm201_vm2, %v198_v27, %v200_v32  ;;  %v2198_v27 = vrot.slane %v1717_v17, %v2105_v34  ;;  %v2208_v32 = vrot.slane %v1718_v20, %v2105_v34 }
 0x176   :  { %v216_v54 = vmul.f32 %v2121_v41, %v202_v45  ;;  %v215_v55 = vmul.f32 %v2124_v42, %v203_v43 }
 0x178   :  { %v238_v38 = vpop.permute.xlu1 %237  ;;  %v220_v39 = vpop.permute.xlu0 %219 }
 0x179   :  { %v222_v56 = vsel %vm221_vm3, %v218_v31, %v220_v39  ;;  %v223_v1 = vsel %vm221_vm3, %v220_v39, %v218_v31  ;;  %v2205_v31 = vrot.slane %v1718_v20, %v2103_v33 }
 0x17a   :  { %v236_v2 = vmul.f32 %v2146_v49, %v222_v56  ;;  %v235_v19 = vmul.f32 %v2171_v0, %v223_v1 }
 0x17c   :  { %v178_v51 = vpop.permute.xlu1 %177  ;;  %v240_v52 = vpop.permute.xlu0 %239 }
 0x17d   :  { %v183_v57 = vsel %vm181_vm4, %v178_v51, %v176_v28  ;;  %v242_v58 = vsel %vm241_vm5, %v238_v38, %v240_v52  ;;  %v182_v59 = vsel %vm181_vm4, %v176_v28, %v178_v51  ;;  %v243_v60 = vsel %vm241_vm5, %v240_v52, %v238_v38 }
 0x17e   :  { %v256_v61 = vmul.f32 %v2137_v46, %v242_v58  ;;  %v196_v62 = vmul.f32 %v2140_v47, %v182_v59  ;;  %v195_v63 = vmul.f32 %v2143_v48, %v183_v57  ;;  %v255_v12 = vmul.f32 %v2149_v50, %v243_v60 }
 0x17f   :  { %v2225_v51 = vrot.slane %v1719_v29, %v2103_v33 }
 0x180   :  { %v258_v4 = vpop.permute.xlu1 %257  ;;  %v260_v5 = vpop.permute.xlu0 %259  ;;  %v338_v6 = vpack.c.bf16 %v216_v54, %v196_v62  ;;  %v337_v11 = vpack.c.bf16 %v215_v55, %v195_v63  ;;  %v340_v18 = vpack.c.bf16 %v256_v61, %v236_v2  ;;  %v339_v28 = vpack.c.bf16 %v255_v12, %v235_v19 }
 0x181   :  { %v263_v13 = vsel %vm261_vm6, %v260_v5, %v258_v4  ;;  %v262_v15 = vsel %vm261_vm6, %v258_v4, %v260_v5  ;;  %v347_v4 = vld [vmem:[%s2987_s4] sm:$0xf] }
 0x182   :  { %v276_v16 = vmul.f32 %v2153_v53, %v263_v13  ;;  %365 = vmatprep.subr.bf16.mxu1 %v338_v6  ;;  %v275_v25 = vmul.f32 %v2180_v14, %v262_v15 }
 0x183   :  { %366 = vmatpush1.bf16.msra.mxu1 %v337_v11 }
 0x184   :  { %v278_v21 = vpop.permute.xlu1 %277  ;;  %v280_v23 = vpop.permute.xlu0 %279  ;;  %367 = vmatprep.subr.bf16.mxu1 %v340_v18  ;;  %v342_v35 = vpack.c.bf16 %v276_v16, %v2068_v24  ;;  %v341_v45 = vpack.c.bf16 %v275_v25, %v2062_v22 }
 0x185   :  { %v282_v36 = vsel %vm281_vm7, %v278_v21, %v280_v23  ;;  %v283_v37 = vsel %vm281_vm7, %v280_v23, %v278_v21 }
 0x186   :  { %v295_v52 = vmul.f32 %v2195_v26, %v282_v36  ;;  %v296_v54 = vmul.f32 %v2198_v27, %v283_v37  ;;  %v2273_v36 = vld [vmem:[%s2990_s7] sm:$0xff] }
 0x187   :  { %368 = vmatpush1.bf16.msra.mxu1 %v339_v28 }
 0x188   :  { %v298_v38 = vpop.permute.xlu1 %297  ;;  %v300_v39 = vpop.permute.xlu0 %299  ;;  %369 = vmatprep.subr.bf16.mxu1 %v342_v35 }
 0x189   :  { %v302_v43 = vsel %vm301_vm8, %v298_v38, %v300_v39  ;;  %v303_v44 = vsel %vm301_vm8, %v300_v39, %v298_v38 }
 0x18a   :  { %v315_v55 = vmul.f32 %v2205_v31, %v302_v43  ;;  %v316_v34 = vmul.f32 %v2208_v32, %v303_v44 }
 0x18b   :  { %370 = vmatpush1.bf16.msra.mxu1 %v341_v45 }
 0x18c   :  { %v318_v56 = vpop.permute.xlu1 %317  ;;  %v320_v57 = vpop.permute.xlu0 %319  ;;  %v344_v58 = vpack.c.bf16 %v316_v34, %v296_v54  ;;  %v343_v59 = vpack.c.bf16 %v315_v55, %v295_v52 }
 0x18d   :  { %v322_v60 = vsel %vm321_vm9, %v318_v56, %v320_v57  ;;  %v323_v33 = vsel %vm321_vm9, %v320_v57, %v318_v56 }
 0x18e   :  { %v336_v61 = vmul.f32 %v2217_v40, %v323_v33  ;;  %371 = vmatprep.subr.bf16.mxu1 %v344_v58  ;;  %v335_v62 = vmul.f32 %v2225_v51, %v322_v60 }
 0x18f   :  { %372 = vmatpush1.bf16.msra.mxu1 %v343_v59 }
 0x190   :  { %v346_v63 = vpack.c.bf16 %v336_v61, %v336_v61  ;;  %v345_v1 = vpack.c.bf16 %v335_v62, %v335_v62 }
 0x192   :  { %1727 = vmatprep.subr.msk.bf16.mxu1 %vm358_vm10, %v346_v63  ;;  %v360_v2 = vsel %vm358_vm10, %v345_v1, 0 }
 0x193   :  { %374 = vmatpush1.bf16.msra.mxu1 %v360_v2 }
 0x196   :  { %1728 = vmatmul.mubr.msk.bf16.vlgmr.msra.gmra.mrb[0].mxu1 %vm354_vm11, %v347_v4 }
 0x197   :  { %687 = vmatprep.mubr.bf16.mxu1 %v1948_v3 }
 0x19d   :  { %v352_v5 = vpop.permute.xlu1 %351 }
 0x269   :  { %v399_v6 = vpop.f32.mrb[0].mxu1 }
 0x26a   :  { %v400_v11 = vadd.f32 %v399_v6, %v352_v5  ;;  %v401_v12 = vpop.f32.mrb[1].mxu1 }
 0x26b   :  { %v402_v13 = vadd.f32 %v401_v12, %v352_v5  ;;  %v403_v15 = vpop.f32.mrb[2].mxu1 }
 0x26c   :  { %v1729_v16 = vmul.f32 -1.442695, %v400_v11  ;;  %v404_v17 = vpop.f32.mrb[3].mxu1 }
 0x26d   :  { %v1730_v18 = vmul.f32 -1.442695, %v402_v13 }
 0x26e   :  { %1802 = vpow2.f32 %v1729_v16 }
 0x26f   :  { %1804 = vpow2.f32 %v1730_v18 }
 0x278   :  { %v1803_v19 = vpop.eup %1802 }
 0x279   :  { %v1805_v20 = vpop.eup %1804  ;;  %v412_v21 = vadd.f32 1.0, %v1803_v19 }
 0x27a   :  { %v413_v23 = vadd.f32 1.0, %v1805_v20 }
 0x27b   :  { %1806 = vrcp.f32 %v412_v21 }
 0x27c   :  { %1808 = vrcp.f32 %v413_v23 }
 0x285   :  { %v1807_v25 = vpop.eup %1806 }
 0x286   :  { %v1809_v28 = vpop.eup %1808  ;;  %v2244_v29 = vmul.f32 %v1807_v25, %v400_v11 }
 0x287   :  { %v419_v35 = vmul.f32 %v1809_v28, %v402_v13 }
 0x288   :  { %420 = vrot.lane.b32.xlu0 %v2244_v29, %s1950_s19 }
 0x289   :  { %422 = vrot.lane.b32.xlu1 %v419_v35, %s1950_s19 }
 0x28c   :  { %428 = vrot.lane.b32.xlu0 %v2244_v29, %s1949_s2 }
 0x28d   :  { %430 = vrot.lane.b32.xlu1 %v419_v35, %s1949_s2 }
 0x290   :  { %436 = vrot.lane.b32.xlu0 %v2244_v29, %s1951_s20 }
 0x291   :  { %438 = vrot.lane.b32.xlu1 %v419_v35, %s1951_s20 }
 0x294   :  { %444 = vrot.lane.b32.xlu0 %v2244_v29, %s1952_s21 }
 0x295   :  { %446 = vrot.lane.b32.xlu1 %v419_v35, %s1952_s21 }
 0x298   :  { %452 = vrot.lane.b32.xlu0 %v2244_v29, %s1953_s22 }
 0x299   :  { %454 = vrot.lane.b32.xlu1 %v419_v35, %s1953_s22 }
 0x29c   :  { %460 = vrot.lane.b32.xlu0 %v2244_v29, %s1954_s23 }
 0x29d   :  { %462 = vrot.lane.b32.xlu1 %v419_v35, %s1954_s23 }
 0x2a0   :  { %468 = vrot.lane.b32.xlu0 %v2244_v29, %s1955_s24 }
 0x2a1   :  { %470 = vrot.lane.b32.xlu1 %v419_v35, %s1955_s24 }
 0x2a4   :  { %476 = vrot.lane.b32.xlu0 %v2244_v29, %s1956_s25 }
 0x2a5   :  { %478 = vrot.lane.b32.xlu1 %v419_v35, %s1956_s25 }
 0x2a8   :  { %498 = vperm.xlu0 %1788, %v2273_v36  }
 0x2fa   :  { %v421_v37 = vpop.permute.xlu0 %420 }
 0x2fb   :  { %v423_v38 = vpop.permute.xlu1 %422 }
 0x2fc   :  { %v424_v39 = vsel %vm181_vm4, %v421_v37, %v423_v38  ;;  %v425_v43 = vsel %vm181_vm4, %v423_v38, %v421_v37 }
 0x2fd   :  { %v426_v55 = vmul.f32 %v425_v43, %v2143_v48  ;;  %v427_v34 = vmul.f32 %v424_v39, %v2140_v47 }
 0x2fe   :  { %v429_v44 = vpop.permute.xlu0 %428 }
 0x2ff   :  { %v431_v45 = vpop.permute.xlu1 %430 }
 0x300   :  { %v432_v52 = vsel %vm201_vm2, %v429_v44, %v431_v45  ;;  %v433_v54 = vsel %vm201_vm2, %v431_v45, %v429_v44 }
 0x301   :  { %v434_v56 = vmul.f32 %v433_v54, %v2124_v42  ;;  %v435_v57 = vmul.f32 %v432_v52, %v2121_v41 }
 0x302   :  { %v437_v58 = vpop.permute.xlu0 %436 }
 0x303   :  { %v484_v59 = vpack.c.bf16 %v434_v56, %v426_v55  ;;  %v439_v60 = vpop.permute.xlu1 %438  ;;  %v485_v33 = vpack.c.bf16 %v435_v57, %v427_v34 }
 0x304   :  { %v440_v61 = vsel %vm221_vm3, %v437_v58, %v439_v60  ;;  %v441_v62 = vsel %vm221_vm3, %v439_v60, %v437_v58 }
 0x305   :  { %510 = vmatprep.subr.bf16.mxu0 %v485_v33  ;;  %v442_v5 = vmul.f32 %v441_v62, %v2171_v0  ;;  %v443_v6 = vmul.f32 %v440_v61, %v2146_v49 }
 0x306   :  { %511 = vmatpush1.bf16.msra.mxu0 %v484_v59  ;;  %v445_v63 = vpop.permute.xlu0 %444 }
 0x307   :  { %v447_v1 = vpop.permute.xlu1 %446 }
 0x308   :  { %v448_v2 = vsel %vm241_vm5, %v445_v63, %v447_v1  ;;  %v449_v4 = vsel %vm241_vm5, %v447_v1, %v445_v63 }
 0x309   :  { %v450_v11 = vmul.f32 %v449_v4, %v2149_v50  ;;  %v451_v12 = vmul.f32 %v448_v2, %v2137_v46  ;;  %v494_v2 = vld [vmem:[%s2989_s6] sm:$0xf] }
 0x30a   :  { %v453_v13 = vpop.permute.xlu0 %452 }
 0x30b   :  { %v486_v15 = vpack.c.bf16 %v450_v11, %v442_v5  ;;  %v455_v16 = vpop.permute.xlu1 %454  ;;  %v487_v17 = vpack.c.bf16 %v451_v12, %v443_v6 }
 0x30c   :  { %v456_v18 = vsel %vm261_vm6, %v453_v13, %v455_v16  ;;  %v457_v19 = vsel %vm261_vm6, %v455_v16, %v453_v13 }
 0x30d   :  { %v458_v20 = vmul.f32 %v456_v18, %v2180_v14  ;;  %v459_v21 = vmul.f32 %v457_v19, %v2153_v53  ;;  %512 = vmatprep.subr.bf16.mxu0 %v487_v17 }
 0x30e   :  { %513 = vmatpush1.bf16.msra.mxu0 %v486_v15  ;;  %v461_v23 = vpop.permute.xlu0 %460 }
 0x30f   :  { %v488_v25 = vpack.c.bf16 %v458_v20, %v2244_v29  ;;  %v463_v28 = vpop.permute.xlu1 %462  ;;  %v489_v37 = vpack.c.bf16 %v459_v21, %v419_v35 }
 0x310   :  { %v464_v38 = vsel %vm281_vm7, %v461_v23, %v463_v28  ;;  %v465_v39 = vsel %vm281_vm7, %v463_v28, %v461_v23 }
 0x311   :  { %514 = vmatprep.subr.bf16.mxu0 %v489_v37  ;;  %v466_v29 = vmul.f32 %v464_v38, %v2195_v26  ;;  %v467_v35 = vmul.f32 %v465_v39, %v2198_v27  ;;  %v2371_v38 = vld [vmem:[%s2992_s9] sm:$0xff] }
 0x312   :  { %515 = vmatpush1.bf16.msra.mxu0 %v488_v25  ;;  %v469_v43 = vpop.permute.xlu0 %468 }
 0x313   :  { %v471_v44 = vpop.permute.xlu1 %470 }
 0x314   :  { %v472_v45 = vsel %vm301_vm8, %v469_v43, %v471_v44  ;;  %v473_v52 = vsel %vm301_vm8, %v471_v44, %v469_v43 }
 0x315   :  { %v474_v54 = vmul.f32 %v472_v45, %v2205_v31  ;;  %v475_v55 = vmul.f32 %v473_v52, %v2208_v32 }
 0x316   :  { %v477_v34 = vpop.permute.xlu0 %476 }
 0x317   :  { %v490_v56 = vpack.c.bf16 %v474_v54, %v466_v29  ;;  %v479_v57 = vpop.permute.xlu1 %478  ;;  %v491_v58 = vpack.c.bf16 %v475_v55, %v467_v35 }
 0x318   :  { %v480_v59 = vsel %vm321_vm9, %v477_v34, %v479_v57  ;;  %v481_v60 = vsel %vm321_vm9, %v479_v57, %v477_v34 }
 0x319   :  { %v482_v33 = vmul.f32 %v480_v59, %v2225_v51  ;;  %v483_v61 = vmul.f32 %v481_v60, %v2217_v40  ;;  %516 = vmatprep.subr.bf16.mxu0 %v491_v58 }
 0x31a   :  { %517 = vmatpush1.bf16.msra.mxu0 %v490_v56 }
 0x31b   :  { %v492_v62 = vpack.c.bf16 %v482_v33, %v482_v33  ;;  %v493_v63 = vpack.c.bf16 %v483_v61, %v483_v61 }
 0x31d   :  { %1731 = vmatprep.subr.msk.bf16.mxu0 %vm358_vm10, %v493_v63  ;;  %v505_v1 = vsel %vm358_vm10, %v492_v62, 0 }
 0x31e   :  { %519 = vmatpush1.bf16.msra.mxu0 %v505_v1 }
 0x321   :  { %1732 = vmatmul.mubr.msk.bf16.vlgmr.msra.gmra.mrb[4].mxu0 %vm354_vm11, %v494_v2 }
 0x322   :  { %832 = vmatprep.mubr.bf16.mxu0 %v1948_v3 }
 0x327   :  { %v499_v4 = vpop.permute.xlu0 %498 }
 0x3f4   :  { %v544_v5 = vpop.f32.mrb[4].mxu0 }
 0x3f5   :  { %v545_v6 = vadd.f32 %v544_v5, %v499_v4  ;;  %v546_v11 = vpop.f32.mrb[5].mxu0 }
 0x3f6   :  { %v547_v12 = vadd.f32 %v546_v11, %v499_v4  ;;  %v548_v13 = vpop.f32.mrb[6].mxu0 }
 0x3f7   :  { %v1733_v15 = vmul.f32 -1.442695, %v545_v6  ;;  %v549_v16 = vpop.f32.mrb[7].mxu0 }
 0x3f8   :  { %v1734_v17 = vmul.f32 -1.442695, %v547_v12 }
 0x3f9   :  { %1810 = vpow2.f32 %v1733_v15 }
 0x3fa   :  { %1812 = vpow2.f32 %v1734_v17 }
 0x403   :  { %v1811_v18 = vpop.eup %1810 }
 0x404   :  { %v1813_v19 = vpop.eup %1812  ;;  %v557_v20 = vadd.f32 1.0, %v1811_v18 }
 0x405   :  { %v558_v21 = vadd.f32 1.0, %v1813_v19 }
 0x406   :  { %1814 = vrcp.f32 %v557_v20 }
 0x407   :  { %1816 = vrcp.f32 %v558_v21 }
 0x410   :  { %v1815_v23 = vpop.eup %1814 }
 0x411   :  { %v1817_v25 = vpop.eup %1816  ;;  %v2332_v28 = vmul.f32 %v1815_v23, %v545_v6 }
 0x412   :  { %v2334_v37 = vmul.f32 %v1817_v25, %v547_v12 }
 0x413   :  { %565 = vrot.lane.b32.xlu1 %v2332_v28, %s1950_s19 }
 0x414   :  { %567 = vrot.lane.b32.xlu0 %v2334_v37, %s1950_s19 }
 0x417   :  { %573 = vrot.lane.b32.xlu1 %v2332_v28, %s1949_s2 }
 0x418   :  { %575 = vrot.lane.b32.xlu0 %v2334_v37, %s1949_s2 }
 0x41b   :  { %581 = vrot.lane.b32.xlu1 %v2332_v28, %s1951_s20 }
 0x41c   :  { %583 = vrot.lane.b32.xlu0 %v2334_v37, %s1951_s20 }
 0x41f   :  { %589 = vrot.lane.b32.xlu1 %v2332_v28, %s1952_s21 }
 0x420   :  { %591 = vrot.lane.b32.xlu0 %v2334_v37, %s1952_s21 }
 0x423   :  { %597 = vrot.lane.b32.xlu1 %v2332_v28, %s1953_s22 }
 0x424   :  { %599 = vrot.lane.b32.xlu0 %v2334_v37, %s1953_s22 }
 0x427   :  { %605 = vrot.lane.b32.xlu1 %v2332_v28, %s1954_s23 }
 0x428   :  { %607 = vrot.lane.b32.xlu0 %v2334_v37, %s1954_s23 }
 0x42b   :  { %613 = vrot.lane.b32.xlu1 %v2332_v28, %s1955_s24 }
 0x42c   :  { %615 = vrot.lane.b32.xlu0 %v2334_v37, %s1955_s24 }
 0x42f   :  { %621 = vrot.lane.b32.xlu1 %v2332_v28, %s1956_s25 }
 0x430   :  { %623 = vrot.lane.b32.xlu0 %v2334_v37, %s1956_s25 }
 0x433   :  { %643 = vperm.xlu1 %1789, %v2371_v38  }
 0x485   :  { %v566_v39 = vpop.permute.xlu1 %565 }
 0x486   :  { %v568_v43 = vpop.permute.xlu0 %567 }
 0x487   :  { %v569_v44 = vsel %vm181_vm4, %v566_v39, %v568_v43  ;;  %v570_v45 = vsel %vm181_vm4, %v568_v43, %v566_v39 }
 0x488   :  { %v571_v55 = vmul.f32 %v570_v45, %v2143_v48  ;;  %v572_v34 = vmul.f32 %v569_v44, %v2140_v47 }
 0x489   :  { %v574_v52 = vpop.permute.xlu1 %573 }
 0x48a   :  { %v576_v29 = vpop.permute.xlu0 %575 }
 0x48b   :  { %v577_v35 = vsel %vm201_vm2, %v574_v52, %v576_v29  ;;  %v578_v54 = vsel %vm201_vm2, %v576_v29, %v574_v52 }
 0x48c   :  { %v579_v56 = vmul.f32 %v578_v54, %v2124_v42  ;;  %v580_v57 = vmul.f32 %v577_v35, %v2121_v41 }
 0x48d   :  { %v582_v58 = vpop.permute.xlu1 %581 }
 0x48e   :  { %v629_v59 = vpack.c.bf16 %v579_v56, %v571_v55  ;;  %v584_v60 = vpop.permute.xlu0 %583  ;;  %v630_v33 = vpack.c.bf16 %v580_v57, %v572_v34 }
 0x48f   :  { %v585_v61 = vsel %vm221_vm3, %v582_v58, %v584_v60  ;;  %v586_v62 = vsel %vm221_vm3, %v584_v60, %v582_v58 }
 0x490   :  { %655 = vmatprep.subr.bf16.mxu1 %v630_v33  ;;  %v587_v5 = vmul.f32 %v586_v62, %v2171_v0  ;;  %v588_v6 = vmul.f32 %v585_v61, %v2146_v49 }
 0x491   :  { %656 = vmatpush1.bf16.msra.mxu1 %v629_v59  ;;  %v590_v63 = vpop.permute.xlu1 %589 }
 0x492   :  { %v592_v1 = vpop.permute.xlu0 %591 }
 0x493   :  { %v593_v2 = vsel %vm241_vm5, %v590_v63, %v592_v1  ;;  %v594_v4 = vsel %vm241_vm5, %v592_v1, %v590_v63 }
 0x494   :  { %v595_v11 = vmul.f32 %v594_v4, %v2149_v50  ;;  %v596_v12 = vmul.f32 %v593_v2, %v2137_v46 }
 0x495   :  { %v598_v13 = vpop.permute.xlu1 %597 }
 0x496   :  { %v631_v15 = vpack.c.bf16 %v595_v11, %v587_v5  ;;  %v600_v16 = vpop.permute.xlu0 %599  ;;  %v632_v17 = vpack.c.bf16 %v596_v12, %v588_v6  ;;  %v639_v6 = vld [vmem:[%s2991_s8] sm:$0xf] }
 0x497   :  { %v601_v18 = vsel %vm261_vm6, %v598_v13, %v600_v16  ;;  %v602_v19 = vsel %vm261_vm6, %v600_v16, %v598_v13 }
 0x498   :  { %v603_v20 = vmul.f32 %v601_v18, %v2180_v14  ;;  %v604_v21 = vmul.f32 %v602_v19, %v2153_v53  ;;  %657 = vmatprep.subr.bf16.mxu1 %v632_v17 }
 0x499   :  { %658 = vmatpush1.bf16.msra.mxu1 %v631_v15  ;;  %v606_v23 = vpop.permute.xlu1 %605 }
 0x49a   :  { %v633_v25 = vpack.c.bf16 %v603_v20, %v2332_v28  ;;  %v608_v39 = vpop.permute.xlu0 %607  ;;  %v634_v43 = vpack.c.bf16 %v604_v21, %v2334_v37 }
 0x49b   :  { %v609_v44 = vsel %vm281_vm7, %v606_v23, %v608_v39  ;;  %v610_v45 = vsel %vm281_vm7, %v608_v39, %v606_v23 }
 0x49c   :  { %659 = vmatprep.subr.bf16.mxu1 %v634_v43  ;;  %v611_v55 = vmul.f32 %v609_v44, %v2195_v26  ;;  %v612_v34 = vmul.f32 %v610_v45, %v2198_v27 }
 0x49d   :  { %660 = vmatpush1.bf16.msra.mxu1 %v633_v25  ;;  %v614_v52 = vpop.permute.xlu1 %613 }
 0x49e   :  { %v616_v29 = vpop.permute.xlu0 %615 }
 0x49f   :  { %v617_v35 = vsel %vm301_vm8, %v614_v52, %v616_v29  ;;  %v618_v54 = vsel %vm301_vm8, %v616_v29, %v614_v52  ;;  %v2470_v29 = vld [vmem:[%s2994_s11] sm:$0xff] }
 0x4a0   :  { %v619_v56 = vmul.f32 %v617_v35, %v2205_v31  ;;  %v620_v57 = vmul.f32 %v618_v54, %v2208_v32  ;;  %v66_v35 = vld [vmem:[%s2986_s3] sm:$0xff] }
 0x4a1   :  { %v622_v58 = vpop.permute.xlu1 %621 }
 0x4a2   :  { %v635_v59 = vpack.c.bf16 %v619_v56, %v611_v55  ;;  %v624_v60 = vpop.permute.xlu0 %623  ;;  %v636_v33 = vpack.c.bf16 %v620_v57, %v612_v34 }
 0x4a3   :  { %v625_v61 = vsel %vm321_vm9, %v622_v58, %v624_v60  ;;  %v626_v62 = vsel %vm321_vm9, %v624_v60, %v622_v58 }
 0x4a4   :  { %v627_v63 = vmul.f32 %v625_v61, %v2225_v51  ;;  %v628_v1 = vmul.f32 %v626_v62, %v2217_v40  ;;  %661 = vmatprep.subr.bf16.mxu1 %v636_v33 }
 0x4a5   :  { %662 = vmatpush1.bf16.msra.mxu1 %v635_v59 }
 0x4a6   :  { %v637_v2 = vpack.c.bf16 %v627_v63, %v627_v63  ;;  %v638_v4 = vpack.c.bf16 %v628_v1, %v628_v1 }
 0x4a8   :  { %1735 = vmatprep.subr.msk.bf16.mxu1 %vm358_vm10, %v638_v4  ;;  %v650_v5 = vsel %vm358_vm10, %v637_v2, 0 }
 0x4a9   :  { %664 = vmatpush1.bf16.msra.mxu1 %v650_v5 }
 0x4ac   :  { %1736 = vmatmul.mubr.msk.bf16.vlgmr.msra.gmra.mrb[4].mxu1 %vm354_vm11, %v639_v6 }
 0x4ad   :  { %910 = vmatprep.mubr.bf16.mxu1 %v1948_v3 }
 0x4b2   :  { %v644_v11 = vpop.permute.xlu1 %643 }
 0x57f   :  { %v689_v12 = vpop.f32.mrb[4].mxu1 }
 0x580   :  { %v690_v13 = vadd.f32 %v689_v12, %v644_v11  ;;  %v691_v15 = vpop.f32.mrb[5].mxu1 }
 0x581   :  { %v692_v16 = vadd.f32 %v691_v15, %v644_v11  ;;  %v693_v17 = vpop.f32.mrb[6].mxu1 }
 0x582   :  { %v1737_v18 = vmul.f32 -1.442695, %v690_v13  ;;  %v694_v19 = vpop.f32.mrb[7].mxu1 }
 0x583   :  { %v1738_v20 = vmul.f32 -1.442695, %v692_v16 }
 0x584   :  { %1818 = vpow2.f32 %v1737_v18 }
 0x585   :  { %1820 = vpow2.f32 %v1738_v20 }
 0x58e   :  { %v1819_v21 = vpop.eup %1818 }
 0x58f   :  { %v1821_v23 = vpop.eup %1820  ;;  %v702_v25 = vadd.f32 1.0, %v1819_v21 }
 0x590   :  { %v703_v39 = vadd.f32 1.0, %v1821_v23 }
 0x591   :  { %1822 = vrcp.f32 %v702_v25 }
 0x592   :  { %1824 = vrcp.f32 %v703_v39 }
 0x59b   :  { %v1823_v43 = vpop.eup %1822 }
 0x59c   :  { %v1825_v44 = vpop.eup %1824  ;;  %v2431_v45 = vmul.f32 %v1823_v43, %v690_v13 }
 0x59d   :  { %v2433_v52 = vmul.f32 %v1825_v44, %v692_v16 }
 0x59e   :  { %710 = vrot.lane.b32.xlu0 %v2431_v45, %s1950_s19 }
 0x59f   :  { %712 = vrot.lane.b32.xlu1 %v2433_v52, %s1950_s19 }
 0x5a2   :  { %718 = vrot.lane.b32.xlu0 %v2431_v45, %s1949_s2 }
 0x5a3   :  { %720 = vrot.lane.b32.xlu1 %v2433_v52, %s1949_s2 }
 0x5a6   :  { %726 = vrot.lane.b32.xlu0 %v2431_v45, %s1951_s20 }
 0x5a7   :  { %728 = vrot.lane.b32.xlu1 %v2433_v52, %s1951_s20 }
 0x5aa   :  { %734 = vrot.lane.b32.xlu0 %v2431_v45, %s1952_s21 }
 0x5ab   :  { %736 = vrot.lane.b32.xlu1 %v2433_v52, %s1952_s21 }
 0x5ae   :  { %742 = vrot.lane.b32.xlu0 %v2431_v45, %s1953_s22 }
 0x5af   :  { %744 = vrot.lane.b32.xlu1 %v2433_v52, %s1953_s22 }
 0x5b2   :  { %750 = vrot.lane.b32.xlu0 %v2431_v45, %s1954_s23 }
 0x5b3   :  { %752 = vrot.lane.b32.xlu1 %v2433_v52, %s1954_s23 }
 0x5b6   :  { %758 = vrot.lane.b32.xlu0 %v2431_v45, %s1955_s24 }
 0x5b7   :  { %760 = vrot.lane.b32.xlu1 %v2433_v52, %s1955_s24 }
 0x5ba   :  { %766 = vrot.lane.b32.xlu0 %v2431_v45, %s1956_s25 }
 0x5bb   :  { %768 = vrot.lane.b32.xlu1 %v2433_v52, %s1956_s25 }
 0x5be   :  { %788 = vperm.xlu0 %1788, %v2470_v29  }
 0x5bf   :  { %80 = vperm.xlu1 %1789, %v66_v35  }
 0x610   :  { %v711_v54 = vpop.permute.xlu0 %710 }
 0x611   :  { %v713_v55 = vpop.permute.xlu1 %712 }
 0x612   :  { %v714_v34 = vsel %vm181_vm4, %v711_v54, %v713_v55  ;;  %v715_v56 = vsel %vm181_vm4, %v713_v55, %v711_v54 }
 0x613   :  { %v716_v33 = vmul.f32 %v715_v56, %v2143_v48  ;;  %v717_v61 = vmul.f32 %v714_v34, %v2140_v47 }
 0x614   :  { %v719_v57 = vpop.permute.xlu0 %718 }
 0x615   :  { %v721_v58 = vpop.permute.xlu1 %720 }
 0x616   :  { %v722_v59 = vsel %vm201_vm2, %v719_v57, %v721_v58  ;;  %v723_v60 = vsel %vm201_vm2, %v721_v58, %v719_v57 }
 0x617   :  { %v724_v62 = vmul.f32 %v723_v60, %v2124_v42  ;;  %v725_v63 = vmul.f32 %v722_v59, %v2121_v41 }
 0x618   :  { %v727_v1 = vpop.permute.xlu0 %726 }
 0x619   :  { %v774_v2 = vpack.c.bf16 %v724_v62, %v716_v33  ;;  %v729_v4 = vpop.permute.xlu1 %728  ;;  %v775_v5 = vpack.c.bf16 %v725_v63, %v717_v61 }
 0x61a   :  { %v730_v6 = vsel %vm221_vm3, %v727_v1, %v729_v4  ;;  %v731_v11 = vsel %vm221_vm3, %v729_v4, %v727_v1 }
 0x61b   :  { %800 = vmatprep.subr.bf16.mxu0 %v775_v5  ;;  %v732_v17 = vmul.f32 %v731_v11, %v2171_v0  ;;  %v733_v18 = vmul.f32 %v730_v6, %v2146_v49 }
 0x61c   :  { %801 = vmatpush1.bf16.msra.mxu0 %v774_v2  ;;  %v735_v12 = vpop.permute.xlu0 %734 }
 0x61d   :  { %v737_v13 = vpop.permute.xlu1 %736 }
 0x61e   :  { %v738_v15 = vsel %vm241_vm5, %v735_v12, %v737_v13  ;;  %v739_v16 = vsel %vm241_vm5, %v737_v13, %v735_v12 }
 0x61f   :  { %v740_v19 = vmul.f32 %v739_v16, %v2149_v50  ;;  %v741_v20 = vmul.f32 %v738_v15, %v2137_v46 }
 0x620   :  { %v743_v21 = vpop.permute.xlu0 %742 }
 0x621   :  { %v776_v23 = vpack.c.bf16 %v740_v19, %v732_v17  ;;  %v745_v25 = vpop.permute.xlu1 %744  ;;  %v777_v39 = vpack.c.bf16 %v741_v20, %v733_v18 }
 0x622   :  { %v746_v43 = vsel %vm261_vm6, %v743_v21, %v745_v25  ;;  %v747_v44 = vsel %vm261_vm6, %v745_v25, %v743_v21  ;;  %v784_v25 = vld [vmem:[%s2993_s10] sm:$0xf] }
 0x623   :  { %v748_v35 = vmul.f32 %v746_v43, %v2180_v14  ;;  %v749_v54 = vmul.f32 %v747_v44, %v2153_v53  ;;  %802 = vmatprep.subr.bf16.mxu0 %v777_v39 }
 0x624   :  { %803 = vmatpush1.bf16.msra.mxu0 %v776_v23  ;;  %v751_v55 = vpop.permute.xlu0 %750 }
 0x625   :  { %v778_v34 = vpack.c.bf16 %v748_v35, %v2431_v45  ;;  %v753_v56 = vpop.permute.xlu1 %752  ;;  %v779_v57 = vpack.c.bf16 %v749_v54, %v2433_v52  ;;  %v1749_v45 = vld [vmem:[%s2983_s0 + $0x8] sm:$0xff] }
 0x626   :  { %v754_v58 = vsel %vm281_vm7, %v751_v55, %v753_v56  ;;  %v755_v59 = vsel %vm281_vm7, %v753_v56, %v751_v55  ;;  %v956_v12 = vcombine.high %v1749_v45, %v1749_v45  ;;  %v958_v21 = vpack.c.bf16 %v1749_v45, %v1749_v45 }
 0x627   :  { %804 = vmatprep.subr.bf16.mxu0 %v779_v57  ;;  %v756_v52 = vmul.f32 %v754_v58, %v2195_v26  ;;  %v757_v63 = vmul.f32 %v755_v59, %v2198_v27 }
 0x628   :  { %805 = vmatpush1.bf16.msra.mxu0 %v778_v34  ;;  %v759_v60 = vpop.permute.xlu0 %758  ;;  %v959_v20 = vpack.c.bf16 %v956_v12, %v956_v12  ;;  %v961_v39 = vsel %vm97_vm0, %v958_v21, 0 }
 0x629   :  { %v761_v33 = vpop.permute.xlu1 %760 }
 0x62a   :  { %v762_v61 = vsel %vm301_vm8, %v759_v60, %v761_v33  ;;  %v763_v62 = vsel %vm301_vm8, %v761_v33, %v759_v60 }
 0x62b   :  { %v764_v1 = vmul.f32 %v762_v61, %v2205_v31  ;;  %v765_v2 = vmul.f32 %v763_v62, %v2208_v32 }
 0x62c   :  { %v767_v4 = vpop.permute.xlu0 %766 }
 0x62d   :  { %v780_v5 = vpack.c.bf16 %v764_v1, %v756_v52  ;;  %v769_v6 = vpop.permute.xlu1 %768  ;;  %v781_v11 = vpack.c.bf16 %v765_v2, %v757_v63 }
 0x62e   :  { %v770_v13 = vsel %vm321_vm9, %v767_v4, %v769_v6  ;;  %v771_v15 = vsel %vm321_vm9, %v769_v6, %v767_v4 }
 0x62f   :  { %v772_v16 = vmul.f32 %v770_v13, %v2225_v51  ;;  %v773_v17 = vmul.f32 %v771_v15, %v2217_v40  ;;  %806 = vmatprep.subr.bf16.mxu0 %v781_v11 }
 0x630   :  { %807 = vmatpush1.bf16.msra.mxu0 %v780_v5 }
 0x631   :  { %v782_v18 = vpack.c.bf16 %v772_v16, %v772_v16  ;;  %v783_v19 = vpack.c.bf16 %v773_v17, %v773_v17 }
 0x633   :  { %1739 = vmatprep.subr.msk.bf16.mxu0 %vm358_vm10, %v783_v19  ;;  %v795_v23 = vsel %vm358_vm10, %v782_v18, 0 }
 0x634   :  { %809 = vmatpush1.bf16.msra.mxu0 %v795_v23 }
 0x635   :  { %1750 = vmatprep.subr.msk.bf16.mxu0 %vm97_vm0, %v959_v20 }
 0x637   :  { %1740 = vmatmul.mubr.msk.bf16.vlgmr.msra.gmra.mrb[8].mxu0 %vm354_vm11, %v784_v25 }
 0x638   :  { %967 = vmatpush1.bf16.msra.mxu0 %v961_v39  ;;  %998 = vmatprep.mubr.bf16.mxu0 %v1948_v3 }
 0x63d   :  { %v789_v34 = vpop.permute.xlu0 %788 }
 0x63e   :  { %v2541_v43 = vpop.permute.xlu1 %80 }
 0x63f   :  { %1751 = vmatmul.mubr.msk.bf16.vlgmr.msra.gmra.mrb[12].mxu0 %vm93_vm1, %v2049_v7  ;;  %v141_v44 = vadd.f32 %v2058_v10, %v2541_v43  ;;  %v139_v35 = vadd.f32 %v2054_v8, %v2541_v43 }
 0x640   :  { %1304 = vmatprep.mubr.bf16.mxu0 %v1948_v3 }
 0x641   :  { %v1724_v54 = vmul.f32 -1.442695, %v141_v44  ;;  %v1723_v55 = vmul.f32 -1.442695, %v139_v35 }
 0x643   :  { %1826 = vpow2.f32 %v1724_v54 }
 0x644   :  { %1828 = vpow2.f32 %v1723_v55 }
 0x64d   :  { %v1827_v8 = vpop.eup %1826 }
 0x64e   :  { %v1829_v2 = vpop.eup %1828  ;;  %v160_v4 = vadd.f32 1.0, %v1827_v8 }
 0x64f   :  { %v159_v13 = vadd.f32 1.0, %v1829_v2 }
 0x70a   :  { %v834_v56 = vpop.f32.mrb[8].mxu0 }
 0x70b   :  { %v835_v57 = vadd.f32 %v834_v56, %v789_v34  ;;  %v836_v58 = vpop.f32.mrb[9].mxu0 }
 0x70c   :  { %v837_v59 = vadd.f32 %v836_v58, %v789_v34  ;;  %v838_v60 = vpop.f32.mrb[10].mxu0 }
 0x70d   :  { %v1741_v7 = vmul.f32 -1.442695, %v835_v57  ;;  %v839_v33 = vpop.f32.mrb[11].mxu0 }
 0x70e   :  { %v1742_v61 = vmul.f32 -1.442695, %v837_v59 }
 0x70f   :  { %1830 = vpow2.f32 %v1741_v7 }
 0x710   :  { %1832 = vpow2.f32 %v1742_v61 }
 0x712   :  { %v2547_v62 = vpop.f32.mrb[12].mxu0 }
 0x713   :  { %v2549_v10 = vpop.f32.mrb[13].mxu0 }
 0x714   :  { %v1004_v45 = vpop.f32.mrb[14].mxu0 }
 0x715   :  { %v1005_v52 = vadd.f32 %v1004_v45, %v2056_v9  ;;  %v1006_v63 = vpop.f32.mrb[15].mxu0 }
 0x716   :  { %v1007_v1 = vadd.f32 %v1006_v63, %v2056_v9 }
 0x717   :  { %v1754_v5 = vmul.f32 -1.442695, %v1005_v52 }
 0x718   :  { %v1755_v6 = vmul.f32 -1.442695, %v1007_v1 }
 0x719   :  { %v1831_v11 = vpop.eup %1830  ;;  %1834 = vpow2.f32 %v1754_v5 }
 0x71a   :  { %v1833_v12 = vpop.eup %1832  ;;  %v847_v15 = vadd.f32 1.0, %v1831_v11  ;;  %1836 = vpow2.f32 %v1755_v6 }
 0x71b   :  { %1838 = vrcp.f32 %v160_v4  ;;  %v848_v16 = vadd.f32 1.0, %v1833_v12 }
 0x71c   :  { %1840 = vrcp.f32 %v847_v15 }
 0x71d   :  { %1842 = vrcp.f32 %v848_v16 }
 0x71e   :  { %1844 = vrcp.f32 %v159_v13 }
 0x723   :  { %v1835_v17 = vpop.eup %1834 }
 0x724   :  { %v1837_v18 = vpop.eup %1836  ;;  %v1023_v19 = vadd.f32 1.0, %v1835_v17 }
 0x725   :  { %v1839_v20 = vpop.eup %1838  ;;  %v1024_v9 = vadd.f32 1.0, %v1837_v18 }
 0x726   :  { %v1841_v21 = vpop.eup %1840  ;;  %1846 = vrcp.f32 %v1023_v19  ;;  %v172_v55 = vmul.f32 %v1839_v20, %v141_v44 }
 0x727   :  { %v1843_v23 = vpop.eup %1842  ;;  %v853_v25 = vmul.f32 %v1841_v21, %v835_v57  ;;  %1848 = vrcp.f32 %v1024_v9  ;;  %v1793_v57 = vld [vmem:[%s2995_s12] sm:$0xff]  }
 0x728   :  { %v1845_v39 = vpop.eup %1844  ;;  %v854_v54 = vmul.f32 %v1843_v23, %v837_v59  ;;  %v858_v60 = vpack.c.bf16 %v172_v55, %v2068_v24 }
 0x729   :  { %v171_v56 = vmul.f32 %v1845_v39, %v139_v35  ;;  %v855_v58 = vpack.c.bf16 %v2332_v28, %v853_v25 }
 0x72a   :  { %v856_v34 = vpack.c.bf16 %v2334_v37, %v854_v54 }
 0x72b   :  { %v857_v7 = vpack.c.bf16 %v171_v56, %v2062_v22  ;;  %v1922_v22 = vld [vmem:[%s2988_s5] sm:$0xff] }
 0x72c   :  { %878 = vmatprep.subr.bf16.mxu1 %v856_v34 }
 0x72d   :  { %879 = vmatpush1.bf16.msra.mxu1 %v855_v58 }
 0x72e   :  { %880 = vmatprep.subr.bf16.mxu1 %v858_v60 }
 0x730   :  { %v1847_v33 = vpop.eup %1846 }
 0x731   :  { %v1849_v61 = vpop.eup %1848  ;;  %v2560_v59 = vmul.f32 %v1847_v33, %v1005_v52  ;;  %881 = vmatpush1.bf16.msra.mxu1 %v857_v7 }
 0x732   :  { %v2562_v37 = vmul.f32 %v1849_v61, %v1007_v1 }
 0x733   :  { %1037 = vrot.lane.b32.xlu0 %v2560_v59, %s1950_s19 }
 0x734   :  { %1039 = vrot.lane.b32.xlu1 %v2562_v37, %s1950_s19  ;;  %1744 = vmatmul.mubr.msk.bf16.vlgmr.msra.gmra.mrb[8].mxu1 %vm874_vm12, %v1793_v57 }
 0x735   :  { %1159 = vmatprep.mubr.bf16.mxu1 %v1948_v3 }
 0x737   :  { %1045 = vrot.lane.b32.xlu0 %v2560_v59, %s1949_s2 }
 0x738   :  { %1047 = vrot.lane.b32.xlu1 %v2562_v37, %s1949_s2 }
 0x73b   :  { %1053 = vrot.lane.b32.xlu0 %v2560_v59, %s1951_s20 }
 0x73c   :  { %1055 = vrot.lane.b32.xlu1 %v2562_v37, %s1951_s20 }
 0x73f   :  { %1061 = vrot.lane.b32.xlu0 %v2560_v59, %s1952_s21 }
 0x740   :  { %1063 = vrot.lane.b32.xlu1 %v2562_v37, %s1952_s21 }
 0x743   :  { %1069 = vrot.lane.b32.xlu0 %v2560_v59, %s1953_s22 }
 0x744   :  { %1071 = vrot.lane.b32.xlu1 %v2562_v37, %s1953_s22 }
 0x747   :  { %1077 = vrot.lane.b32.xlu0 %v2560_v59, %s1954_s23 }
 0x748   :  { %1079 = vrot.lane.b32.xlu1 %v2562_v37, %s1954_s23 }
 0x74b   :  { %1085 = vrot.lane.b32.xlu0 %v2560_v59, %s1955_s24 }
 0x74c   :  { %1087 = vrot.lane.b32.xlu1 %v2562_v37, %s1955_s24 }
 0x74f   :  { %1093 = vrot.lane.b32.xlu0 %v2560_v59, %s1956_s25 }
 0x750   :  { %1095 = vrot.lane.b32.xlu1 %v2562_v37, %s1956_s25 }
 0x753   :  { %1115 = vperm.xlu0 %1788, %v1922_v22  }
 0x7a5   :  { %v1038_v24 = vpop.permute.xlu0 %1037 }
 0x7a6   :  { %v1040_v28 = vpop.permute.xlu1 %1039 }
 0x7a7   :  { %v1041_v44 = vsel %vm181_vm4, %v1038_v24, %v1040_v28  ;;  %v1042_v35 = vsel %vm181_vm4, %v1040_v28, %v1038_v24 }
 0x7a8   :  { %v1043_v1 = vmul.f32 %v1042_v35, %v2143_v48  ;;  %v1044_v2 = vmul.f32 %v1041_v44, %v2140_v47 }
 0x7a9   :  { %v1046_v8 = vpop.permute.xlu0 %1045 }
 0x7aa   :  { %v1048_v45 = vpop.permute.xlu1 %1047 }
 0x7ab   :  { %v1049_v52 = vsel %vm201_vm2, %v1046_v8, %v1048_v45  ;;  %v1050_v63 = vsel %vm201_vm2, %v1048_v45, %v1046_v8 }
 0x7ac   :  { %v1051_v4 = vmul.f32 %v1050_v63, %v2124_v42  ;;  %v1052_v5 = vmul.f32 %v1049_v52, %v2121_v41 }
 0x7ad   :  { %v1054_v6 = vpop.permute.xlu0 %1053 }
 0x7ae   :  { %v1101_v11 = vpack.c.bf16 %v1051_v4, %v1043_v1  ;;  %v1056_v12 = vpop.permute.xlu1 %1055  ;;  %v1102_v13 = vpack.c.bf16 %v1052_v5, %v1044_v2 }
 0x7af   :  { %v1057_v15 = vsel %vm221_vm3, %v1054_v6, %v1056_v12  ;;  %v1058_v16 = vsel %vm221_vm3, %v1056_v12, %v1054_v6 }
 0x7b0   :  { %1127 = vmatprep.subr.bf16.mxu1 %v1102_v13  ;;  %v1059_v9 = vmul.f32 %v1058_v16, %v2171_v0  ;;  %v1060_v21 = vmul.f32 %v1057_v15, %v2146_v49 }
 0x7b1   :  { %1128 = vmatpush1.bf16.msra.mxu1 %v1101_v11  ;;  %v1062_v17 = vpop.permute.xlu0 %1061 }
 0x7b2   :  { %v1064_v18 = vpop.permute.xlu1 %1063 }
 0x7b3   :  { %v1065_v19 = vsel %vm241_vm5, %v1062_v17, %v1064_v18  ;;  %v1066_v20 = vsel %vm241_vm5, %v1064_v18, %v1062_v17 }
 0x7b4   :  { %v1067_v23 = vmul.f32 %v1066_v20, %v2149_v50  ;;  %v1068_v25 = vmul.f32 %v1065_v19, %v2137_v46  ;;  %v1111_v20 = vld [vmem:[%s2987_s4] sm:$0xf] }
 0x7b5   :  { %v1070_v39 = vpop.permute.xlu0 %1069 }
 0x7b6   :  { %v1103_v54 = vpack.c.bf16 %v1067_v23, %v1059_v9  ;;  %v1072_v55 = vpop.permute.xlu1 %1071  ;;  %v1104_v34 = vpack.c.bf16 %v1068_v25, %v1060_v21 }
 0x7b7   :  { %v1073_v56 = vsel %vm261_vm6, %v1070_v39, %v1072_v55  ;;  %v1074_v58 = vsel %vm261_vm6, %v1072_v55, %v1070_v39 }
 0x7b8   :  { %v1075_v60 = vmul.f32 %v1073_v56, %v2180_v14  ;;  %v1076_v7 = vmul.f32 %v1074_v58, %v2153_v53  ;;  %1129 = vmatprep.subr.bf16.mxu1 %v1104_v34 }
 0x7b9   :  { %1130 = vmatpush1.bf16.msra.mxu1 %v1103_v54  ;;  %v1078_v33 = vpop.permute.xlu0 %1077 }
 0x7ba   :  { %v1105_v57 = vpack.c.bf16 %v1075_v60, %v2560_v59  ;;  %v1080_v61 = vpop.permute.xlu1 %1079  ;;  %v1106_v22 = vpack.c.bf16 %v1076_v7, %v2562_v37 }
 0x7bb   :  { %v1081_v24 = vsel %vm281_vm7, %v1078_v33, %v1080_v61  ;;  %v1082_v28 = vsel %vm281_vm7, %v1080_v61, %v1078_v33 }
 0x7bc   :  { %1131 = vmatprep.subr.bf16.mxu1 %v1106_v22  ;;  %v1083_v52 = vmul.f32 %v1081_v24, %v2195_v26  ;;  %v1084_v63 = vmul.f32 %v1082_v28, %v2198_v27 }
 0x7bd   :  { %1132 = vmatpush1.bf16.msra.mxu1 %v1105_v57  ;;  %v1086_v44 = vpop.permute.xlu0 %1085 }
 0x7be   :  { %v1088_v35 = vpop.permute.xlu1 %1087 }
 0x7bf   :  { %v1089_v8 = vsel %vm301_vm8, %v1086_v44, %v1088_v35  ;;  %v1090_v45 = vsel %vm301_vm8, %v1088_v35, %v1086_v44 }
 0x7c0   :  { %v1091_v1 = vmul.f32 %v1089_v8, %v2205_v31  ;;  %v1092_v2 = vmul.f32 %v1090_v45, %v2208_v32 }
 0x7c1   :  { %v1094_v4 = vpop.permute.xlu0 %1093 }
 0x7c2   :  { %v1107_v5 = vpack.c.bf16 %v1091_v1, %v1083_v52  ;;  %v1096_v6 = vpop.permute.xlu1 %1095  ;;  %v1108_v11 = vpack.c.bf16 %v1092_v2, %v1084_v63 }
 0x7c3   :  { %v1097_v12 = vsel %vm321_vm9, %v1094_v4, %v1096_v6  ;;  %v1098_v13 = vsel %vm321_vm9, %v1096_v6, %v1094_v4 }
 0x7c4   :  { %v1099_v15 = vmul.f32 %v1097_v12, %v2225_v51  ;;  %v1100_v16 = vmul.f32 %v1098_v13, %v2217_v40  ;;  %1133 = vmatprep.subr.bf16.mxu1 %v1108_v11 }
 0x7c5   :  { %1134 = vmatpush1.bf16.msra.mxu1 %v1107_v5 }
 0x7c6   :  { %v1109_v17 = vpack.c.bf16 %v1099_v15, %v1099_v15  ;;  %v1110_v18 = vpack.c.bf16 %v1100_v16, %v1100_v16 }
 0x7c8   :  { %1756 = vmatprep.subr.msk.bf16.mxu1 %vm358_vm10, %v1110_v18  ;;  %v1122_v19 = vsel %vm358_vm10, %v1109_v17, 0 }
 0x7c9   :  { %1136 = vmatpush1.bf16.msra.mxu1 %v1122_v19 }
 0x7cc   :  { %1757 = vmatmul.mubr.msk.bf16.vlgmr.msra.gmra.mrb[12].mxu1 %vm354_vm11, %v1111_v20 }
 0x7cd   :  { %1449 = vmatprep.mubr.bf16.mxu1 %v1948_v3 }
 0x7d2   :  { %v1116_v39 = vpop.permute.xlu0 %1115 }
 0x807   :  { %v2658_v9 = vpop.f32.mrb[8].mxu1 }
 0x808   :  { %v2660_v21 = vpop.f32.mrb[9].mxu1 }
 0x809   :  { %v2662_v23 = vpop.f32.mrb[10].mxu1 }
 0x80a   :  { %v2664_v25 = vpop.f32.mrb[11].mxu1 }
 0x89f   :  { %v1161_v54 = vpop.f32.mrb[12].mxu1 }
 0x8a0   :  { %v1162_v55 = vadd.f32 %v1161_v54, %v1116_v39  ;;  %v1163_v34 = vpop.f32.mrb[13].mxu1 }
 0x8a1   :  { %v1164_v56 = vadd.f32 %v1163_v34, %v1116_v39  ;;  %v1165_v58 = vpop.f32.mrb[14].mxu1 }
 0x8a2   :  { %v1758_v60 = vmul.f32 -1.442695, %v1162_v55  ;;  %v1166_v7 = vpop.f32.mrb[15].mxu1 }
 0x8a3   :  { %v1759_v33 = vmul.f32 -1.442695, %v1164_v56 }
 0x8a4   :  { %1850 = vpow2.f32 %v1758_v60 }
 0x8a5   :  { %1852 = vpow2.f32 %v1759_v33 }
 0x8ae   :  { %v1851_v57 = vpop.eup %1850 }
 0x8af   :  { %v1853_v61 = vpop.eup %1852  ;;  %v1174_v22 = vadd.f32 1.0, %v1851_v57 }
 0x8b0   :  { %v1175_v24 = vadd.f32 1.0, %v1853_v61 }
 0x8b1   :  { %1854 = vrcp.f32 %v1174_v22 }
 0x8b2   :  { %1856 = vrcp.f32 %v1175_v24 }
 0x8bb   :  { %v1855_v28 = vpop.eup %1854 }
 0x8bc   :  { %v1857_v44 = vpop.eup %1856  ;;  %v2666_v35 = vmul.f32 %v1855_v28, %v1162_v55 }
 0x8bd   :  { %v1181_v8 = vmul.f32 %v1857_v44, %v1164_v56 }
 0x8be   :  { %1182 = vrot.lane.b32.xlu1 %v2666_v35, %s1950_s19 }
 0x8bf   :  { %1184 = vrot.lane.b32.xlu0 %v1181_v8, %s1950_s19 }
 0x8c2   :  { %1190 = vrot.lane.b32.xlu1 %v2666_v35, %s1949_s2 }
 0x8c3   :  { %1192 = vrot.lane.b32.xlu0 %v1181_v8, %s1949_s2 }
 0x8c6   :  { %1198 = vrot.lane.b32.xlu1 %v2666_v35, %s1951_s20 }
 0x8c7   :  { %1200 = vrot.lane.b32.xlu0 %v1181_v8, %s1951_s20 }
 0x8ca   :  { %1206 = vrot.lane.b32.xlu1 %v2666_v35, %s1952_s21 }
 0x8cb   :  { %1208 = vrot.lane.b32.xlu0 %v1181_v8, %s1952_s21 }
 0x8ce   :  { %1214 = vrot.lane.b32.xlu1 %v2666_v35, %s1953_s22 }
 0x8cf   :  { %1216 = vrot.lane.b32.xlu0 %v1181_v8, %s1953_s22 }
 0x8d2   :  { %1222 = vrot.lane.b32.xlu1 %v2666_v35, %s1954_s23 }
 0x8d3   :  { %1224 = vrot.lane.b32.xlu0 %v1181_v8, %s1954_s23 }
 0x8d6   :  { %1230 = vrot.lane.b32.xlu1 %v2666_v35, %s1955_s24 }
 0x8d7   :  { %1232 = vrot.lane.b32.xlu0 %v1181_v8, %s1955_s24 }
 0x8da   :  { %1238 = vrot.lane.b32.xlu1 %v2666_v35, %s1956_s25 }
 0x8db   :  { %1240 = vrot.lane.b32.xlu0 %v1181_v8, %s1956_s25 }
 0x8de   :  { %1260 = vperm.xlu1 %1789, %v2273_v36  }
 0x930   :  { %v1183_v45 = vpop.permute.xlu1 %1182 }
 0x931   :  { %v1185_v52 = vpop.permute.xlu0 %1184 }
 0x932   :  { %v1186_v63 = vsel %vm181_vm4, %v1183_v45, %v1185_v52  ;;  %v1187_v1 = vsel %vm181_vm4, %v1185_v52, %v1183_v45 }
 0x933   :  { %v1188_v11 = vmul.f32 %v1187_v1, %v2143_v48  ;;  %v1189_v36 = vmul.f32 %v1186_v63, %v2140_v47 }
 0x934   :  { %v1191_v2 = vpop.permute.xlu1 %1190 }
 0x935   :  { %v1193_v4 = vpop.permute.xlu0 %1192 }
 0x936   :  { %v1194_v5 = vsel %vm201_vm2, %v1191_v2, %v1193_v4  ;;  %v1195_v6 = vsel %vm201_vm2, %v1193_v4, %v1191_v2 }
 0x937   :  { %v1196_v12 = vmul.f32 %v1195_v6, %v2124_v42  ;;  %v1197_v13 = vmul.f32 %v1194_v5, %v2121_v41 }
 0x938   :  { %v1199_v15 = vpop.permute.xlu1 %1198 }
 0x939   :  { %v1246_v16 = vpack.c.bf16 %v1196_v12, %v1188_v11  ;;  %v1201_v17 = vpop.permute.xlu0 %1200  ;;  %v1247_v18 = vpack.c.bf16 %v1197_v13, %v1189_v36 }
 0x93a   :  { %v1202_v19 = vsel %vm221_vm3, %v1199_v15, %v1201_v17  ;;  %v1203_v20 = vsel %vm221_vm3, %v1201_v17, %v1199_v15 }
 0x93b   :  { %1272 = vmatprep.subr.bf16.mxu0 %v1247_v18  ;;  %v1204_v56 = vmul.f32 %v1203_v20, %v2171_v0  ;;  %v1205_v58 = vmul.f32 %v1202_v19, %v2146_v49 }
 0x93c   :  { %1273 = vmatpush1.bf16.msra.mxu0 %v1246_v16  ;;  %v1207_v39 = vpop.permute.xlu1 %1206 }
 0x93d   :  { %v1209_v54 = vpop.permute.xlu0 %1208 }
 0x93e   :  { %v1210_v55 = vsel %vm241_vm5, %v1207_v39, %v1209_v54  ;;  %v1211_v34 = vsel %vm241_vm5, %v1209_v54, %v1207_v39 }
 0x93f   :  { %v1212_v60 = vmul.f32 %v1211_v34, %v2149_v50  ;;  %v1213_v7 = vmul.f32 %v1210_v55, %v2137_v46 }
 0x940   :  { %v1215_v33 = vpop.permute.xlu1 %1214 }
 0x941   :  { %v1248_v57 = vpack.c.bf16 %v1212_v60, %v1204_v56  ;;  %v1217_v61 = vpop.permute.xlu0 %1216  ;;  %v1249_v22 = vpack.c.bf16 %v1213_v7, %v1205_v58  ;;  %v1256_v60 = vld [vmem:[%s2989_s6] sm:$0xf] }
 0x942   :  { %v1218_v24 = vsel %vm261_vm6, %v1215_v33, %v1217_v61  ;;  %v1219_v28 = vsel %vm261_vm6, %v1217_v61, %v1215_v33 }
 0x943   :  { %v1220_v44 = vmul.f32 %v1218_v24, %v2180_v14  ;;  %v1221_v45 = vmul.f32 %v1219_v28, %v2153_v53  ;;  %1274 = vmatprep.subr.bf16.mxu0 %v1249_v22 }
 0x944   :  { %1275 = vmatpush1.bf16.msra.mxu0 %v1248_v57  ;;  %v1223_v52 = vpop.permute.xlu1 %1222 }
 0x945   :  { %v1250_v63 = vpack.c.bf16 %v1220_v44, %v2666_v35  ;;  %v1225_v1 = vpop.permute.xlu0 %1224  ;;  %v1251_v2 = vpack.c.bf16 %v1221_v45, %v1181_v8 }
 0x946   :  { %v1226_v4 = vsel %vm281_vm7, %v1223_v52, %v1225_v1  ;;  %v1227_v5 = vsel %vm281_vm7, %v1225_v1, %v1223_v52 }
 0x947   :  { %1276 = vmatprep.subr.bf16.mxu0 %v1251_v2  ;;  %v1228_v35 = vmul.f32 %v1226_v4, %v2195_v26  ;;  %v1229_v8 = vmul.f32 %v1227_v5, %v2198_v27 }
 0x948   :  { %1277 = vmatpush1.bf16.msra.mxu0 %v1250_v63  ;;  %v1231_v6 = vpop.permute.xlu1 %1230 }
 0x949   :  { %v1233_v11 = vpop.permute.xlu0 %1232 }
 0x94a   :  { %v1234_v36 = vsel %vm301_vm8, %v1231_v6, %v1233_v11  ;;  %v1235_v12 = vsel %vm301_vm8, %v1233_v11, %v1231_v6 }
 0x94b   :  { %v1236_v13 = vmul.f32 %v1234_v36, %v2205_v31  ;;  %v1237_v15 = vmul.f32 %v1235_v12, %v2208_v32 }
 0x94c   :  { %v1239_v16 = vpop.permute.xlu1 %1238 }
 0x94d   :  { %v1252_v17 = vpack.c.bf16 %v1236_v13, %v1228_v35  ;;  %v1241_v18 = vpop.permute.xlu0 %1240  ;;  %v1253_v19 = vpack.c.bf16 %v1237_v15, %v1229_v8 }
 0x94e   :  { %v1242_v20 = vsel %vm321_vm9, %v1239_v16, %v1241_v18  ;;  %v1243_v39 = vsel %vm321_vm9, %v1241_v18, %v1239_v16 }
 0x94f   :  { %v1244_v54 = vmul.f32 %v1242_v20, %v2225_v51  ;;  %v1245_v55 = vmul.f32 %v1243_v39, %v2217_v40  ;;  %1278 = vmatprep.subr.bf16.mxu0 %v1253_v19 }
 0x950   :  { %1279 = vmatpush1.bf16.msra.mxu0 %v1252_v17 }
 0x951   :  { %v1254_v34 = vpack.c.bf16 %v1244_v54, %v1244_v54  ;;  %v1255_v56 = vpack.c.bf16 %v1245_v55, %v1245_v55 }
 0x953   :  { %1760 = vmatprep.subr.msk.bf16.mxu0 %vm358_vm10, %v1255_v56  ;;  %v1267_v58 = vsel %vm358_vm10, %v1254_v34, 0 }
 0x954   :  { %1281 = vmatpush1.bf16.msra.mxu0 %v1267_v58 }
 0x957   :  { %1761 = vmatmul.mubr.msk.bf16.vlgmr.msra.gmra.mrb[16].mxu0 %vm354_vm11, %v1256_v60 }
 0x958   :  { %1594 = vmatprep.mubr.bf16.mxu0 %v1948_v3 }
 0x95d   :  { %v1261_v7 = vpop.permute.xlu1 %1260 }
 0xa2a   :  { %v1306_v33 = vpop.f32.mrb[16].mxu0 }
 0xa2b   :  { %v1307_v57 = vadd.f32 %v1306_v33, %v1261_v7  ;;  %v1308_v61 = vpop.f32.mrb[17].mxu0 }
 0xa2c   :  { %v1309_v22 = vadd.f32 %v1308_v61, %v1261_v7  ;;  %v1310_v24 = vpop.f32.mrb[18].mxu0 }
 0xa2d   :  { %v1762_v28 = vmul.f32 -1.442695, %v1307_v57  ;;  %v1311_v44 = vpop.f32.mrb[19].mxu0 }
 0xa2e   :  { %v1763_v45 = vmul.f32 -1.442695, %v1309_v22 }
 0xa2f   :  { %1858 = vpow2.f32 %v1762_v28 }
 0xa30   :  { %1860 = vpow2.f32 %v1763_v45 }
 0xa39   :  { %v1859_v52 = vpop.eup %1858 }
 0xa3a   :  { %v1861_v63 = vpop.eup %1860  ;;  %v1319_v1 = vadd.f32 1.0, %v1859_v52 }
 0xa3b   :  { %v1320_v2 = vadd.f32 1.0, %v1861_v63 }
 0xa3c   :  { %1862 = vrcp.f32 %v1319_v1 }
 0xa3d   :  { %1864 = vrcp.f32 %v1320_v2 }
 0xa46   :  { %v1863_v4 = vpop.eup %1862 }
 0xa47   :  { %v1865_v5 = vpop.eup %1864  ;;  %v2749_v6 = vmul.f32 %v1863_v4, %v1307_v57 }
 0xa48   :  { %v2751_v11 = vmul.f32 %v1865_v5, %v1309_v22 }
 0xa49   :  { %1327 = vrot.lane.b32.xlu0 %v2749_v6, %s1950_s19 }
 0xa4a   :  { %1329 = vrot.lane.b32.xlu1 %v2751_v11, %s1950_s19 }
 0xa4d   :  { %1335 = vrot.lane.b32.xlu0 %v2749_v6, %s1949_s2 }
 0xa4e   :  { %1337 = vrot.lane.b32.xlu1 %v2751_v11, %s1949_s2 }
 0xa51   :  { %1343 = vrot.lane.b32.xlu0 %v2749_v6, %s1951_s20 }
 0xa52   :  { %1345 = vrot.lane.b32.xlu1 %v2751_v11, %s1951_s20 }
 0xa55   :  { %1351 = vrot.lane.b32.xlu0 %v2749_v6, %s1952_s21 }
 0xa56   :  { %1353 = vrot.lane.b32.xlu1 %v2751_v11, %s1952_s21 }
 0xa59   :  { %1359 = vrot.lane.b32.xlu0 %v2749_v6, %s1953_s22 }
 0xa5a   :  { %1361 = vrot.lane.b32.xlu1 %v2751_v11, %s1953_s22 }
 0xa5d   :  { %1367 = vrot.lane.b32.xlu0 %v2749_v6, %s1954_s23 }
 0xa5e   :  { %1369 = vrot.lane.b32.xlu1 %v2751_v11, %s1954_s23 }
 0xa61   :  { %1375 = vrot.lane.b32.xlu0 %v2749_v6, %s1955_s24 }
 0xa62   :  { %1377 = vrot.lane.b32.xlu1 %v2751_v11, %s1955_s24 }
 0xa65   :  { %1383 = vrot.lane.b32.xlu0 %v2749_v6, %s1956_s25 }
 0xa66   :  { %1385 = vrot.lane.b32.xlu1 %v2751_v11, %s1956_s25 }
 0xa69   :  { %1405 = vperm.xlu0 %1788, %v2371_v38  }
 0xabb   :  { %v1328_v36 = vpop.permute.xlu0 %1327 }
 0xabc   :  { %v1330_v12 = vpop.permute.xlu1 %1329 }
 0xabd   :  { %v1331_v35 = vsel %vm181_vm4, %v1328_v36, %v1330_v12  ;;  %v1332_v8 = vsel %vm181_vm4, %v1330_v12, %v1328_v36 }
 0xabe   :  { %v1333_v18 = vmul.f32 %v1332_v8, %v2143_v48  ;;  %v1334_v38 = vmul.f32 %v1331_v35, %v2140_v47 }
 0xabf   :  { %v1336_v13 = vpop.permute.xlu0 %1335 }
 0xac0   :  { %v1338_v15 = vpop.permute.xlu1 %1337 }
 0xac1   :  { %v1339_v16 = vsel %vm201_vm2, %v1336_v13, %v1338_v15  ;;  %v1340_v17 = vsel %vm201_vm2, %v1338_v15, %v1336_v13 }
 0xac2   :  { %v1341_v19 = vmul.f32 %v1340_v17, %v2124_v42  ;;  %v1342_v20 = vmul.f32 %v1339_v16, %v2121_v41 }
 0xac3   :  { %v1344_v39 = vpop.permute.xlu0 %1343 }
 0xac4   :  { %v1391_v54 = vpack.c.bf16 %v1341_v19, %v1333_v18  ;;  %v1346_v55 = vpop.permute.xlu1 %1345  ;;  %v1392_v34 = vpack.c.bf16 %v1342_v20, %v1334_v38 }
 0xac5   :  { %v1347_v56 = vsel %vm221_vm3, %v1344_v39, %v1346_v55  ;;  %v1348_v58 = vsel %vm221_vm3, %v1346_v55, %v1344_v39 }
 0xac6   :  { %1417 = vmatprep.subr.bf16.mxu1 %v1392_v34  ;;  %v1349_v61 = vmul.f32 %v1348_v58, %v2171_v0  ;;  %v1350_v22 = vmul.f32 %v1347_v56, %v2146_v49 }
 0xac7   :  { %1418 = vmatpush1.bf16.msra.mxu1 %v1391_v54  ;;  %v1352_v60 = vpop.permute.xlu0 %1351 }
 0xac8   :  { %v1354_v7 = vpop.permute.xlu1 %1353 }
 0xac9   :  { %v1355_v33 = vsel %vm241_vm5, %v1352_v60, %v1354_v7  ;;  %v1356_v57 = vsel %vm241_vm5, %v1354_v7, %v1352_v60 }
 0xaca   :  { %v1357_v24 = vmul.f32 %v1356_v57, %v2149_v50  ;;  %v1358_v28 = vmul.f32 %v1355_v33, %v2137_v46 }
 0xacb   :  { %v1360_v44 = vpop.permute.xlu0 %1359 }
 0xacc   :  { %v1393_v45 = vpack.c.bf16 %v1357_v24, %v1349_v61  ;;  %v1362_v52 = vpop.permute.xlu1 %1361  ;;  %v1394_v63 = vpack.c.bf16 %v1358_v28, %v1350_v22  ;;  %v1401_v28 = vld [vmem:[%s2991_s8] sm:$0xf] }
 0xacd   :  { %v1363_v1 = vsel %vm261_vm6, %v1360_v44, %v1362_v52  ;;  %v1364_v2 = vsel %vm261_vm6, %v1362_v52, %v1360_v44 }
 0xace   :  { %v1365_v4 = vmul.f32 %v1363_v1, %v2180_v14  ;;  %v1366_v5 = vmul.f32 %v1364_v2, %v2153_v53  ;;  %1419 = vmatprep.subr.bf16.mxu1 %v1394_v63 }
 0xacf   :  { %1420 = vmatpush1.bf16.msra.mxu1 %v1393_v45  ;;  %v1368_v36 = vpop.permute.xlu0 %1367 }
 0xad0   :  { %v1395_v12 = vpack.c.bf16 %v1365_v4, %v2749_v6  ;;  %v1370_v35 = vpop.permute.xlu1 %1369  ;;  %v1396_v8 = vpack.c.bf16 %v1366_v5, %v2751_v11 }
 0xad1   :  { %v1371_v13 = vsel %vm281_vm7, %v1368_v36, %v1370_v35  ;;  %v1372_v15 = vsel %vm281_vm7, %v1370_v35, %v1368_v36 }
 0xad2   :  { %1421 = vmatprep.subr.bf16.mxu1 %v1396_v8  ;;  %v1373_v19 = vmul.f32 %v1371_v13, %v2195_v26  ;;  %v1374_v20 = vmul.f32 %v1372_v15, %v2198_v27 }
 0xad3   :  { %1422 = vmatpush1.bf16.msra.mxu1 %v1395_v12  ;;  %v1376_v16 = vpop.permute.xlu0 %1375 }
 0xad4   :  { %v1378_v17 = vpop.permute.xlu1 %1377 }
 0xad5   :  { %v1379_v18 = vsel %vm301_vm8, %v1376_v16, %v1378_v17  ;;  %v1380_v38 = vsel %vm301_vm8, %v1378_v17, %v1376_v16 }
 0xad6   :  { %v1381_v39 = vmul.f32 %v1379_v18, %v2205_v31  ;;  %v1382_v54 = vmul.f32 %v1380_v38, %v2208_v32  ;;  %v70_v18 = vld [vmem:[%s2996_s13] sm:$0xff]  ;;  %v71_v38 = vld [vmem:[%s2996_s13 + $0x8] sm:$0xff] }
 0xad7   :  { %v1384_v55 = vpop.permute.xlu0 %1383 }
 0xad8   :  { %v1397_v34 = vpack.c.bf16 %v1381_v39, %v1373_v19  ;;  %v1386_v56 = vpop.permute.xlu1 %1385  ;;  %v1398_v58 = vpack.c.bf16 %v1382_v54, %v1374_v20 }
 0xad9   :  { %v1387_v60 = vsel %vm321_vm9, %v1384_v55, %v1386_v56  ;;  %v1388_v7 = vsel %vm321_vm9, %v1386_v56, %v1384_v55 }
 0xada   :  { %v1389_v33 = vmul.f32 %v1387_v60, %v2225_v51  ;;  %v1390_v57 = vmul.f32 %v1388_v7, %v2217_v40  ;;  %1423 = vmatprep.subr.bf16.mxu1 %v1398_v58 }
 0xadb   :  { %1424 = vmatpush1.bf16.msra.mxu1 %v1397_v34 }
 0xadc   :  { %v1399_v61 = vpack.c.bf16 %v1389_v33, %v1389_v33  ;;  %v1400_v22 = vpack.c.bf16 %v1390_v57, %v1390_v57 }
 0xade   :  { %1764 = vmatprep.subr.msk.bf16.mxu1 %vm358_vm10, %v1400_v22  ;;  %v1412_v24 = vsel %vm358_vm10, %v1399_v61, 0 }
 0xadf   :  { %1426 = vmatpush1.bf16.msra.mxu1 %v1412_v24 }
 0xae2   :  { %1765 = vmatmul.mubr.msk.bf16.vlgmr.msra.gmra.mrb[16].mxu1 %vm354_vm11, %v1401_v28 }
 0xae3   :  { %1653 = vmatprep.mubr.bf16.mxu1 %v1948_v3 }
 0xae8   :  { %v1406_v44 = vpop.permute.xlu0 %1405 }
 0xbb5   :  { %v1451_v45 = vpop.f32.mrb[16].mxu1 }
 0xbb6   :  { %v1452_v52 = vadd.f32 %v1451_v45, %v1406_v44  ;;  %v1453_v63 = vpop.f32.mrb[17].mxu1 }
 0xbb7   :  { %v1454_v1 = vadd.f32 %v1453_v63, %v1406_v44  ;;  %v1455_v2 = vpop.f32.mrb[18].mxu1 }
 0xbb8   :  { %v1766_v4 = vmul.f32 -1.442695, %v1452_v52  ;;  %v1456_v5 = vpop.f32.mrb[19].mxu1 }
 0xbb9   :  { %v1767_v36 = vmul.f32 -1.442695, %v1454_v1 }
 0xbba   :  { %1866 = vpow2.f32 %v1766_v4 }
 0xbbb   :  { %1868 = vpow2.f32 %v1767_v36 }
 0xbc4   :  { %v1867_v12 = vpop.eup %1866 }
 0xbc5   :  { %v1869_v35 = vpop.eup %1868  ;;  %v1464_v8 = vadd.f32 1.0, %v1867_v12 }
 0xbc6   :  { %v1465_v13 = vadd.f32 1.0, %v1869_v35 }
 0xbc7   :  { %1870 = vrcp.f32 %v1464_v8 }
 0xbc8   :  { %1872 = vrcp.f32 %v1465_v13 }
 0xbd1   :  { %v1871_v15 = vpop.eup %1870 }
 0xbd2   :  { %v1873_v16 = vpop.eup %1872  ;;  %v2843_v3 = vmul.f32 %v1871_v15, %v1452_v52 }
 0xbd3   :  { %v2845_v17 = vmul.f32 %v1873_v16, %v1454_v1 }
 0xbd4   :  { %1472 = vrot.lane.b32.xlu1 %v2843_v3, %s1950_s19 }
 0xbd5   :  { %1474 = vrot.lane.b32.xlu0 %v2845_v17, %s1950_s19 }
 0xbd8   :  { %1480 = vrot.lane.b32.xlu1 %v2843_v3, %s1949_s2 }
 0xbd9   :  { %1482 = vrot.lane.b32.xlu0 %v2845_v17, %s1949_s2 }
 0xbdc   :  { %1488 = vrot.lane.b32.xlu1 %v2843_v3, %s1951_s20 }
 0xbdd   :  { %1490 = vrot.lane.b32.xlu0 %v2845_v17, %s1951_s20 }
 0xbe0   :  { %1496 = vrot.lane.b32.xlu1 %v2843_v3, %s1952_s21 }
 0xbe1   :  { %1498 = vrot.lane.b32.xlu0 %v2845_v17, %s1952_s21 }
 0xbe4   :  { %1504 = vrot.lane.b32.xlu1 %v2843_v3, %s1953_s22 }
 0xbe5   :  { %1506 = vrot.lane.b32.xlu0 %v2845_v17, %s1953_s22 }
 0xbe8   :  { %1512 = vrot.lane.b32.xlu1 %v2843_v3, %s1954_s23 }
 0xbe9   :  { %1514 = vrot.lane.b32.xlu0 %v2845_v17, %s1954_s23 }
 0xbec   :  { %1520 = vrot.lane.b32.xlu1 %v2843_v3, %s1955_s24 }
 0xbed   :  { %1522 = vrot.lane.b32.xlu0 %v2845_v17, %s1955_s24 }
 0xbf0   :  { %1528 = vrot.lane.b32.xlu1 %v2843_v3, %s1956_s25 }
 0xbf1   :  { %1530 = vrot.lane.b32.xlu0 %v2845_v17, %s1956_s25 }
 0xbf4   :  { %1550 = vperm.xlu1 %1789, %v2470_v29  }
 0xbf5   :  { %861 = vperm.xlu0 %1788, %v70_v18  }
 0xbf8   :  { %866 = vperm.xlu1 %1789, %v71_v38  }
 0xc46   :  { %v1473_v19 = vpop.permute.xlu1 %1472 }
 0xc47   :  { %v1475_v20 = vpop.permute.xlu0 %1474 }
 0xc48   :  { %v1476_v39 = vsel %vm181_vm4, %v1473_v19, %v1475_v20  ;;  %v1477_v54 = vsel %vm181_vm4, %v1475_v20, %v1473_v19 }
 0xc49   :  { %v1478_v58 = vmul.f32 %v1477_v54, %v2143_v48  ;;  %v1479_v60 = vmul.f32 %v1476_v39, %v2140_v47 }
 0xc4a   :  { %v1481_v55 = vpop.permute.xlu1 %1480 }
 0xc4b   :  { %v1483_v34 = vpop.permute.xlu0 %1482 }
 0xc4c   :  { %v1484_v56 = vsel %vm201_vm2, %v1481_v55, %v1483_v34  ;;  %v1485_v29 = vsel %vm201_vm2, %v1483_v34, %v1481_v55 }
 0xc4d   :  { %v1486_v7 = vmul.f32 %v1485_v29, %v2124_v42  ;;  %v1487_v33 = vmul.f32 %v1484_v56, %v2121_v41 }
 0xc4e   :  { %v1489_v57 = vpop.permute.xlu1 %1488 }
 0xc4f   :  { %v1536_v61 = vpack.c.bf16 %v1486_v7, %v1478_v58  ;;  %v1491_v22 = vpop.permute.xlu0 %1490  ;;  %v1537_v24 = vpack.c.bf16 %v1487_v33, %v1479_v60  ;;  %v1546_v60 = vld [vmem:[%s2993_s10] sm:$0xf] }
 0xc50   :  { %v1492_v28 = vsel %vm221_vm3, %v1489_v57, %v1491_v22  ;;  %v1493_v44 = vsel %vm221_vm3, %v1491_v22, %v1489_v57 }
 0xc51   :  { %1562 = vmatprep.subr.bf16.mxu0 %v1537_v24  ;;  %v1494_v42 = vmul.f32 %v1493_v44, %v2171_v0  ;;  %v1495_v52 = vmul.f32 %v1492_v28, %v2146_v49 }
 0xc52   :  { %1563 = vmatpush1.bf16.msra.mxu0 %v1536_v61  ;;  %v1497_v45 = vpop.permute.xlu1 %1496 }
 0xc53   :  { %v1499_v48 = vpop.permute.xlu0 %1498 }
 0xc54   :  { %v1500_v47 = vsel %vm241_vm5, %v1497_v45, %v1499_v48  ;;  %v1501_v41 = vsel %vm241_vm5, %v1499_v48, %v1497_v45 }
 0xc55   :  { %v1502_v63 = vmul.f32 %v1501_v41, %v2149_v50  ;;  %v1503_v1 = vmul.f32 %v1500_v47, %v2137_v46 }
 0xc56   :  { %v1505_v2 = vpop.permute.xlu1 %1504 }
 0xc57   :  { %v1538_v4 = vpack.c.bf16 %v1502_v63, %v1494_v42  ;;  %v1507_v5 = vpop.permute.xlu0 %1506  ;;  %v1539_v36 = vpack.c.bf16 %v1503_v1, %v1495_v52 }
 0xc58   :  { %v1508_v12 = vsel %vm261_vm6, %v1505_v2, %v1507_v5  ;;  %v1509_v35 = vsel %vm261_vm6, %v1507_v5, %v1505_v2 }
 0xc59   :  { %v1510_v8 = vmul.f32 %v1508_v12, %v2180_v14  ;;  %v1511_v0 = vmul.f32 %v1509_v35, %v2153_v53  ;;  %1564 = vmatprep.subr.bf16.mxu0 %v1539_v36  ;;  %v1003_v12 = vadd.f32 %v2549_v10, %v2541_v43  ;;  %v1001_v35 = vadd.f32 %v2547_v62, %v2541_v43 }
 0xc5a   :  { %1565 = vmatpush1.bf16.msra.mxu0 %v1538_v4  ;;  %v1513_v49 = vpop.permute.xlu1 %1512 }
 0xc5b   :  { %v1540_v50 = vpack.c.bf16 %v1510_v8, %v2843_v3  ;;  %v1515_v46 = vpop.permute.xlu0 %1514  ;;  %v1541_v13 = vpack.c.bf16 %v1511_v0, %v2845_v17  ;;  %v1753_v8 = vmul.f32 -1.442695, %v1003_v12  ;;  %v1752_v0 = vmul.f32 -1.442695, %v1001_v35 }
 0xc5c   :  { %v1516_v15 = vsel %vm281_vm7, %v1513_v49, %v1515_v46  ;;  %v1517_v16 = vsel %vm281_vm7, %v1515_v46, %v1513_v49 }
 0xc5d   :  { %1566 = vmatprep.subr.bf16.mxu0 %v1541_v13  ;;  %v1518_v3 = vmul.f32 %v1516_v15, %v2195_v26  ;;  %v1519_v17 = vmul.f32 %v1517_v16, %v2198_v27 }
 0xc5e   :  { %1567 = vmatpush1.bf16.msra.mxu0 %v1540_v50  ;;  %v1521_v18 = vpop.permute.xlu1 %1520 }
 0xc5f   :  { %v1523_v14 = vpop.permute.xlu0 %1522 }
 0xc60   :  { %v1524_v53 = vsel %vm301_vm8, %v1521_v18, %v1523_v14  ;;  %v1525_v38 = vsel %vm301_vm8, %v1523_v14, %v1521_v18 }
 0xc61   :  { %v1526_v19 = vmul.f32 %v1524_v53, %v2205_v31  ;;  %v1527_v20 = vmul.f32 %v1525_v38, %v2208_v32 }
 0xc62   :  { %v1529_v39 = vpop.permute.xlu1 %1528 }
 0xc63   :  { %v1542_v54 = vpack.c.bf16 %v1526_v19, %v1518_v3  ;;  %v1531_v55 = vpop.permute.xlu0 %1530  ;;  %v1543_v34 = vpack.c.bf16 %v1527_v20, %v1519_v17 }
 0xc64   :  { %v1532_v56 = vsel %vm321_vm9, %v1529_v39, %v1531_v55  ;;  %v1533_v29 = vsel %vm321_vm9, %v1531_v55, %v1529_v39 }
 0xc65   :  { %v1534_v58 = vmul.f32 %v1532_v56, %v2225_v51  ;;  %v1535_v26 = vmul.f32 %v1533_v29, %v2217_v40  ;;  %1568 = vmatprep.subr.bf16.mxu0 %v1543_v34 }
 0xc66   :  { %1569 = vmatpush1.bf16.msra.mxu0 %v1542_v54 }
 0xc67   :  { %v1544_v27 = vpack.c.bf16 %v1534_v58, %v1534_v58  ;;  %v1545_v31 = vpack.c.bf16 %v1535_v26, %v1535_v26 }
 0xc69   :  { %1768 = vmatprep.subr.msk.bf16.mxu0 %vm358_vm10, %v1545_v31  ;;  %v1557_v32 = vsel %vm358_vm10, %v1544_v27, 0 }
 0xc6a   :  { %1571 = vmatpush1.bf16.msra.mxu0 %v1557_v32 }
 0xc6d   :  { %1769 = vmatmul.mubr.msk.bf16.vlgmr.msra.gmra.mrb[20].mxu0 %vm354_vm11, %v1546_v60  ;;  %v1923_v60 = vld [vmem:[%s2995_s12] sm:$0xff]   ;;  %s1957_s12 = smov [#allocation2]  }
 0xc6e   :  { %s1702_s24 = sshll.u32 %s1957_s12, 4  ;;  %s1703_s24 = int_to_ptr.vmem [resolvable:$true] %s1702_s24 }
 0xc6f   :  { %s1924_s25 = scalar_lea.vmem %s1703_s24, 1024  ;;  %p1929_p1 = scmp.lt.s32.totalorder %s1703_s24, %s1703_s24 }
 0xc70   :  { %p1925_p0 = scmp.ne.s32.totalorder %s1703_s24, %s1924_s25  ;;  %p1930_p2 = scmp.lt.s32.totalorder %s1924_s25, %s1924_s25 }
 0xc72   :  { %p1931_p3 = por %p1930_p2, %p1929_p1 }
 0xc73   :  { %v1551_v30 = vpop.permute.xlu1 %1550 }
 0xc74   :  { %v2942_v7 = vpop.permute.xlu0 %861  ;;  %p1932_p4 = pnand %p1931_p3, %p1925_p0 }
 0xc75   :  { %v913_v40 = vadd.f32 %v2658_v9, %v2942_v7  ;;  %v915_v51 = vadd.f32 %v2660_v21, %v2942_v7 }
 0xc77   :  { %v1745_v33 = vmul.f32 -1.442695, %v913_v40  ;;  %v1746_v57 = vmul.f32 -1.442695, %v915_v51  ;;  %v2948_v61 = vpop.permute.xlu1 %866 }
 0xc78   :  { %v917_v22 = vadd.f32 %v2662_v23, %v2948_v61  ;;  %v919_v24 = vadd.f32 %v2664_v25, %v2948_v61 }
 0xc79   :  { %1874 = vpow2.f32 %v1745_v33 }
 0xc7a   :  { %1876 = vpow2.f32 %v1746_v57  ;;  %v1747_v28 = vmul.f32 -1.442695, %v917_v22  ;;  %v1748_v44 = vmul.f32 -1.442695, %v919_v24 }
 0xc7c   :  { %1878 = vpow2.f32 %v1747_v28 }
 0xc7d   :  { %1880 = vpow2.f32 %v1748_v44 }
 0xc83   :  { %v1875_v9 = vpop.eup %1874 }
 0xc84   :  { %v1877_v45 = vpop.eup %1876  ;;  %v933_v48 = vadd.f32 1.0, %v1875_v9 }
 0xc85   :  { %v934_v21 = vadd.f32 1.0, %v1877_v45 }
 0xc86   :  { %v1879_v47 = vpop.eup %1878  ;;  %1882 = vrcp.f32 %v933_v48 }
 0xc87   :  { %v1881_v41 = vpop.eup %1880  ;;  %1884 = vrcp.f32 %v934_v21  ;;  %v935_v42 = vadd.f32 1.0, %v1879_v47 }
 0xc88   :  { %v936_v52 = vadd.f32 1.0, %v1881_v41 }
 0xc89   :  { %1886 = vrcp.f32 %v935_v42 }
 0xc8a   :  { %1888 = vrcp.f32 %v936_v52 }
 0xc8b   :  { %1890 = vpow2.f32 %v1753_v8 }
 0xc8c   :  { %1892 = vpow2.f32 %v1752_v0 }
 0xc90   :  { %v1883_v23 = vpop.eup %1882 }
 0xc91   :  { %v1885_v25 = vpop.eup %1884  ;;  %v945_v63 = vmul.f32 %v1883_v23, %v913_v40 }
 0xc92   :  { %v946_v1 = vmul.f32 %v1885_v25, %v915_v51 }
 0xc93   :  { %v1887_v2 = vpop.eup %1886  ;;  %949 = vst [vmem:[#allocation2] sm:$0xff] %v945_v63 }
 0xc94   :  { %v1889_v4 = vpop.eup %1888  ;;  %950 = vst [vmem:[#allocation2 + $0x8] sm:$0xff] %v946_v1  ;;  %v947_v5 = vmul.f32 %v1887_v2, %v917_v22 }
 0xc95   :  { %v948_v36 = vmul.f32 %v1889_v4, %v919_v24  ;;  %v1891_v53 = vpop.eup %1890 }
 0xc96   :  { %951 = vst [vmem:[#allocation2 + $0x10] sm:$0xff] %v947_v5  ;;  %v1022_v38 = vadd.f32 1.0, %v1891_v53  ;;  %v1893_v10 = vpop.eup %1892 }
 0xc97   :  { %952 = vst [vmem:[#allocation2 + $0x18] sm:$0xff] %v948_v36  ;;  %v1021_v19 = vadd.f32 1.0, %v1893_v10 }
 0xd40   :  { %v1596_v49 = vpop.f32.mrb[20].mxu0 }
 0xd41   :  { %v1597_v50 = vadd.f32 %v1596_v49, %v1551_v30  ;;  %v1598_v46 = vpop.f32.mrb[21].mxu0 }
 0xd42   :  { %v1599_v13 = vadd.f32 %v1598_v46, %v1551_v30  ;;  %v1600_v15 = vpop.f32.mrb[22].mxu0 }
 0xd43   :  { %v1770_v16 = vmul.f32 -1.442695, %v1597_v50  ;;  %v1601_v18 = vpop.f32.mrb[23].mxu0 }
 0xd44   :  { %v1771_v14 = vmul.f32 -1.442695, %v1599_v13 }
 0xd45   :  { %1894 = vpow2.f32 %v1770_v16 }
 0xd46   :  { %1896 = vpow2.f32 %v1771_v14 }
 0xd47   :  { %1898 = vrcp.f32 %v1022_v38 }
 0xd4f   :  { %v1895_v3 = vpop.eup %1894 }
 0xd50   :  { %v1897_v17 = vpop.eup %1896  ;;  %v1609_v43 = vadd.f32 1.0, %v1895_v3 }
 0xd51   :  { %v1610_v62 = vadd.f32 1.0, %v1897_v17  ;;  %v1899_v20 = vpop.eup %1898 }
 0xd52   :  { %1900 = vrcp.f32 %v1609_v43  ;;  %v1034_v29 = vmul.f32 %v1899_v20, %v1003_v12 }
 0xd53   :  { %1902 = vrcp.f32 %v1610_v62 }
 0xd54   :  { %1904 = vrcp.f32 %v1021_v19  ;;  %v1620_v27 = vpack.c.bf16 %v1034_v29, %v2562_v37 }
 0xd5c   :  { %v1901_v39 = vpop.eup %1900 }
 0xd5d   :  { %v1903_v54 = vpop.eup %1902  ;;  %v1615_v55 = vmul.f32 %v1901_v39, %v1597_v50 }
 0xd5e   :  { %v1616_v34 = vmul.f32 %v1903_v54, %v1599_v13  ;;  %v1905_v56 = vpop.eup %1904 }
 0xd5f   :  { %v1617_v26 = vpack.c.bf16 %v2749_v6, %v1615_v55  ;;  %v1033_v31 = vmul.f32 %v1905_v56, %v1001_v35 }
 0xd60   :  { %v1618_v58 = vpack.c.bf16 %v2751_v11, %v1616_v34 }
 0xd61   :  { %v1619_v32 = vpack.c.bf16 %v1033_v31, %v2560_v59 }
 0xd62   :  { %1621 = vmatprep.subr.bf16.mxu1 %v1618_v58 }
 0xd63   :  { %1622 = vmatpush1.bf16.msra.mxu1 %v1617_v26 }
 0xd64   :  { %1623 = vmatprep.subr.bf16.mxu1 %v1620_v27 }
 0xd67   :  { %1624 = vmatpush1.bf16.msra.mxu1 %v1619_v32 }
 0xd6a   :  { %1772 = vmatmul.mubr.msk.bf16.vlgmr.msra.gmra.mrb[20].mxu1 %vm874_vm12, %v1923_v60 }
 0xe3d   :  { %v1655_v30 = vpop.f32.mrb[20].mxu1 }
 0xe3e   :  { %v1656_v11 = vadd.f32 %v1655_v30, %v2942_v7  ;;  %v1657_v40 = vpop.f32.mrb[21].mxu1 }
 0xe3f   :  { %v1658_v6 = vadd.f32 %v1657_v40, %v2942_v7  ;;  %v1659_v51 = vpop.f32.mrb[22].mxu1 }
 0xe40   :  { %v1773_v37 = vmul.f32 -1.442695, %v1656_v11  ;;  %v1660_v33 = vadd.f32 %v1659_v51, %v2948_v61  ;;  %v1661_v57 = vpop.f32.mrb[23].mxu1 }
 0xe41   :  { %v1774_v22 = vmul.f32 -1.442695, %v1658_v6  ;;  %v1662_v59 = vadd.f32 %v1661_v57, %v2948_v61 }
 0xe42   :  { %1906 = vpow2.f32 %v1773_v37  ;;  %v1775_v24 = vmul.f32 -1.442695, %v1660_v33 }
 0xe43   :  { %1908 = vpow2.f32 %v1774_v22  ;;  %v1776_v28 = vmul.f32 -1.442695, %v1662_v59 }
 0xe44   :  { %1910 = vpow2.f32 %v1775_v24 }
 0xe45   :  { %1912 = vpow2.f32 %v1776_v28 }
 0xe4c   :  { %v1907_v44 = vpop.eup %1906 }
 0xe4d   :  { %v1909_v9 = vpop.eup %1908  ;;  %v1676_v45 = vadd.f32 1.0, %v1907_v44 }
 0xe4e   :  { %v1911_v48 = vpop.eup %1910  ;;  %v1677_v21 = vadd.f32 1.0, %v1909_v9 }
 0xe4f   :  { %v1913_v7 = vpop.eup %1912  ;;  %1914 = vrcp.f32 %v1676_v45  ;;  %v1678_v47 = vadd.f32 1.0, %v1911_v48 }
 0xe50   :  { %1916 = vrcp.f32 %v1677_v21  ;;  %v1679_v41 = vadd.f32 1.0, %v1913_v7 }
 0xe51   :  { %1918 = vrcp.f32 %v1678_v47 }
 0xe52   :  { %1920 = vrcp.f32 %v1679_v41 }
 0xe59   :  { %v1915_v42 = vpop.eup %1914 }
 0xe5a   :  { %v1917_v61 = vpop.eup %1916  ;;  %v1688_v52 = vmul.f32 %v1915_v42, %v1656_v11 }
 0xe5b   :  { %v1919_v23 = vpop.eup %1918  ;;  %v1689_v25 = vmul.f32 %v1917_v61, %v1658_v6 }
 0xe5c   :  { %v1921_v63 = vpop.eup %1920  ;;  %1693 = vst [vmem:[#allocation2 + $0x20] sm:$0xff] %v1688_v52  ;;  %v1690_v1 = vmul.f32 %v1919_v23, %v1660_v33 }
 0xe5d   :  { %1694 = vst [vmem:[#allocation2 + $0x28] sm:$0xff] %v1689_v25  ;;  %v1691_v2 = vmul.f32 %v1921_v63, %v1662_v59 }
 0xe5e   :  { %1695 = vst [vmem:[#allocation2 + $0x30] sm:$0xff] %v1690_v1 }
 0xe5f   :  { %1696 = vst [vmem:[#allocation2 + $0x38] sm:$0xff] %v1691_v2 }
 0xe60   :  { %1935 = shalt.err (!%p1932_p4)
}
 0xe61   :  { %s1936_s1 = scalar_lea.hbm %s2997_s14, 1024 }
 0xe62   :  { %p1937_p5 = scmp.ne.s32.totalorder %s2997_s14, %s1936_s1  ;;  %p1940_p6 = scmp.lt.u32.totalorder %s1936_s1, %s2997_s14 }
 0xe64   :  { %p1942_p7 = pnand %p1940_p6, %p1937_p5 }
 0xe66   :  { %1945 = shalt.err (!%p1942_p7)
}
 0xe67   :  { %s1958_s27 = smov 256  }
 0xe68   :  { %1708 = dma.vmem_to_hbm [thread:$0]  %s1703_s24, 1024, %s2997_s14, [#allocation3], %s1958_s27, %s1958_s27, %s1949_s2  }
 0xe69   :  { %1946 = dma.done.wait [#allocation3], 1024  }
 0xe6a   :  { %1947 = vsyncadd [#allocation3], 4294966272 }
 0xe6b   :  { %1712 = vsyncpa [#allocation3], 1 }

// kernel: tpu_custom_call.1
= control target key start
LH: loop header
LB: loop body
LE: loop exit
PB: predicated region body
PF: predicated region fallthrough
CT: control target
= control target key end

     0   :  { %vm97_vm0 = vcmask 1041408   ;;  %v1948_v3 = vmov 0   ;;  %s2983_s0 = inlined_call_operand.vmem [shape: f32[2,4,256], index: 0, kind: input, shape index: {}]   ;;  %s2984_s1 = inlined_call_operand.vmem [shape: f32[8,1,256], index: 1, kind: input, shape index: {}]   ;;  %s2985_s2 = inlined_call_operand.vmem [shape: bf16[16,4], index: 2, kind: input, shape index: {}]   ;;  %s2986_s3 = inlined_call_operand.vmem [shape: f32[16,1], index: 3, kind: input, shape index: {}]   ;;  %s2987_s4 = inlined_call_operand.vmem [shape: bf16[8,72], index: 4, kind: input, shape index: {}]   ;;  %s2988_s5 = inlined_call_operand.vmem [shape: f32[8,1], index: 5, kind: input, shape index: {}]   ;;  %s2989_s6 = inlined_call_operand.vmem [shape: bf16[8,72], index: 6, kind: input, shape index: {}]   ;;  %s2990_s7 = inlined_call_operand.vmem [shape: f32[8,1], index: 7, kind: input, shape index: {}]   ;;  %s2991_s8 = inlined_call_operand.vmem [shape: bf16[8,72], index: 8, kind: input, shape index: {}]   ;;  %s2992_s9 = inlined_call_operand.vmem [shape: f32[8,1], index: 9, kind: input, shape index: {}]   ;;  %s2993_s10 = inlined_call_operand.vmem [shape: bf16[8,72], index: 10, kind: input, shape index: {}]   ;;  %s2994_s11 = inlined_call_operand.vmem [shape: f32[8,1], index: 11, kind: input, shape index: {}]   ;;  %s2995_s12 = inlined_call_operand.vmem [shape: bf16[16,32], index: 12, kind: input, shape index: {}]   ;;  %s2996_s13 = inlined_call_operand.vmem [shape: f32[16,1], index: 13, kind: input, shape index: {}]   ;;  %s2997_s14 = inlined_call_operand.hbm [shape: f32[2,16,256], index: 14, kind: output, shape index: {}]  }
   0x1   :  { %v72_v0 = vld [vmem:[%s2983_s0] sm:$0xff]  ;;  %136 = vmatprep.mubr.bf16.mxu0 %v1948_v3  ;;  %1788 = vset.pattern.permute.xlu0 %v1948_v3  ;;  %v67_v4 = vld [vmem:[%s2986_s3 + $0x8] sm:$0xff] }
   0x2   :  { %v74_v1 = vcombine.high %v72_v0, %v72_v0  ;;  %v76_v2 = vpack.c.bf16 %v72_v0, %v72_v0  ;;  %85 = vperm.xlu0 %1788, %v67_v4   ;;  %397 = vmatprep.mubr.bf16.mxu1 %v1948_v3 }
   0x3   :  { %19 = vsyncpa [#allocation3], 0  ;;  %1789 = vset.pattern.permute.xlu1 %v1948_v3  ;;  %v2049_v7 = vld [vmem:[%s2985_s2] sm:$0xff]   ;;  %vm93_vm1 = vcmask 31744   ;;  %s1949_s2 = smov 16   ;;  %s1950_s19 = smov 17   ;;  %v179_v26 = vlaneseq }
   0x4   :  { %v77_v5 = vpack.c.bf16 %v74_v1, %v74_v1  ;;  %v99_v6 = vsel %vm97_vm0, %v76_v2, 0  ;;  %s1951_s20 = smov 15   ;;  %s1952_s21 = smov 1   ;;  %v348_v25 = vld [vmem:[%s2988_s5] sm:$0xff]  ;;  %v1716_v44 = vld [vmem:[%s2984_s1 + $0x8] sm:$0x3] }
   0x5   :  { %s1953_s22 = smov 127   ;;  %s1954_s23 = smov 113   ;;  %v186_v29 = vshrl.u32 %v179_v26, 7  ;;  %v2101_v30 = vand.u32 127, %v179_v26  ;;  %v1713_v35 = vld [vmem:[%s2984_s1 + $0x2] sm:$0x3] }
   0x6   :  { %1721 = vmatprep.subr.msk.bf16.mxu0 %vm97_vm0, %v77_v5  ;;  %s1955_s24 = smov 112   ;;  %s1956_s25 = smov 111   ;;  %v1715_v36 = vld [vmem:[%s2984_s1 + $0x6] sm:$0x3]  ;;  %v49_v37 = vld [vmem:[%s2984_s1] sm:$0x3] }
   0x7   :  { %105 = vmatpush1.bf16.msra.mxu0 %v99_v6  ;;  %v2103_v33 = vsub.s32 0, %v186_v29  ;;  %v2105_v34 = vsub.s32 1, %v186_v29  ;;  %vm201_vm2 = vcmp.lt.s32.totalorder %v2101_v30, 16  ;;  %v1714_v40 = vld [vmem:[%s2984_s1 + $0x4] sm:$0x3]  ;;  %vm221_vm3 = vcmp.lt.s32.totalorder %v2101_v30, 15 }
   0x8   :  { %vm181_vm4 = vcmp.lt.s32.totalorder %v2101_v30, 17  ;;  %vm241_vm5 = vcmp.lt.s32.totalorder %v2101_v30, 1  ;;  %vm261_vm6 = vcmp.lt.s32.totalorder %v2101_v30, 127  ;;  %vm281_vm7 = vcmp.lt.s32.totalorder %v2101_v30, 113  ;;  %v1719_v29 = vld [vmem:[%s2984_s1 + $0xe] sm:$0x3] }
   0x9   :  { %v2121_v41 = vrot.slane %v1713_v35, %v2105_v34  ;;  %v2124_v42 = vrot.slane %v1713_v35, %v2103_v33  ;;  %v2137_v46 = vrot.slane %v1715_v36, %v2105_v34  ;;  %v2140_v47 = vrot.slane %v49_v37, %v2105_v34 }
   0xa   :  { %1722 = vmatmul.mubr.msk.bf16.vlgmr.msra.gmra.mrb[0].mxu0 %vm93_vm1, %v2049_v7  ;;  %v2143_v48 = vrot.slane %v49_v37, %v2103_v33  ;;  %v2146_v49 = vrot.slane %v1714_v40, %v2105_v34  ;;  %v2149_v50 = vrot.slane %v1715_v36, %v2103_v33  ;;  %v2153_v53 = vrot.slane %v1716_v44, %v2105_v34 }
   0xb   :  { %542 = vmatprep.mubr.bf16.mxu0 %v1948_v3  ;;  %v2171_v0 = vrot.slane %v1714_v40, %v2103_v33  ;;  %vm301_vm8 = vcmp.lt.s32.totalorder %v2101_v30, 112  ;;  %vm321_vm9 = vcmp.lt.s32.totalorder %v2101_v30, 111  ;;  %v2217_v40 = vrot.slane %v1719_v29, %v2105_v34 }
   0xc   :  { %vm358_vm10 = vcmask 1043456   ;;  %vm354_vm11 = vcmask 588800   ;;  %vm874_vm12 = vcmask 261120  }
  0x81   :  { %v2056_v9 = vpop.permute.xlu0 %85 }
  0xdd   :  { %v2054_v8 = vpop.f32.mrb[0].mxu0 }
  0xde   :  { %v2058_v10 = vpop.f32.mrb[1].mxu0 }
  0xdf   :  { %v142_v11 = vpop.f32.mrb[2].mxu0 }
  0xe0   :  { %v143_v12 = vadd.f32 %v142_v11, %v2056_v9  ;;  %v144_v13 = vpop.f32.mrb[3].mxu0 }
  0xe1   :  { %v145_v14 = vadd.f32 %v144_v13, %v2056_v9 }
  0xe2   :  { %v1725_v15 = vmul.f32 -1.442695, %v143_v12 }
  0xe3   :  { %v1726_v16 = vmul.f32 -1.442695, %v145_v14 }
  0xe4   :  { %1794 = vpow2.f32 %v1725_v15 }
  0xe5   :  { %1796 = vpow2.f32 %v1726_v16 }
  0xee   :  { %v1795_v17 = vpop.eup %1794 }
  0xef   :  { %v1797_v18 = vpop.eup %1796  ;;  %v161_v19 = vadd.f32 1.0, %v1795_v17  ;;  %v1717_v17 = vld [vmem:[%s2984_s1 + $0xa] sm:$0x3] }
  0xf0   :  { %v162_v20 = vadd.f32 1.0, %v1797_v18  ;;  %v2195_v26 = vrot.slane %v1717_v17, %v2103_v33 }
  0xf1   :  { %1798 = vrcp.f32 %v161_v19 }
  0xf2   :  { %1800 = vrcp.f32 %v162_v20  ;;  %v1718_v20 = vld [vmem:[%s2984_s1 + $0xc] sm:$0x3] }
  0xfb   :  { %v1799_v21 = vpop.eup %1798 }
  0xfc   :  { %v2062_v22 = vmul.f32 %v1799_v21, %v143_v12  ;;  %v1801_v23 = vpop.eup %1800 }
  0xfd   :  { %v2068_v24 = vmul.f32 %v1801_v23, %v145_v14  ;;  %v2180_v14 = vrot.slane %v1716_v44, %v2103_v33 }
  0xfe   :  { %197 = vrot.lane.b32.xlu1 %v2062_v22, %s1949_s2  ;;  %175 = vrot.lane.b32.xlu0 %v2062_v22, %s1950_s19 }
 0x102   :  { %217 = vrot.lane.b32.xlu1 %v2062_v22, %s1951_s20  ;;  %199 = vrot.lane.b32.xlu0 %v2068_v24, %s1949_s2 }
 0x106   :  { %237 = vrot.lane.b32.xlu1 %v2062_v22, %s1952_s21  ;;  %219 = vrot.lane.b32.xlu0 %v2068_v24, %s1951_s20 }
 0x10a   :  { %177 = vrot.lane.b32.xlu1 %v2068_v24, %s1950_s19  ;;  %239 = vrot.lane.b32.xlu0 %v2068_v24, %s1952_s21 }
 0x10e   :  { %257 = vrot.lane.b32.xlu1 %v2062_v22, %s1953_s22  ;;  %259 = vrot.lane.b32.xlu0 %v2068_v24, %s1953_s22 }
 0x112   :  { %277 = vrot.lane.b32.xlu1 %v2062_v22, %s1954_s23  ;;  %279 = vrot.lane.b32.xlu0 %v2068_v24, %s1954_s23 }
 0x116   :  { %297 = vrot.lane.b32.xlu1 %v2062_v22, %s1955_s24  ;;  %299 = vrot.lane.b32.xlu0 %v2068_v24, %s1955_s24 }
 0x11a   :  { %317 = vrot.lane.b32.xlu1 %v2062_v22, %s1956_s25  ;;  %319 = vrot.lane.b32.xlu0 %v2068_v24, %s1956_s25 }
 0x11e   :  { %351 = vperm.xlu1 %1789, %v348_v25  }
 0x170   :  { %v198_v27 = vpop.permute.xlu1 %197  ;;  %v176_v28 = vpop.permute.xlu0 %175 }
 0x174   :  { %v218_v31 = vpop.permute.xlu1 %217  ;;  %v200_v32 = vpop.permute.xlu0 %199 }
 0x175   :  { %v203_v43 = vsel %vm201_vm2, %v200_v32, %v198_v27  ;;  %v202_v45 = vsel %vm201_vm2, %v198_v27, %v200_v32  ;;  %v2198_v27 = vrot.slane %v1717_v17, %v2105_v34  ;;  %v2208_v32 = vrot.slane %v1718_v20, %v2105_v34 }
 0x176   :  { %v216_v54 = vmul.f32 %v2121_v41, %v202_v45  ;;  %v215_v55 = vmul.f32 %v2124_v42, %v203_v43 }
 0x178   :  { %v238_v38 = vpop.permute.xlu1 %237  ;;  %v220_v39 = vpop.permute.xlu0 %219 }
 0x179   :  { %v222_v56 = vsel %vm221_vm3, %v218_v31, %v220_v39  ;;  %v223_v1 = vsel %vm221_vm3, %v220_v39, %v218_v31  ;;  %v2205_v31 = vrot.slane %v1718_v20, %v2103_v33 }
 0x17a   :  { %v236_v2 = vmul.f32 %v2146_v49, %v222_v56  ;;  %v235_v19 = vmul.f32 %v2171_v0, %v223_v1 }
 0x17c   :  { %v178_v51 = vpop.permute.xlu1 %177  ;;  %v240_v52 = vpop.permute.xlu0 %239 }
 0x17d   :  { %v183_v57 = vsel %vm181_vm4, %v178_v51, %v176_v28  ;;  %v242_v58 = vsel %vm241_vm5, %v238_v38, %v240_v52  ;;  %v182_v59 = vsel %vm181_vm4, %v176_v28, %v178_v51  ;;  %v243_v60 = vsel %vm241_vm5, %v240_v52, %v238_v38 }
 0x17e   :  { %v256_v61 = vmul.f32 %v2137_v46, %v242_v58  ;;  %v196_v62 = vmul.f32 %v2140_v47, %v182_v59  ;;  %v195_v63 = vmul.f32 %v2143_v48, %v183_v57  ;;  %v255_v12 = vmul.f32 %v2149_v50, %v243_v60 }
 0x17f   :  { %v2225_v51 = vrot.slane %v1719_v29, %v2103_v33 }
 0x180   :  { %v258_v4 = vpop.permute.xlu1 %257  ;;  %v260_v5 = vpop.permute.xlu0 %259  ;;  %v338_v6 = vpack.c.bf16 %v216_v54, %v196_v62  ;;  %v337_v11 = vpack.c.bf16 %v215_v55, %v195_v63  ;;  %v340_v18 = vpack.c.bf16 %v256_v61, %v236_v2  ;;  %v339_v28 = vpack.c.bf16 %v255_v12, %v235_v19 }
 0x181   :  { %v263_v13 = vsel %vm261_vm6, %v260_v5, %v258_v4  ;;  %v262_v15 = vsel %vm261_vm6, %v258_v4, %v260_v5  ;;  %v347_v4 = vld [vmem:[%s2987_s4] sm:$0xf] }
 0x182   :  { %v276_v16 = vmul.f32 %v2153_v53, %v263_v13  ;;  %365 = vmatprep.subr.bf16.mxu1 %v338_v6  ;;  %v275_v25 = vmul.f32 %v2180_v14, %v262_v15 }
 0x183   :  { %366 = vmatpush1.bf16.msra.mxu1 %v337_v11 }
 0x184   :  { %v278_v21 = vpop.permute.xlu1 %277  ;;  %v280_v23 = vpop.permute.xlu0 %279  ;;  %367 = vmatprep.subr.bf16.mxu1 %v340_v18  ;;  %v342_v35 = vpack.c.bf16 %v276_v16, %v2068_v24  ;;  %v341_v45 = vpack.c.bf16 %v275_v25, %v2062_v22 }
 0x185   :  { %v282_v36 = vsel %vm281_vm7, %v278_v21, %v280_v23  ;;  %v283_v37 = vsel %vm281_vm7, %v280_v23, %v278_v21 }
 0x186   :  { %v295_v52 = vmul.f32 %v2195_v26, %v282_v36  ;;  %v296_v54 = vmul.f32 %v2198_v27, %v283_v37  ;;  %v2273_v36 = vld [vmem:[%s2990_s7] sm:$0xff] }
 0x187   :  { %368 = vmatpush1.bf16.msra.mxu1 %v339_v28 }
 0x188   :  { %v298_v38 = vpop.permute.xlu1 %297  ;;  %v300_v39 = vpop.permute.xlu0 %299  ;;  %369 = vmatprep.subr.bf16.mxu1 %v342_v35 }
 0x189   :  { %v302_v43 = vsel %vm301_vm8, %v298_v38, %v300_v39  ;;  %v303_v44 = vsel %vm301_vm8, %v300_v39, %v298_v38 }
 0x18a   :  { %v315_v55 = vmul.f32 %v2205_v31, %v302_v43  ;;  %v316_v34 = vmul.f32 %v2208_v32, %v303_v44 }
 0x18b   :  { %370 = vmatpush1.bf16.msra.mxu1 %v341_v45 }
 0x18c   :  { %v318_v56 = vpop.permute.xlu1 %317  ;;  %v320_v57 = vpop.permute.xlu0 %319  ;;  %v344_v58 = vpack.c.bf16 %v316_v34, %v296_v54  ;;  %v343_v59 = vpack.c.bf16 %v315_v55, %v295_v52 }
 0x18d   :  { %v322_v60 = vsel %vm321_vm9, %v318_v56, %v320_v57  ;;  %v323_v33 = vsel %vm321_vm9, %v320_v57, %v318_v56 }
 0x18e   :  { %v336_v61 = vmul.f32 %v2217_v40, %v323_v33  ;;  %371 = vmatprep.subr.bf16.mxu1 %v344_v58  ;;  %v335_v62 = vmul.f32 %v2225_v51, %v322_v60 }
 0x18f   :  { %372 = vmatpush1.bf16.msra.mxu1 %v343_v59 }
 0x190   :  { %v346_v63 = vpack.c.bf16 %v336_v61, %v336_v61  ;;  %v345_v1 = vpack.c.bf16 %v335_v62, %v335_v62 }
 0x192   :  { %1727 = vmatprep.subr.msk.bf16.mxu1 %vm358_vm10, %v346_v63  ;;  %v360_v2 = vsel %vm358_vm10, %v345_v1, 0 }
 0x193   :  { %374 = vmatpush1.bf16.msra.mxu1 %v360_v2 }
 0x196   :  { %1728 = vmatmul.mubr.msk.bf16.vlgmr.msra.gmra.mrb[0].mxu1 %vm354_vm11, %v347_v4 }
 0x197   :  { %687 = vmatprep.mubr.bf16.mxu1 %v1948_v3 }
 0x19d   :  { %v352_v5 = vpop.permute.xlu1 %351 }
 0x269   :  { %v399_v6 = vpop.f32.mrb[0].mxu1 }
 0x26a   :  { %v400_v11 = vadd.f32 %v399_v6, %v352_v5  ;;  %v401_v12 = vpop.f32.mrb[1].mxu1 }
 0x26b   :  { %v402_v13 = vadd.f32 %v401_v12, %v352_v5  ;;  %v403_v15 = vpop.f32.mrb[2].mxu1 }
 0x26c   :  { %v1729_v16 = vmul.f32 -1.442695, %v400_v11  ;;  %v404_v17 = vpop.f32.mrb[3].mxu1 }
 0x26d   :  { %v1730_v18 = vmul.f32 -1.442695, %v402_v13 }
 0x26e   :  { %1802 = vpow2.f32 %v1729_v16 }
 0x26f   :  { %1804 = vpow2.f32 %v1730_v18 }
 0x278   :  { %v1803_v19 = vpop.eup %1802 }
 0x279   :  { %v1805_v20 = vpop.eup %1804  ;;  %v412_v21 = vadd.f32 1.0, %v1803_v19 }
 0x27a   :  { %v413_v23 = vadd.f32 1.0, %v1805_v20 }
 0x27b   :  { %1806 = vrcp.f32 %v412_v21 }
 0x27c   :  { %1808 = vrcp.f32 %v413_v23 }
 0x285   :  { %v1807_v25 = vpop.eup %1806 }
 0x286   :  { %v1809_v28 = vpop.eup %1808  ;;  %v2244_v29 = vmul.f32 %v1807_v25, %v400_v11 }
 0x287   :  { %v419_v35 = vmul.f32 %v1809_v28, %v402_v13 }
 0x288   :  { %420 = vrot.lane.b32.xlu0 %v2244_v29, %s1950_s19 }
 0x289   :  { %422 = vrot.lane.b32.xlu1 %v419_v35, %s1950_s19 }
 0x28c   :  { %428 = vrot.lane.b32.xlu0 %v2244_v29, %s1949_s2 }
 0x28d   :  { %430 = vrot.lane.b32.xlu1 %v419_v35, %s1949_s2 }
 0x290   :  { %436 = vrot.lane.b32.xlu0 %v2244_v29, %s1951_s20 }
 0x291   :  { %438 = vrot.lane.b32.xlu1 %v419_v35, %s1951_s20 }
 0x294   :  { %444 = vrot.lane.b32.xlu0 %v2244_v29, %s1952_s21 }
 0x295   :  { %446 = vrot.lane.b32.xlu1 %v419_v35, %s1952_s21 }
 0x298   :  { %452 = vrot.lane.b32.xlu0 %v2244_v29, %s1953_s22 }
 0x299   :  { %454 = vrot.lane.b32.xlu1 %v419_v35, %s1953_s22 }
 0x29c   :  { %460 = vrot.lane.b32.xlu0 %v2244_v29, %s1954_s23 }
 0x29d   :  { %462 = vrot.lane.b32.xlu1 %v419_v35, %s1954_s23 }
 0x2a0   :  { %468 = vrot.lane.b32.xlu0 %v2244_v29, %s1955_s24 }
 0x2a1   :  { %470 = vrot.lane.b32.xlu1 %v419_v35, %s1955_s24 }
 0x2a4   :  { %476 = vrot.lane.b32.xlu0 %v2244_v29, %s1956_s25 }
 0x2a5   :  { %478 = vrot.lane.b32.xlu1 %v419_v35, %s1956_s25 }
 0x2a8   :  { %498 = vperm.xlu0 %1788, %v2273_v36  }
 0x2fa   :  { %v421_v37 = vpop.permute.xlu0 %420 }
 0x2fb   :  { %v423_v38 = vpop.permute.xlu1 %422 }
 0x2fc   :  { %v424_v39 = vsel %vm181_vm4, %v421_v37, %v423_v38  ;;  %v425_v43 = vsel %vm181_vm4, %v423_v38, %v421_v37 }
 0x2fd   :  { %v426_v55 = vmul.f32 %v425_v43, %v2143_v48  ;;  %v427_v34 = vmul.f32 %v424_v39, %v2140_v47 }
 0x2fe   :  { %v429_v44 = vpop.permute.xlu0 %428 }
 0x2ff   :  { %v431_v45 = vpop.permute.xlu1 %430 }
 0x300   :  { %v432_v52 = vsel %vm201_vm2, %v429_v44, %v431_v45  ;;  %v433_v54 = vsel %vm201_vm2, %v431_v45, %v429_v44 }
 0x301   :  { %v434_v56 = vmul.f32 %v433_v54, %v2124_v42  ;;  %v435_v57 = vmul.f32 %v432_v52, %v2121_v41 }
 0x302   :  { %v437_v58 = vpop.permute.xlu0 %436 }
 0x303   :  { %v484_v59 = vpack.c.bf16 %v434_v56, %v426_v55  ;;  %v439_v60 = vpop.permute.xlu1 %438  ;;  %v485_v33 = vpack.c.bf16 %v435_v57, %v427_v34 }
 0x304   :  { %v440_v61 = vsel %vm221_vm3, %v437_v58, %v439_v60  ;;  %v441_v62 = vsel %vm221_vm3, %v439_v60, %v437_v58 }
 0x305   :  { %510 = vmatprep.subr.bf16.mxu0 %v485_v33  ;;  %v442_v5 = vmul.f32 %v441_v62, %v2171_v0  ;;  %v443_v6 = vmul.f32 %v440_v61, %v2146_v49 }
 0x306   :  { %511 = vmatpush1.bf16.msra.mxu0 %v484_v59  ;;  %v445_v63 = vpop.permute.xlu0 %444 }
 0x307   :  { %v447_v1 = vpop.permute.xlu1 %446 }
 0x308   :  { %v448_v2 = vsel %vm241_vm5, %v445_v63, %v447_v1  ;;  %v449_v4 = vsel %vm241_vm5, %v447_v1, %v445_v63 }
 0x309   :  { %v450_v11 = vmul.f32 %v449_v4, %v2149_v50  ;;  %v451_v12 = vmul.f32 %v448_v2, %v2137_v46  ;;  %v494_v2 = vld [vmem:[%s2989_s6] sm:$0xf] }
 0x30a   :  { %v453_v13 = vpop.permute.xlu0 %452 }
 0x30b   :  { %v486_v15 = vpack.c.bf16 %v450_v11, %v442_v5  ;;  %v455_v16 = vpop.permute.xlu1 %454  ;;  %v487_v17 = vpack.c.bf16 %v451_v12, %v443_v6 }
 0x30c   :  { %v456_v18 = vsel %vm261_vm6, %v453_v13, %v455_v16  ;;  %v457_v19 = vsel %vm261_vm6, %v455_v16, %v453_v13 }
 0x30d   :  { %v458_v20 = vmul.f32 %v456_v18, %v2180_v14  ;;  %v459_v21 = vmul.f32 %v457_v19, %v2153_v53  ;;  %512 = vmatprep.subr.bf16.mxu0 %v487_v17 }
 0x30e   :  { %513 = vmatpush1.bf16.msra.mxu0 %v486_v15  ;;  %v461_v23 = vpop.permute.xlu0 %460 }
 0x30f   :  { %v488_v25 = vpack.c.bf16 %v458_v20, %v2244_v29  ;;  %v463_v28 = vpop.permute.xlu1 %462  ;;  %v489_v37 = vpack.c.bf16 %v459_v21, %v419_v35 }
 0x310   :  { %v464_v38 = vsel %vm281_vm7, %v461_v23, %v463_v28  ;;  %v465_v39 = vsel %vm281_vm7, %v463_v28, %v461_v23 }
 0x311   :  { %514 = vmatprep.subr.bf16.mxu0 %v489_v37  ;;  %v466_v29 = vmul.f32 %v464_v38, %v2195_v26  ;;  %v467_v35 = vmul.f32 %v465_v39, %v2198_v27  ;;  %v2371_v38 = vld [vmem:[%s2992_s9] sm:$0xff] }
 0x312   :  { %515 = vmatpush1.bf16.msra.mxu0 %v488_v25  ;;  %v469_v43 = vpop.permute.xlu0 %468 }
 0x313   :  { %v471_v44 = vpop.permute.xlu1 %470 }
 0x314   :  { %v472_v45 = vsel %vm301_vm8, %v469_v43, %v471_v44  ;;  %v473_v52 = vsel %vm301_vm8, %v471_v44, %v469_v43 }
 0x315   :  { %v474_v54 = vmul.f32 %v472_v45, %v2205_v31  ;;  %v475_v55 = vmul.f32 %v473_v52, %v2208_v32 }
 0x316   :  { %v477_v34 = vpop.permute.xlu0 %476 }
 0x317   :  { %v490_v56 = vpack.c.bf16 %v474_v54, %v466_v29  ;;  %v479_v57 = vpop.permute.xlu1 %478  ;;  %v491_v58 = vpack.c.bf16 %v475_v55, %v467_v35 }
 0x318   :  { %v480_v59 = vsel %vm321_vm9, %v477_v34, %v479_v57  ;;  %v481_v60 = vsel %vm321_vm9, %v479_v57, %v477_v34 }
 0x319   :  { %v482_v33 = vmul.f32 %v480_v59, %v2225_v51  ;;  %v483_v61 = vmul.f32 %v481_v60, %v2217_v40  ;;  %516 = vmatprep.subr.bf16.mxu0 %v491_v58 }
 0x31a   :  { %517 = vmatpush1.bf16.msra.mxu0 %v490_v56 }
 0x31b   :  { %v492_v62 = vpack.c.bf16 %v482_v33, %v482_v33  ;;  %v493_v63 = vpack.c.bf16 %v483_v61, %v483_v61 }
 0x31d   :  { %1731 = vmatprep.subr.msk.bf16.mxu0 %vm358_vm10, %v493_v63  ;;  %v505_v1 = vsel %vm358_vm10, %v492_v62, 0 }
 0x31e   :  { %519 = vmatpush1.bf16.msra.mxu0 %v505_v1 }
 0x321   :  { %1732 = vmatmul.mubr.msk.bf16.vlgmr.msra.gmra.mrb[4].mxu0 %vm354_vm11, %v494_v2 }
 0x322   :  { %832 = vmatprep.mubr.bf16.mxu0 %v1948_v3 }
 0x327   :  { %v499_v4 = vpop.permute.xlu0 %498 }
 0x3f4   :  { %v544_v5 = vpop.f32.mrb[4].mxu0 }
 0x3f5   :  { %v545_v6 = vadd.f32 %v544_v5, %v499_v4  ;;  %v546_v11 = vpop.f32.mrb[5].mxu0 }
 0x3f6   :  { %v547_v12 = vadd.f32 %v546_v11, %v499_v4  ;;  %v548_v13 = vpop.f32.mrb[6].mxu0 }
 0x3f7   :  { %v1733_v15 = vmul.f32 -1.442695, %v545_v6  ;;  %v549_v16 = vpop.f32.mrb[7].mxu0 }
 0x3f8   :  { %v1734_v17 = vmul.f32 -1.442695, %v547_v12 }
 0x3f9   :  { %1810 = vpow2.f32 %v1733_v15 }
 0x3fa   :  { %1812 = vpow2.f32 %v1734_v17 }
 0x403   :  { %v1811_v18 = vpop.eup %1810 }
 0x404   :  { %v1813_v19 = vpop.eup %1812  ;;  %v557_v20 = vadd.f32 1.0, %v1811_v18 }
 0x405   :  { %v558_v21 = vadd.f32 1.0, %v1813_v19 }
 0x406   :  { %1814 = vrcp.f32 %v557_v20 }
 0x407   :  { %1816 = vrcp.f32 %v558_v21 }
 0x410   :  { %v1815_v23 = vpop.eup %1814 }
 0x411   :  { %v1817_v25 = vpop.eup %1816  ;;  %v2332_v28 = vmul.f32 %v1815_v23, %v545_v6 }
 0x412   :  { %v2334_v37 = vmul.f32 %v1817_v25, %v547_v12 }
 0x413   :  { %565 = vrot.lane.b32.xlu1 %v2332_v28, %s1950_s19 }
 0x414   :  { %567 = vrot.lane.b32.xlu0 %v2334_v37, %s1950_s19 }
 0x417   :  { %573 = vrot.lane.b32.xlu1 %v2332_v28, %s1949_s2 }
 0x418   :  { %575 = vrot.lane.b32.xlu0 %v2334_v37, %s1949_s2 }
 0x41b   :  { %581 = vrot.lane.b32.xlu1 %v2332_v28, %s1951_s20 }
 0x41c   :  { %583 = vrot.lane.b32.xlu0 %v2334_v37, %s1951_s20 }
 0x41f   :  { %589 = vrot.lane.b32.xlu1 %v2332_v28, %s1952_s21 }
 0x420   :  { %591 = vrot.lane.b32.xlu0 %v2334_v37, %s1952_s21 }
 0x423   :  { %597 = vrot.lane.b32.xlu1 %v2332_v28, %s1953_s22 }
 0x424   :  { %599 = vrot.lane.b32.xlu0 %v2334_v37, %s1953_s22 }
 0x427   :  { %605 = vrot.lane.b32.xlu1 %v2332_v28, %s1954_s23 }
 0x428   :  { %607 = vrot.lane.b32.xlu0 %v2334_v37, %s1954_s23 }
 0x42b   :  { %613 = vrot.lane.b32.xlu1 %v2332_v28, %s1955_s24 }
 0x42c   :  { %615 = vrot.lane.b32.xlu0 %v2334_v37, %s1955_s24 }
 0x42f   :  { %621 = vrot.lane.b32.xlu1 %v2332_v28, %s1956_s25 }
 0x430   :  { %623 = vrot.lane.b32.xlu0 %v2334_v37, %s1956_s25 }
 0x433   :  { %643 = vperm.xlu1 %1789, %v2371_v38  }
 0x485   :  { %v566_v39 = vpop.permute.xlu1 %565 }
 0x486   :  { %v568_v43 = vpop.permute.xlu0 %567 }
 0x487   :  { %v569_v44 = vsel %vm181_vm4, %v566_v39, %v568_v43  ;;  %v570_v45 = vsel %vm181_vm4, %v568_v43, %v566_v39 }
 0x488   :  { %v571_v55 = vmul.f32 %v570_v45, %v2143_v48  ;;  %v572_v34 = vmul.f32 %v569_v44, %v2140_v47 }
 0x489   :  { %v574_v52 = vpop.permute.xlu1 %573 }
 0x48a   :  { %v576_v29 = vpop.permute.xlu0 %575 }
 0x48b   :  { %v577_v35 = vsel %vm201_vm2, %v574_v52, %v576_v29  ;;  %v578_v54 = vsel %vm201_vm2, %v576_v29, %v574_v52 }
 0x48c   :  { %v579_v56 = vmul.f32 %v578_v54, %v2124_v42  ;;  %v580_v57 = vmul.f32 %v577_v35, %v2121_v41 }
 0x48d   :  { %v582_v58 = vpop.permute.xlu1 %581 }
 0x48e   :  { %v629_v59 = vpack.c.bf16 %v579_v56, %v571_v55  ;;  %v584_v60 = vpop.permute.xlu0 %583  ;;  %v630_v33 = vpack.c.bf16 %v580_v57, %v572_v34 }
 0x48f   :  { %v585_v61 = vsel %vm221_vm3, %v582_v58, %v584_v60  ;;  %v586_v62 = vsel %vm221_vm3, %v584_v60, %v582_v58 }
 0x490   :  { %655 = vmatprep.subr.bf16.mxu1 %v630_v33  ;;  %v587_v5 = vmul.f32 %v586_v62, %v2171_v0  ;;  %v588_v6 = vmul.f32 %v585_v61, %v2146_v49 }
 0x491   :  { %656 = vmatpush1.bf16.msra.mxu1 %v629_v59  ;;  %v590_v63 = vpop.permute.xlu1 %589 }
 0x492   :  { %v592_v1 = vpop.permute.xlu0 %591 }
 0x493   :  { %v593_v2 = vsel %vm241_vm5, %v590_v63, %v592_v1  ;;  %v594_v4 = vsel %vm241_vm5, %v592_v1, %v590_v63 }
 0x494   :  { %v595_v11 = vmul.f32 %v594_v4, %v2149_v50  ;;  %v596_v12 = vmul.f32 %v593_v2, %v2137_v46 }
 0x495   :  { %v598_v13 = vpop.permute.xlu1 %597 }
 0x496   :  { %v631_v15 = vpack.c.bf16 %v595_v11, %v587_v5  ;;  %v600_v16 = vpop.permute.xlu0 %599  ;;  %v632_v17 = vpack.c.bf16 %v596_v12, %v588_v6  ;;  %v639_v6 = vld [vmem:[%s2991_s8] sm:$0xf] }
 0x497   :  { %v601_v18 = vsel %vm261_vm6, %v598_v13, %v600_v16  ;;  %v602_v19 = vsel %vm261_vm6, %v600_v16, %v598_v13 }
 0x498   :  { %v603_v20 = vmul.f32 %v601_v18, %v2180_v14  ;;  %v604_v21 = vmul.f32 %v602_v19, %v2153_v53  ;;  %657 = vmatprep.subr.bf16.mxu1 %v632_v17 }
 0x499   :  { %658 = vmatpush1.bf16.msra.mxu1 %v631_v15  ;;  %v606_v23 = vpop.permute.xlu1 %605 }
 0x49a   :  { %v633_v25 = vpack.c.bf16 %v603_v20, %v2332_v28  ;;  %v608_v39 = vpop.permute.xlu0 %607  ;;  %v634_v43 = vpack.c.bf16 %v604_v21, %v2334_v37 }
 0x49b   :  { %v609_v44 = vsel %vm281_vm7, %v606_v23, %v608_v39  ;;  %v610_v45 = vsel %vm281_vm7, %v608_v39, %v606_v23 }
 0x49c   :  { %659 = vmatprep.subr.bf16.mxu1 %v634_v43  ;;  %v611_v55 = vmul.f32 %v609_v44, %v2195_v26  ;;  %v612_v34 = vmul.f32 %v610_v45, %v2198_v27 }
 0x49d   :  { %660 = vmatpush1.bf16.msra.mxu1 %v633_v25  ;;  %v614_v52 = vpop.permute.xlu1 %613 }
 0x49e   :  { %v616_v29 = vpop.permute.xlu0 %615 }
 0x49f   :  { %v617_v35 = vsel %vm301_vm8, %v614_v52, %v616_v29  ;;  %v618_v54 = vsel %vm301_vm8, %v616_v29, %v614_v52  ;;  %v2470_v29 = vld [vmem:[%s2994_s11] sm:$0xff] }
 0x4a0   :  { %v619_v56 = vmul.f32 %v617_v35, %v2205_v31  ;;  %v620_v57 = vmul.f32 %v618_v54, %v2208_v32  ;;  %v66_v35 = vld [vmem:[%s2986_s3] sm:$0xff] }
 0x4a1   :  { %v622_v58 = vpop.permute.xlu1 %621 }
 0x4a2   :  { %v635_v59 = vpack.c.bf16 %v619_v56, %v611_v55  ;;  %v624_v60 = vpop.permute.xlu0 %623  ;;  %v636_v33 = vpack.c.bf16 %v620_v57, %v612_v34 }
 0x4a3   :  { %v625_v61 = vsel %vm321_vm9, %v622_v58, %v624_v60  ;;  %v626_v62 = vsel %vm321_vm9, %v624_v60, %v622_v58 }
 0x4a4   :  { %v627_v63 = vmul.f32 %v625_v61, %v2225_v51  ;;  %v628_v1 = vmul.f32 %v626_v62, %v2217_v40  ;;  %661 = vmatprep.subr.bf16.mxu1 %v636_v33 }
 0x4a5   :  { %662 = vmatpush1.bf16.msra.mxu1 %v635_v59 }
 0x4a6   :  { %v637_v2 = vpack.c.bf16 %v627_v63, %v627_v63  ;;  %v638_v4 = vpack.c.bf16 %v628_v1, %v628_v1 }
 0x4a8   :  { %1735 = vmatprep.subr.msk.bf16.mxu1 %vm358_vm10, %v638_v4  ;;  %v650_v5 = vsel %vm358_vm10, %v637_v2, 0 }
 0x4a9   :  { %664 = vmatpush1.bf16.msra.mxu1 %v650_v5 }
 0x4ac   :  { %1736 = vmatmul.mubr.msk.bf16.vlgmr.msra.gmra.mrb[4].mxu1 %vm354_vm11, %v639_v6 }
 0x4ad   :  { %910 = vmatprep.mubr.bf16.mxu1 %v1948_v3 }
 0x4b2   :  { %v644_v11 = vpop.permute.xlu1 %643 }
 0x57f   :  { %v689_v12 = vpop.f32.mrb[4].mxu1 }
 0x580   :  { %v690_v13 = vadd.f32 %v689_v12, %v644_v11  ;;  %v691_v15 = vpop.f32.mrb[5].mxu1 }
 0x581   :  { %v692_v16 = vadd.f32 %v691_v15, %v644_v11  ;;  %v693_v17 = vpop.f32.mrb[6].mxu1 }
 0x582   :  { %v1737_v18 = vmul.f32 -1.442695, %v690_v13  ;;  %v694_v19 = vpop.f32.mrb[7].mxu1 }
 0x583   :  { %v1738_v20 = vmul.f32 -1.442695, %v692_v16 }
 0x584   :  { %1818 = vpow2.f32 %v1737_v18 }
 0x585   :  { %1820 = vpow2.f32 %v1738_v20 }
 0x58e   :  { %v1819_v21 = vpop.eup %1818 }
 0x58f   :  { %v1821_v23 = vpop.eup %1820  ;;  %v702_v25 = vadd.f32 1.0, %v1819_v21 }
 0x590   :  { %v703_v39 = vadd.f32 1.0, %v1821_v23 }
 0x591   :  { %1822 = vrcp.f32 %v702_v25 }
 0x592   :  { %1824 = vrcp.f32 %v703_v39 }
 0x59b   :  { %v1823_v43 = vpop.eup %1822 }
 0x59c   :  { %v1825_v44 = vpop.eup %1824  ;;  %v2431_v45 = vmul.f32 %v1823_v43, %v690_v13 }
 0x59d   :  { %v2433_v52 = vmul.f32 %v1825_v44, %v692_v16 }
 0x59e   :  { %710 = vrot.lane.b32.xlu0 %v2431_v45, %s1950_s19 }
 0x59f   :  { %712 = vrot.lane.b32.xlu1 %v2433_v52, %s1950_s19 }
 0x5a2   :  { %718 = vrot.lane.b32.xlu0 %v2431_v45, %s1949_s2 }
 0x5a3   :  { %720 = vrot.lane.b32.xlu1 %v2433_v52, %s1949_s2 }
 0x5a6   :  { %726 = vrot.lane.b32.xlu0 %v2431_v45, %s1951_s20 }
 0x5a7   :  { %728 = vrot.lane.b32.xlu1 %v2433_v52, %s1951_s20 }
 0x5aa   :  { %734 = vrot.lane.b32.xlu0 %v2431_v45, %s1952_s21 }
 0x5ab   :  { %736 = vrot.lane.b32.xlu1 %v2433_v52, %s1952_s21 }
 0x5ae   :  { %742 = vrot.lane.b32.xlu0 %v2431_v45, %s1953_s22 }
 0x5af   :  { %744 = vrot.lane.b32.xlu1 %v2433_v52, %s1953_s22 }
 0x5b2   :  { %750 = vrot.lane.b32.xlu0 %v2431_v45, %s1954_s23 }
 0x5b3   :  { %752 = vrot.lane.b32.xlu1 %v2433_v52, %s1954_s23 }
 0x5b6   :  { %758 = vrot.lane.b32.xlu0 %v2431_v45, %s1955_s24 }
 0x5b7   :  { %760 = vrot.lane.b32.xlu1 %v2433_v52, %s1955_s24 }
 0x5ba   :  { %766 = vrot.lane.b32.xlu0 %v2431_v45, %s1956_s25 }
 0x5bb   :  { %768 = vrot.lane.b32.xlu1 %v2433_v52, %s1956_s25 }
 0x5be   :  { %788 = vperm.xlu0 %1788, %v2470_v29  }
 0x5bf   :  { %80 = vperm.xlu1 %1789, %v66_v35  }
 0x610   :  { %v711_v54 = vpop.permute.xlu0 %710 }
 0x611   :  { %v713_v55 = vpop.permute.xlu1 %712 }
 0x612   :  { %v714_v34 = vsel %vm181_vm4, %v711_v54, %v713_v55  ;;  %v715_v56 = vsel %vm181_vm4, %v713_v55, %v711_v54 }
 0x613   :  { %v716_v33 = vmul.f32 %v715_v56, %v2143_v48  ;;  %v717_v61 = vmul.f32 %v714_v34, %v2140_v47 }
 0x614   :  { %v719_v57 = vpop.permute.xlu0 %718 }
 0x615   :  { %v721_v58 = vpop.permute.xlu1 %720 }
 0x616   :  { %v722_v59 = vsel %vm201_vm2, %v719_v57, %v721_v58  ;;  %v723_v60 = vsel %vm201_vm2, %v721_v58, %v719_v57 }
 0x617   :  { %v724_v62 = vmul.f32 %v723_v60, %v2124_v42  ;;  %v725_v63 = vmul.f32 %v722_v59, %v2121_v41 }
 0x618   :  { %v727_v1 = vpop.permute.xlu0 %726 }
 0x619   :  { %v774_v2 = vpack.c.bf16 %v724_v62, %v716_v33  ;;  %v729_v4 = vpop.permute.xlu1 %728  ;;  %v775_v5 = vpack.c.bf16 %v725_v63, %v717_v61 }
 0x61a   :  { %v730_v6 = vsel %vm221_vm3, %v727_v1, %v729_v4  ;;  %v731_v11 = vsel %vm221_vm3, %v729_v4, %v727_v1 }
 0x61b   :  { %800 = vmatprep.subr.bf16.mxu0 %v775_v5  ;;  %v732_v17 = vmul.f32 %v731_v11, %v2171_v0  ;;  %v733_v18 = vmul.f32 %v730_v6, %v2146_v49 }
 0x61c   :  { %801 = vmatpush1.bf16.msra.mxu0 %v774_v2  ;;  %v735_v12 = vpop.permute.xlu0 %734 }
 0x61d   :  { %v737_v13 = vpop.permute.xlu1 %736 }
 0x61e   :  { %v738_v15 = vsel %vm241_vm5, %v735_v12, %v737_v13  ;;  %v739_v16 = vsel %vm241_vm5, %v737_v13, %v735_v12 }
 0x61f   :  { %v740_v19 = vmul.f32 %v739_v16, %v2149_v50  ;;  %v741_v20 = vmul.f32 %v738_v15, %v2137_v46 }
 0x620   :  { %v743_v21 = vpop.permute.xlu0 %742 }
 0x621   :  { %v776_v23 = vpack.c.bf16 %v740_v19, %v732_v17  ;;  %v745_v25 = vpop.permute.xlu1 %744  ;;  %v777_v39 = vpack.c.bf16 %v741_v20, %v733_v18 }
 0x622   :  { %v746_v43 = vsel %vm261_vm6, %v743_v21, %v745_v25  ;;  %v747_v44 = vsel %vm261_vm6, %v745_v25, %v743_v21  ;;  %v784_v25 = vld [vmem:[%s2993_s10] sm:$0xf] }
 0x623   :  { %v748_v35 = vmul.f32 %v746_v43, %v2180_v14  ;;  %v749_v54 = vmul.f32 %v747_v44, %v2153_v53  ;;  %802 = vmatprep.subr.bf16.mxu0 %v777_v39 }
 0x624   :  { %803 = vmatpush1.bf16.msra.mxu0 %v776_v23  ;;  %v751_v55 = vpop.permute.xlu0 %750 }
 0x625   :  { %v778_v34 = vpack.c.bf16 %v748_v35, %v2431_v45  ;;  %v753_v56 = vpop.permute.xlu1 %752  ;;  %v779_v57 = vpack.c.bf16 %v749_v54, %v2433_v52  ;;  %v1749_v45 = vld [vmem:[%s2983_s0 + $0x8] sm:$0xff] }
 0x626   :  { %v754_v58 = vsel %vm281_vm7, %v751_v55, %v753_v56  ;;  %v755_v59 = vsel %vm281_vm7, %v753_v56, %v751_v55  ;;  %v956_v12 = vcombine.high %v1749_v45, %v1749_v45  ;;  %v958_v21 = vpack.c.bf16 %v1749_v45, %v1749_v45 }
 0x627   :  { %804 = vmatprep.subr.bf16.mxu0 %v779_v57  ;;  %v756_v52 = vmul.f32 %v754_v58, %v2195_v26  ;;  %v757_v63 = vmul.f32 %v755_v59, %v2198_v27 }
 0x628   :  { %805 = vmatpush1.bf16.msra.mxu0 %v778_v34  ;;  %v759_v60 = vpop.permute.xlu0 %758  ;;  %v959_v20 = vpack.c.bf16 %v956_v12, %v956_v12  ;;  %v961_v39 = vsel %vm97_vm0, %v958_v21, 0 }
 0x629   :  { %v761_v33 = vpop.permute.xlu1 %760 }
 0x62a   :  { %v762_v61 = vsel %vm301_vm8, %v759_v60, %v761_v33  ;;  %v763_v62 = vsel %vm301_vm8, %v761_v33, %v759_v60 }
 0x62b   :  { %v764_v1 = vmul.f32 %v762_v61, %v2205_v31  ;;  %v765_v2 = vmul.f32 %v763_v62, %v2208_v32 }
 0x62c   :  { %v767_v4 = vpop.permute.xlu0 %766 }
 0x62d   :  { %v780_v5 = vpack.c.bf16 %v764_v1, %v756_v52  ;;  %v769_v6 = vpop.permute.xlu1 %768  ;;  %v781_v11 = vpack.c.bf16 %v765_v2, %v757_v63 }
 0x62e   :  { %v770_v13 = vsel %vm321_vm9, %v767_v4, %v769_v6  ;;  %v771_v15 = vsel %vm321_vm9, %v769_v6, %v767_v4 }
 0x62f   :  { %v772_v16 = vmul.f32 %v770_v13, %v2225_v51  ;;  %v773_v17 = vmul.f32 %v771_v15, %v2217_v40  ;;  %806 = vmatprep.subr.bf16.mxu0 %v781_v11 }
 0x630   :  { %807 = vmatpush1.bf16.msra.mxu0 %v780_v5 }
 0x631   :  { %v782_v18 = vpack.c.bf16 %v772_v16, %v772_v16  ;;  %v783_v19 = vpack.c.bf16 %v773_v17, %v773_v17 }
 0x633   :  { %1739 = vmatprep.subr.msk.bf16.mxu0 %vm358_vm10, %v783_v19  ;;  %v795_v23 = vsel %vm358_vm10, %v782_v18, 0 }
 0x634   :  { %809 = vmatpush1.bf16.msra.mxu0 %v795_v23 }
 0x635   :  { %1750 = vmatprep.subr.msk.bf16.mxu0 %vm97_vm0, %v959_v20 }
 0x637   :  { %1740 = vmatmul.mubr.msk.bf16.vlgmr.msra.gmra.mrb[8].mxu0 %vm354_vm11, %v784_v25 }
 0x638   :  { %967 = vmatpush1.bf16.msra.mxu0 %v961_v39  ;;  %998 = vmatprep.mubr.bf16.mxu0 %v1948_v3 }
 0x63d   :  { %v789_v34 = vpop.permute.xlu0 %788 }
 0x63e   :  { %v2541_v43 = vpop.permute.xlu1 %80 }
 0x63f   :  { %1751 = vmatmul.mubr.msk.bf16.vlgmr.msra.gmra.mrb[12].mxu0 %vm93_vm1, %v2049_v7  ;;  %v141_v44 = vadd.f32 %v2058_v10, %v2541_v43  ;;  %v139_v35 = vadd.f32 %v2054_v8, %v2541_v43 }
 0x640   :  { %1304 = vmatprep.mubr.bf16.mxu0 %v1948_v3 }
 0x641   :  { %v1724_v54 = vmul.f32 -1.442695, %v141_v44  ;;  %v1723_v55 = vmul.f32 -1.442695, %v139_v35 }
 0x643   :  { %1826 = vpow2.f32 %v1724_v54 }
 0x644   :  { %1828 = vpow2.f32 %v1723_v55 }
 0x64d   :  { %v1827_v8 = vpop.eup %1826 }
 0x64e   :  { %v1829_v2 = vpop.eup %1828  ;;  %v160_v4 = vadd.f32 1.0, %v1827_v8 }
 0x64f   :  { %v159_v13 = vadd.f32 1.0, %v1829_v2 }
 0x70a   :  { %v834_v56 = vpop.f32.mrb[8].mxu0 }
 0x70b   :  { %v835_v57 = vadd.f32 %v834_v56, %v789_v34  ;;  %v836_v58 = vpop.f32.mrb[9].mxu0 }
 0x70c   :  { %v837_v59 = vadd.f32 %v836_v58, %v789_v34  ;;  %v838_v60 = vpop.f32.mrb[10].mxu0 }
 0x70d   :  { %v1741_v7 = vmul.f32 -1.442695, %v835_v57  ;;  %v839_v33 = vpop.f32.mrb[11].mxu0 }
 0x70e   :  { %v1742_v61 = vmul.f32 -1.442695, %v837_v59 }
 0x70f   :  { %1830 = vpow2.f32 %v1741_v7 }
 0x710   :  { %1832 = vpow2.f32 %v1742_v61 }
 0x712   :  { %v2547_v62 = vpop.f32.mrb[12].mxu0 }
 0x713   :  { %v2549_v10 = vpop.f32.mrb[13].mxu0 }
 0x714   :  { %v1004_v45 = vpop.f32.mrb[14].mxu0 }
 0x715   :  { %v1005_v52 = vadd.f32 %v1004_v45, %v2056_v9  ;;  %v1006_v63 = vpop.f32.mrb[15].mxu0 }
 0x716   :  { %v1007_v1 = vadd.f32 %v1006_v63, %v2056_v9 }
 0x717   :  { %v1754_v5 = vmul.f32 -1.442695, %v1005_v52 }
 0x718   :  { %v1755_v6 = vmul.f32 -1.442695, %v1007_v1 }
 0x719   :  { %v1831_v11 = vpop.eup %1830  ;;  %1834 = vpow2.f32 %v1754_v5 }
 0x71a   :  { %v1833_v12 = vpop.eup %1832  ;;  %v847_v15 = vadd.f32 1.0, %v1831_v11  ;;  %1836 = vpow2.f32 %v1755_v6 }
 0x71b   :  { %1838 = vrcp.f32 %v160_v4  ;;  %v848_v16 = vadd.f32 1.0, %v1833_v12 }
 0x71c   :  { %1840 = vrcp.f32 %v847_v15 }
 0x71d   :  { %1842 = vrcp.f32 %v848_v16 }
 0x71e   :  { %1844 = vrcp.f32 %v159_v13 }
 0x723   :  { %v1835_v17 = vpop.eup %1834 }
 0x724   :  { %v1837_v18 = vpop.eup %1836  ;;  %v1023_v19 = vadd.f32 1.0, %v1835_v17 }
 0x725   :  { %v1839_v20 = vpop.eup %1838  ;;  %v1024_v9 = vadd.f32 1.0, %v1837_v18 }
 0x726   :  { %v1841_v21 = vpop.eup %1840  ;;  %1846 = vrcp.f32 %v1023_v19  ;;  %v172_v55 = vmul.f32 %v1839_v20, %v141_v44 }
 0x727   :  { %v1843_v23 = vpop.eup %1842  ;;  %v853_v25 = vmul.f32 %v1841_v21, %v835_v57  ;;  %1848 = vrcp.f32 %v1024_v9  ;;  %v1793_v57 = vld [vmem:[%s2995_s12] sm:$0xff]  }
 0x728   :  { %v1845_v39 = vpop.eup %1844  ;;  %v854_v54 = vmul.f32 %v1843_v23, %v837_v59  ;;  %v858_v60 = vpack.c.bf16 %v172_v55, %v2068_v24 }
 0x729   :  { %v171_v56 = vmul.f32 %v1845_v39, %v139_v35  ;;  %v855_v58 = vpack.c.bf16 %v2332_v28, %v853_v25 }
 0x72a   :  { %v856_v34 = vpack.c.bf16 %v2334_v37, %v854_v54 }
 0x72b   :  { %v857_v7 = vpack.c.bf16 %v171_v56, %v2062_v22  ;;  %v1922_v22 = vld [vmem:[%s2988_s5] sm:$0xff] }
 0x72c   :  { %878 = vmatprep.subr.bf16.mxu1 %v856_v34 }
 0x72d   :  { %879 = vmatpush1.bf16.msra.mxu1 %v855_v58 }
 0x72e   :  { %880 = vmatprep.subr.bf16.mxu1 %v858_v60 }
 0x730   :  { %v1847_v33 = vpop.eup %1846 }
 0x731   :  { %v1849_v61 = vpop.eup %1848  ;;  %v2560_v59 = vmul.f32 %v1847_v33, %v1005_v52  ;;  %881 = vmatpush1.bf16.msra.mxu1 %v857_v7 }
 0x732   :  { %v2562_v37 = vmul.f32 %v1849_v61, %v1007_v1 }
 0x733   :  { %1037 = vrot.lane.b32.xlu0 %v2560_v59, %s1950_s19 }
 0x734   :  { %1039 = vrot.lane.b32.xlu1 %v2562_v37, %s1950_s19  ;;  %1744 = vmatmul.mubr.msk.bf16.vlgmr.msra.gmra.mrb[8].mxu1 %vm874_vm12, %v1793_v57 }
 0x735   :  { %1159 = vmatprep.mubr.bf16.mxu1 %v1948_v3 }
 0x737   :  { %1045 = vrot.lane.b32.xlu0 %v2560_v59, %s1949_s2 }
 0x738   :  { %1047 = vrot.lane.b32.xlu1 %v2562_v37, %s1949_s2 }
 0x73b   :  { %1053 = vrot.lane.b32.xlu0 %v2560_v59, %s1951_s20 }
 0x73c   :  { %1055 = vrot.lane.b32.xlu1 %v2562_v37, %s1951_s20 }
 0x73f   :  { %1061 = vrot.lane.b32.xlu0 %v2560_v59, %s1952_s21 }
 0x740   :  { %1063 = vrot.lane.b32.xlu1 %v2562_v37, %s1952_s21 }
 0x743   :  { %1069 = vrot.lane.b32.xlu0 %v2560_v59, %s1953_s22 }
 0x744   :  { %1071 = vrot.lane.b32.xlu1 %v2562_v37, %s1953_s22 }
 0x747   :  { %1077 = vrot.lane.b32.xlu0 %v2560_v59, %s1954_s23 }
 0x748   :  { %1079 = vrot.lane.b32.xlu1 %v2562_v37, %s1954_s23 }
 0x74b   :  { %1085 = vrot.lane.b32.xlu0 %v2560_v59, %s1955_s24 }
 0x74c   :  { %1087 = vrot.lane.b32.xlu1 %v2562_v37, %s1955_s24 }
 0x74f   :  { %1093 = vrot.lane.b32.xlu0 %v2560_v59, %s1956_s25 }
 0x750   :  { %1095 = vrot.lane.b32.xlu1 %v2562_v37, %s1956_s25 }
 0x753   :  { %1115 = vperm.xlu0 %1788, %v1922_v22  }
 0x7a5   :  { %v1038_v24 = vpop.permute.xlu0 %1037 }
 0x7a6   :  { %v1040_v28 = vpop.permute.xlu1 %1039 }
 0x7a7   :  { %v1041_v44 = vsel %vm181_vm4, %v1038_v24, %v1040_v28  ;;  %v1042_v35 = vsel %vm181_vm4, %v1040_v28, %v1038_v24 }
 0x7a8   :  { %v1043_v1 = vmul.f32 %v1042_v35, %v2143_v48  ;;  %v1044_v2 = vmul.f32 %v1041_v44, %v2140_v47 }
 0x7a9   :  { %v1046_v8 = vpop.permute.xlu0 %1045 }
 0x7aa   :  { %v1048_v45 = vpop.permute.xlu1 %1047 }
 0x7ab   :  { %v1049_v52 = vsel %vm201_vm2, %v1046_v8, %v1048_v45  ;;  %v1050_v63 = vsel %vm201_vm2, %v1048_v45, %v1046_v8 }
 0x7ac   :  { %v1051_v4 = vmul.f32 %v1050_v63, %v2124_v42  ;;  %v1052_v5 = vmul.f32 %v1049_v52, %v2121_v41 }
 0x7ad   :  { %v1054_v6 = vpop.permute.xlu0 %1053 }
 0x7ae   :  { %v1101_v11 = vpack.c.bf16 %v1051_v4, %v1043_v1  ;;  %v1056_v12 = vpop.permute.xlu1 %1055  ;;  %v1102_v13 = vpack.c.bf16 %v1052_v5, %v1044_v2 }
 0x7af   :  { %v1057_v15 = vsel %vm221_vm3, %v1054_v6, %v1056_v12  ;;  %v1058_v16 = vsel %vm221_vm3, %v1056_v12, %v1054_v6 }
 0x7b0   :  { %1127 = vmatprep.subr.bf16.mxu1 %v1102_v13  ;;  %v1059_v9 = vmul.f32 %v1058_v16, %v2171_v0  ;;  %v1060_v21 = vmul.f32 %v1057_v15, %v2146_v49 }
 0x7b1   :  { %1128 = vmatpush1.bf16.msra.mxu1 %v1101_v11  ;;  %v1062_v17 = vpop.permute.xlu0 %1061 }
 0x7b2   :  { %v1064_v18 = vpop.permute.xlu1 %1063 }
 0x7b3   :  { %v1065_v19 = vsel %vm241_vm5, %v1062_v17, %v1064_v18  ;;  %v1066_v20 = vsel %vm241_vm5, %v1064_v18, %v1062_v17 }
 0x7b4   :  { %v1067_v23 = vmul.f32 %v1066_v20, %v2149_v50  ;;  %v1068_v25 = vmul.f32 %v1065_v19, %v2137_v46  ;;  %v1111_v20 = vld [vmem:[%s2987_s4] sm:$0xf] }
 0x7b5   :  { %v1070_v39 = vpop.permute.xlu0 %1069 }
 0x7b6   :  { %v1103_v54 = vpack.c.bf16 %v1067_v23, %v1059_v9  ;;  %v1072_v55 = vpop.permute.xlu1 %1071  ;;  %v1104_v34 = vpack.c.bf16 %v1068_v25, %v1060_v21 }
 0x7b7   :  { %v1073_v56 = vsel %vm261_vm6, %v1070_v39, %v1072_v55  ;;  %v1074_v58 = vsel %vm261_vm6, %v1072_v55, %v1070_v39 }
 0x7b8   :  { %v1075_v60 = vmul.f32 %v1073_v56, %v2180_v14  ;;  %v1076_v7 = vmul.f32 %v1074_v58, %v2153_v53  ;;  %1129 = vmatprep.subr.bf16.mxu1 %v1104_v34 }
 0x7b9   :  { %1130 = vmatpush1.bf16.msra.mxu1 %v1103_v54  ;;  %v1078_v33 = vpop.permute.xlu0 %1077 }
 0x7ba   :  { %v1105_v57 = vpack.c.bf16 %v1075_v60, %v2560_v59  ;;  %v1080_v61 = vpop.permute.xlu1 %1079  ;;  %v1106_v22 = vpack.c.bf16 %v1076_v7, %v2562_v37 }
 0x7bb   :  { %v1081_v24 = vsel %vm281_vm7, %v1078_v33, %v1080_v61  ;;  %v1082_v28 = vsel %vm281_vm7, %v1080_v61, %v1078_v33 }
 0x7bc   :  { %1131 = vmatprep.subr.bf16.mxu1 %v1106_v22  ;;  %v1083_v52 = vmul.f32 %v1081_v24, %v2195_v26  ;;  %v1084_v63 = vmul.f32 %v1082_v28, %v2198_v27 }
 0x7bd   :  { %1132 = vmatpush1.bf16.msra.mxu1 %v1105_v57  ;;  %v1086_v44 = vpop.permute.xlu0 %1085 }
 0x7be   :  { %v1088_v35 = vpop.permute.xlu1 %1087 }
 0x7bf   :  { %v1089_v8 = vsel %vm301_vm8, %v1086_v44, %v1088_v35  ;;  %v1090_v45 = vsel %vm301_vm8, %v1088_v35, %v1086_v44 }
 0x7c0   :  { %v1091_v1 = vmul.f32 %v1089_v8, %v2205_v31  ;;  %v1092_v2 = vmul.f32 %v1090_v45, %v2208_v32 }
 0x7c1   :  { %v1094_v4 = vpop.permute.xlu0 %1093 }
 0x7c2   :  { %v1107_v5 = vpack.c.bf16 %v1091_v1, %v1083_v52  ;;  %v1096_v6 = vpop.permute.xlu1 %1095  ;;  %v1108_v11 = vpack.c.bf16 %v1092_v2, %v1084_v63 }
 0x7c3   :  { %v1097_v12 = vsel %vm321_vm9, %v1094_v4, %v1096_v6  ;;  %v1098_v13 = vsel %vm321_vm9, %v1096_v6, %v1094_v4 }
 0x7c4   :  { %v1099_v15 = vmul.f32 %v1097_v12, %v2225_v51  ;;  %v1100_v16 = vmul.f32 %v1098_v13, %v2217_v40  ;;  %1133 = vmatprep.subr.bf16.mxu1 %v1108_v11 }
 0x7c5   :  { %1134 = vmatpush1.bf16.msra.mxu1 %v1107_v5 }
 0x7c6   :  { %v1109_v17 = vpack.c.bf16 %v1099_v15, %v1099_v15  ;;  %v1110_v18 = vpack.c.bf16 %v1100_v16, %v1100_v16 }
 0x7c8   :  { %1756 = vmatprep.subr.msk.bf16.mxu1 %vm358_vm10, %v1110_v18  ;;  %v1122_v19 = vsel %vm358_vm10, %v1109_v17, 0 }
 0x7c9   :  { %1136 = vmatpush1.bf16.msra.mxu1 %v1122_v19 }
 0x7cc   :  { %1757 = vmatmul.mubr.msk.bf16.vlgmr.msra.gmra.mrb[12].mxu1 %vm354_vm11, %v1111_v20 }
 0x7cd   :  { %1449 = vmatprep.mubr.bf16.mxu1 %v1948_v3 }
 0x7d2   :  { %v1116_v39 = vpop.permute.xlu0 %1115 }
 0x807   :  { %v2658_v9 = vpop.f32.mrb[8].mxu1 }
 0x808   :  { %v2660_v21 = vpop.f32.mrb[9].mxu1 }
 0x809   :  { %v2662_v23 = vpop.f32.mrb[10].mxu1 }
 0x80a   :  { %v2664_v25 = vpop.f32.mrb[11].mxu1 }
 0x89f   :  { %v1161_v54 = vpop.f32.mrb[12].mxu1 }
 0x8a0   :  { %v1162_v55 = vadd.f32 %v1161_v54, %v1116_v39  ;;  %v1163_v34 = vpop.f32.mrb[13].mxu1 }
 0x8a1   :  { %v1164_v56 = vadd.f32 %v1163_v34, %v1116_v39  ;;  %v1165_v58 = vpop.f32.mrb[14].mxu1 }
 0x8a2   :  { %v1758_v60 = vmul.f32 -1.442695, %v1162_v55  ;;  %v1166_v7 = vpop.f32.mrb[15].mxu1 }
 0x8a3   :  { %v1759_v33 = vmul.f32 -1.442695, %v1164_v56 }
 0x8a4   :  { %1850 = vpow2.f32 %v1758_v60 }
 0x8a5   :  { %1852 = vpow2.f32 %v1759_v33 }
 0x8ae   :  { %v1851_v57 = vpop.eup %1850 }
 0x8af   :  { %v1853_v61 = vpop.eup %1852  ;;  %v1174_v22 = vadd.f32 1.0, %v1851_v57 }
 0x8b0   :  { %v1175_v24 = vadd.f32 1.0, %v1853_v61 }
 0x8b1   :  { %1854 = vrcp.f32 %v1174_v22 }
 0x8b2   :  { %1856 = vrcp.f32 %v1175_v24 }
 0x8bb   :  { %v1855_v28 = vpop.eup %1854 }
 0x8bc   :  { %v1857_v44 = vpop.eup %1856  ;;  %v2666_v35 = vmul.f32 %v1855_v28, %v1162_v55 }
 0x8bd   :  { %v1181_v8 = vmul.f32 %v1857_v44, %v1164_v56 }
 0x8be   :  { %1182 = vrot.lane.b32.xlu1 %v2666_v35, %s1950_s19 }
 0x8bf   :  { %1184 = vrot.lane.b32.xlu0 %v1181_v8, %s1950_s19 }
 0x8c2   :  { %1190 = vrot.lane.b32.xlu1 %v2666_v35, %s1949_s2 }
 0x8c3   :  { %1192 = vrot.lane.b32.xlu0 %v1181_v8, %s1949_s2 }
 0x8c6   :  { %1198 = vrot.lane.b32.xlu1 %v2666_v35, %s1951_s20 }
 0x8c7   :  { %1200 = vrot.lane.b32.xlu0 %v1181_v8, %s1951_s20 }
 0x8ca   :  { %1206 = vrot.lane.b32.xlu1 %v2666_v35, %s1952_s21 }
 0x8cb   :  { %1208 = vrot.lane.b32.xlu0 %v1181_v8, %s1952_s21 }
 0x8ce   :  { %1214 = vrot.lane.b32.xlu1 %v2666_v35, %s1953_s22 }
 0x8cf   :  { %1216 = vrot.lane.b32.xlu0 %v1181_v8, %s1953_s22 }
 0x8d2   :  { %1222 = vrot.lane.b32.xlu1 %v2666_v35, %s1954_s23 }
 0x8d3   :  { %1224 = vrot.lane.b32.xlu0 %v1181_v8, %s1954_s23 }
 0x8d6   :  { %1230 = vrot.lane.b32.xlu1 %v2666_v35, %s1955_s24 }
 0x8d7   :  { %1232 = vrot.lane.b32.xlu0 %v1181_v8, %s1955_s24 }
 0x8da   :  { %1238 = vrot.lane.b32.xlu1 %v2666_v35, %s1956_s25 }
 0x8db   :  { %1240 = vrot.lane.b32.xlu0 %v1181_v8, %s1956_s25 }
 0x8de   :  { %1260 = vperm.xlu1 %1789, %v2273_v36  }
 0x930   :  { %v1183_v45 = vpop.permute.xlu1 %1182 }
 0x931   :  { %v1185_v52 = vpop.permute.xlu0 %1184 }
 0x932   :  { %v1186_v63 = vsel %vm181_vm4, %v1183_v45, %v1185_v52  ;;  %v1187_v1 = vsel %vm181_vm4, %v1185_v52, %v1183_v45 }
 0x933   :  { %v1188_v11 = vmul.f32 %v1187_v1, %v2143_v48  ;;  %v1189_v36 = vmul.f32 %v1186_v63, %v2140_v47 }
 0x934   :  { %v1191_v2 = vpop.permute.xlu1 %1190 }
 0x935   :  { %v1193_v4 = vpop.permute.xlu0 %1192 }
 0x936   :  { %v1194_v5 = vsel %vm201_vm2, %v1191_v2, %v1193_v4  ;;  %v1195_v6 = vsel %vm201_vm2, %v1193_v4, %v1191_v2 }
 0x937   :  { %v1196_v12 = vmul.f32 %v1195_v6, %v2124_v42  ;;  %v1197_v13 = vmul.f32 %v1194_v5, %v2121_v41 }
 0x938   :  { %v1199_v15 = vpop.permute.xlu1 %1198 }
 0x939   :  { %v1246_v16 = vpack.c.bf16 %v1196_v12, %v1188_v11  ;;  %v1201_v17 = vpop.permute.xlu0 %1200  ;;  %v1247_v18 = vpack.c.bf16 %v1197_v13, %v1189_v36 }
 0x93a   :  { %v1202_v19 = vsel %vm221_vm3, %v1199_v15, %v1201_v17  ;;  %v1203_v20 = vsel %vm221_vm3, %v1201_v17, %v1199_v15 }
 0x93b   :  { %1272 = vmatprep.subr.bf16.mxu0 %v1247_v18  ;;  %v1204_v56 = vmul.f32 %v1203_v20, %v2171_v0  ;;  %v1205_v58 = vmul.f32 %v1202_v19, %v2146_v49 }
 0x93c   :  { %1273 = vmatpush1.bf16.msra.mxu0 %v1246_v16  ;;  %v1207_v39 = vpop.permute.xlu1 %1206 }
 0x93d   :  { %v1209_v54 = vpop.permute.xlu0 %1208 }
 0x93e   :  { %v1210_v55 = vsel %vm241_vm5, %v1207_v39, %v1209_v54  ;;  %v1211_v34 = vsel %vm241_vm5, %v1209_v54, %v1207_v39 }
 0x93f   :  { %v1212_v60 = vmul.f32 %v1211_v34, %v2149_v50  ;;  %v1213_v7 = vmul.f32 %v1210_v55, %v2137_v46 }
 0x940   :  { %v1215_v33 = vpop.permute.xlu1 %1214 }
 0x941   :  { %v1248_v57 = vpack.c.bf16 %v1212_v60, %v1204_v56  ;;  %v1217_v61 = vpop.permute.xlu0 %1216  ;;  %v1249_v22 = vpack.c.bf16 %v1213_v7, %v1205_v58  ;;  %v1256_v60 = vld [vmem:[%s2989_s6] sm:$0xf] }
 0x942   :  { %v1218_v24 = vsel %vm261_vm6, %v1215_v33, %v1217_v61  ;;  %v1219_v28 = vsel %vm261_vm6, %v1217_v61, %v1215_v33 }
 0x943   :  { %v1220_v44 = vmul.f32 %v1218_v24, %v2180_v14  ;;  %v1221_v45 = vmul.f32 %v1219_v28, %v2153_v53  ;;  %1274 = vmatprep.subr.bf16.mxu0 %v1249_v22 }
 0x944   :  { %1275 = vmatpush1.bf16.msra.mxu0 %v1248_v57  ;;  %v1223_v52 = vpop.permute.xlu1 %1222 }
 0x945   :  { %v1250_v63 = vpack.c.bf16 %v1220_v44, %v2666_v35  ;;  %v1225_v1 = vpop.permute.xlu0 %1224  ;;  %v1251_v2 = vpack.c.bf16 %v1221_v45, %v1181_v8 }
 0x946   :  { %v1226_v4 = vsel %vm281_vm7, %v1223_v52, %v1225_v1  ;;  %v1227_v5 = vsel %vm281_vm7, %v1225_v1, %v1223_v52 }
 0x947   :  { %1276 = vmatprep.subr.bf16.mxu0 %v1251_v2  ;;  %v1228_v35 = vmul.f32 %v1226_v4, %v2195_v26  ;;  %v1229_v8 = vmul.f32 %v1227_v5, %v2198_v27 }
 0x948   :  { %1277 = vmatpush1.bf16.msra.mxu0 %v1250_v63  ;;  %v1231_v6 = vpop.permute.xlu1 %1230 }
 0x949   :  { %v1233_v11 = vpop.permute.xlu0 %1232 }
 0x94a   :  { %v1234_v36 = vsel %vm301_vm8, %v1231_v6, %v1233_v11  ;;  %v1235_v12 = vsel %vm301_vm8, %v1233_v11, %v1231_v6 }
 0x94b   :  { %v1236_v13 = vmul.f32 %v1234_v36, %v2205_v31  ;;  %v1237_v15 = vmul.f32 %v1235_v12, %v2208_v32 }
 0x94c   :  { %v1239_v16 = vpop.permute.xlu1 %1238 }
 0x94d   :  { %v1252_v17 = vpack.c.bf16 %v1236_v13, %v1228_v35  ;;  %v1241_v18 = vpop.permute.xlu0 %1240  ;;  %v1253_v19 = vpack.c.bf16 %v1237_v15, %v1229_v8 }
 0x94e   :  { %v1242_v20 = vsel %vm321_vm9, %v1239_v16, %v1241_v18  ;;  %v1243_v39 = vsel %vm321_vm9, %v1241_v18, %v1239_v16 }
 0x94f   :  { %v1244_v54 = vmul.f32 %v1242_v20, %v2225_v51  ;;  %v1245_v55 = vmul.f32 %v1243_v39, %v2217_v40  ;;  %1278 = vmatprep.subr.bf16.mxu0 %v1253_v19 }
 0x950   :  { %1279 = vmatpush1.bf16.msra.mxu0 %v1252_v17 }
 0x951   :  { %v1254_v34 = vpack.c.bf16 %v1244_v54, %v1244_v54  ;;  %v1255_v56 = vpack.c.bf16 %v1245_v55, %v1245_v55 }
 0x953   :  { %1760 = vmatprep.subr.msk.bf16.mxu0 %vm358_vm10, %v1255_v56  ;;  %v1267_v58 = vsel %vm358_vm10, %v1254_v34, 0 }
 0x954   :  { %1281 = vmatpush1.bf16.msra.mxu0 %v1267_v58 }
 0x957   :  { %1761 = vmatmul.mubr.msk.bf16.vlgmr.msra.gmra.mrb[16].mxu0 %vm354_vm11, %v1256_v60 }
 0x958   :  { %1594 = vmatprep.mubr.bf16.mxu0 %v1948_v3 }
 0x95d   :  { %v1261_v7 = vpop.permute.xlu1 %1260 }
 0xa2a   :  { %v1306_v33 = vpop.f32.mrb[16].mxu0 }
 0xa2b   :  { %v1307_v57 = vadd.f32 %v1306_v33, %v1261_v7  ;;  %v1308_v61 = vpop.f32.mrb[17].mxu0 }
 0xa2c   :  { %v1309_v22 = vadd.f32 %v1308_v61, %v1261_v7  ;;  %v1310_v24 = vpop.f32.mrb[18].mxu0 }
 0xa2d   :  { %v1762_v28 = vmul.f32 -1.442695, %v1307_v57  ;;  %v1311_v44 = vpop.f32.mrb[19].mxu0 }
 0xa2e   :  { %v1763_v45 = vmul.f32 -1.442695, %v1309_v22 }
 0xa2f   :  { %1858 = vpow2.f32 %v1762_v28 }
 0xa30   :  { %1860 = vpow2.f32 %v1763_v45 }
 0xa39   :  { %v1859_v52 = vpop.eup %1858 }
 0xa3a   :  { %v1861_v63 = vpop.eup %1860  ;;  %v1319_v1 = vadd.f32 1.0, %v1859_v52 }
 0xa3b   :  { %v1320_v2 = vadd.f32 1.0, %v1861_v63 }
 0xa3c   :  { %1862 = vrcp.f32 %v1319_v1 }
 0xa3d   :  { %1864 = vrcp.f32 %v1320_v2 }
 0xa46   :  { %v1863_v4 = vpop.eup %1862 }
 0xa47   :  { %v1865_v5 = vpop.eup %1864  ;;  %v2749_v6 = vmul.f32 %v1863_v4, %v1307_v57 }
 0xa48   :  { %v2751_v11 = vmul.f32 %v1865_v5, %v1309_v22 }
 0xa49   :  { %1327 = vrot.lane.b32.xlu0 %v2749_v6, %s1950_s19 }
 0xa4a   :  { %1329 = vrot.lane.b32.xlu1 %v2751_v11, %s1950_s19 }
 0xa4d   :  { %1335 = vrot.lane.b32.xlu0 %v2749_v6, %s1949_s2 }
 0xa4e   :  { %1337 = vrot.lane.b32.xlu1 %v2751_v11, %s1949_s2 }
 0xa51   :  { %1343 = vrot.lane.b32.xlu0 %v2749_v6, %s1951_s20 }
 0xa52   :  { %1345 = vrot.lane.b32.xlu1 %v2751_v11, %s1951_s20 }
 0xa55   :  { %1351 = vrot.lane.b32.xlu0 %v2749_v6, %s1952_s21 }
 0xa56   :  { %1353 = vrot.lane.b32.xlu1 %v2751_v11, %s1952_s21 }
 0xa59   :  { %1359 = vrot.lane.b32.xlu0 %v2749_v6, %s1953_s22 }
 0xa5a   :  { %1361 = vrot.lane.b32.xlu1 %v2751_v11, %s1953_s22 }
 0xa5d   :  { %1367 = vrot.lane.b32.xlu0 %v2749_v6, %s1954_s23 }
 0xa5e   :  { %1369 = vrot.lane.b32.xlu1 %v2751_v11, %s1954_s23 }
 0xa61   :  { %1375 = vrot.lane.b32.xlu0 %v2749_v6, %s1955_s24 }
 0xa62   :  { %1377 = vrot.lane.b32.xlu1 %v2751_v11, %s1955_s24 }
 0xa65   :  { %1383 = vrot.lane.b32.xlu0 %v2749_v6, %s1956_s25 }
 0xa66   :  { %1385 = vrot.lane.b32.xlu1 %v2751_v11, %s1956_s25 }
 0xa69   :  { %1405 = vperm.xlu0 %1788, %v2371_v38  }
 0xabb   :  { %v1328_v36 = vpop.permute.xlu0 %1327 }
 0xabc   :  { %v1330_v12 = vpop.permute.xlu1 %1329 }
 0xabd   :  { %v1331_v35 = vsel %vm181_vm4, %v1328_v36, %v1330_v12  ;;  %v1332_v8 = vsel %vm181_vm4, %v1330_v12, %v1328_v36 }
 0xabe   :  { %v1333_v18 = vmul.f32 %v1332_v8, %v2143_v48  ;;  %v1334_v38 = vmul.f32 %v1331_v35, %v2140_v47 }
 0xabf   :  { %v1336_v13 = vpop.permute.xlu0 %1335 }
 0xac0   :  { %v1338_v15 = vpop.permute.xlu1 %1337 }
 0xac1   :  { %v1339_v16 = vsel %vm201_vm2, %v1336_v13, %v1338_v15  ;;  %v1340_v17 = vsel %vm201_vm2, %v1338_v15, %v1336_v13 }
 0xac2   :  { %v1341_v19 = vmul.f32 %v1340_v17, %v2124_v42  ;;  %v1342_v20 = vmul.f32 %v1339_v16, %v2121_v41 }
 0xac3   :  { %v1344_v39 = vpop.permute.xlu0 %1343 }
 0xac4   :  { %v1391_v54 = vpack.c.bf16 %v1341_v19, %v1333_v18  ;;  %v1346_v55 = vpop.permute.xlu1 %1345  ;;  %v1392_v34 = vpack.c.bf16 %v1342_v20, %v1334_v38 }
 0xac5   :  { %v1347_v56 = vsel %vm221_vm3, %v1344_v39, %v1346_v55  ;;  %v1348_v58 = vsel %vm221_vm3, %v1346_v55, %v1344_v39 }
 0xac6   :  { %1417 = vmatprep.subr.bf16.mxu1 %v1392_v34  ;;  %v1349_v61 = vmul.f32 %v1348_v58, %v2171_v0  ;;  %v1350_v22 = vmul.f32 %v1347_v56, %v2146_v49 }
 0xac7   :  { %1418 = vmatpush1.bf16.msra.mxu1 %v1391_v54  ;;  %v1352_v60 = vpop.permute.xlu0 %1351 }
 0xac8   :  { %v1354_v7 = vpop.permute.xlu1 %1353 }
 0xac9   :  { %v1355_v33 = vsel %vm241_vm5, %v1352_v60, %v1354_v7  ;;  %v1356_v57 = vsel %vm241_vm5, %v1354_v7, %v1352_v60 }
 0xaca   :  { %v1357_v24 = vmul.f32 %v1356_v57, %v2149_v50  ;;  %v1358_v28 = vmul.f32 %v1355_v33, %v2137_v46 }
 0xacb   :  { %v1360_v44 = vpop.permute.xlu0 %1359 }
 0xacc   :  { %v1393_v45 = vpack.c.bf16 %v1357_v24, %v1349_v61  ;;  %v1362_v52 = vpop.permute.xlu1 %1361  ;;  %v1394_v63 = vpack.c.bf16 %v1358_v28, %v1350_v22  ;;  %v1401_v28 = vld [vmem:[%s2991_s8] sm:$0xf] }
 0xacd   :  { %v1363_v1 = vsel %vm261_vm6, %v1360_v44, %v1362_v52  ;;  %v1364_v2 = vsel %vm261_vm6, %v1362_v52, %v1360_v44 }
 0xace   :  { %v1365_v4 = vmul.f32 %v1363_v1, %v2180_v14  ;;  %v1366_v5 = vmul.f32 %v1364_v2, %v2153_v53  ;;  %1419 = vmatprep.subr.bf16.mxu1 %v1394_v63 }
 0xacf   :  { %1420 = vmatpush1.bf16.msra.mxu1 %v1393_v45  ;;  %v1368_v36 = vpop.permute.xlu0 %1367 }
 0xad0   :  { %v1395_v12 = vpack.c.bf16 %v1365_v4, %v2749_v6  ;;  %v1370_v35 = vpop.permute.xlu1 %1369  ;;  %v1396_v8 = vpack.c.bf16 %v1366_v5, %v2751_v11 }
 0xad1   :  { %v1371_v13 = vsel %vm281_vm7, %v1368_v36, %v1370_v35  ;;  %v1372_v15 = vsel %vm281_vm7, %v1370_v35, %v1368_v36 }
 0xad2   :  { %1421 = vmatprep.subr.bf16.mxu1 %v1396_v8  ;;  %v1373_v19 = vmul.f32 %v1371_v13, %v2195_v26  ;;  %v1374_v20 = vmul.f32 %v1372_v15, %v2198_v27 }
 0xad3   :  { %1422 = vmatpush1.bf16.msra.mxu1 %v1395_v12  ;;  %v1376_v16 = vpop.permute.xlu0 %1375 }
 0xad4   :  { %v1378_v17 = vpop.permute.xlu1 %1377 }
 0xad5   :  { %v1379_v18 = vsel %vm301_vm8, %v1376_v16, %v1378_v17  ;;  %v1380_v38 = vsel %vm301_vm8, %v1378_v17, %v1376_v16 }
 0xad6   :  { %v1381_v39 = vmul.f32 %v1379_v18, %v2205_v31  ;;  %v1382_v54 = vmul.f32 %v1380_v38, %v2208_v32  ;;  %v70_v18 = vld [vmem:[%s2996_s13] sm:$0xff]  ;;  %v71_v38 = vld [vmem:[%s2996_s13 + $0x8] sm:$0xff] }
 0xad7   :  { %v1384_v55 = vpop.permute.xlu0 %1383 }
 0xad8   :  { %v1397_v34 = vpack.c.bf16 %v1381_v39, %v1373_v19  ;;  %v1386_v56 = vpop.permute.xlu1 %1385  ;;  %v1398_v58 = vpack.c.bf16 %v1382_v54, %v1374_v20 }
 0xad9   :  { %v1387_v60 = vsel %vm321_vm9, %v1384_v55, %v1386_v56  ;;  %v1388_v7 = vsel %vm321_vm9, %v1386_v56, %v1384_v55 }
 0xada   :  { %v1389_v33 = vmul.f32 %v1387_v60, %v2225_v51  ;;  %v1390_v57 = vmul.f32 %v1388_v7, %v2217_v40  ;;  %1423 = vmatprep.subr.bf16.mxu1 %v1398_v58 }
 0xadb   :  { %1424 = vmatpush1.bf16.msra.mxu1 %v1397_v34 }
 0xadc   :  { %v1399_v61 = vpack.c.bf16 %v1389_v33, %v1389_v33  ;;  %v1400_v22 = vpack.c.bf16 %v1390_v57, %v1390_v57 }
 0xade   :  { %1764 = vmatprep.subr.msk.bf16.mxu1 %vm358_vm10, %v1400_v22  ;;  %v1412_v24 = vsel %vm358_vm10, %v1399_v61, 0 }
 0xadf   :  { %1426 = vmatpush1.bf16.msra.mxu1 %v1412_v24 }
 0xae2   :  { %1765 = vmatmul.mubr.msk.bf16.vlgmr.msra.gmra.mrb[16].mxu1 %vm354_vm11, %v1401_v28 }
 0xae3   :  { %1653 = vmatprep.mubr.bf16.mxu1 %v1948_v3 }
 0xae8   :  { %v1406_v44 = vpop.permute.xlu0 %1405 }
 0xbb5   :  { %v1451_v45 = vpop.f32.mrb[16].mxu1 }
 0xbb6   :  { %v1452_v52 = vadd.f32 %v1451_v45, %v1406_v44  ;;  %v1453_v63 = vpop.f32.mrb[17].mxu1 }
 0xbb7   :  { %v1454_v1 = vadd.f32 %v1453_v63, %v1406_v44  ;;  %v1455_v2 = vpop.f32.mrb[18].mxu1 }
 0xbb8   :  { %v1766_v4 = vmul.f32 -1.442695, %v1452_v52  ;;  %v1456_v5 = vpop.f32.mrb[19].mxu1 }
 0xbb9   :  { %v1767_v36 = vmul.f32 -1.442695, %v1454_v1 }
 0xbba   :  { %1866 = vpow2.f32 %v1766_v4 }
 0xbbb   :  { %1868 = vpow2.f32 %v1767_v36 }
 0xbc4   :  { %v1867_v12 = vpop.eup %1866 }
 0xbc5   :  { %v1869_v35 = vpop.eup %1868  ;;  %v1464_v8 = vadd.f32 1.0, %v1867_v12 }
 0xbc6   :  { %v1465_v13 = vadd.f32 1.0, %v1869_v35 }
 0xbc7   :  { %1870 = vrcp.f32 %v1464_v8 }
 0xbc8   :  { %1872 = vrcp.f32 %v1465_v13 }
 0xbd1   :  { %v1871_v15 = vpop.eup %1870 }
 0xbd2   :  { %v1873_v16 = vpop.eup %1872  ;;  %v2843_v3 = vmul.f32 %v1871_v15, %v1452_v52 }
 0xbd3   :  { %v2845_v17 = vmul.f32 %v1873_v16, %v1454_v1 }
 0xbd4   :  { %1472 = vrot.lane.b32.xlu1 %v2843_v3, %s1950_s19 }
 0xbd5   :  { %1474 = vrot.lane.b32.xlu0 %v2845_v17, %s1950_s19 }
 0xbd8   :  { %1480 = vrot.lane.b32.xlu1 %v2843_v3, %s1949_s2 }
 0xbd9   :  { %1482 = vrot.lane.b32.xlu0 %v2845_v17, %s1949_s2 }
 0xbdc   :  { %1488 = vrot.lane.b32.xlu1 %v2843_v3, %s1951_s20 }
 0xbdd   :  { %1490 = vrot.lane.b32.xlu0 %v2845_v17, %s1951_s20 }
 0xbe0   :  { %1496 = vrot.lane.b32.xlu1 %v2843_v3, %s1952_s21 }
 0xbe1   :  { %1498 = vrot.lane.b32.xlu0 %v2845_v17, %s1952_s21 }
 0xbe4   :  { %1504 = vrot.lane.b32.xlu1 %v2843_v3, %s1953_s22 }
 0xbe5   :  { %1506 = vrot.lane.b32.xlu0 %v2845_v17, %s1953_s22 }
 0xbe8   :  { %1512 = vrot.lane.b32.xlu1 %v2843_v3, %s1954_s23 }
 0xbe9   :  { %1514 = vrot.lane.b32.xlu0 %v2845_v17, %s1954_s23 }
 0xbec   :  { %1520 = vrot.lane.b32.xlu1 %v2843_v3, %s1955_s24 }
 0xbed   :  { %1522 = vrot.lane.b32.xlu0 %v2845_v17, %s1955_s24 }
 0xbf0   :  { %1528 = vrot.lane.b32.xlu1 %v2843_v3, %s1956_s25 }
 0xbf1   :  { %1530 = vrot.lane.b32.xlu0 %v2845_v17, %s1956_s25 }
 0xbf4   :  { %1550 = vperm.xlu1 %1789, %v2470_v29  }
 0xbf5   :  { %861 = vperm.xlu0 %1788, %v70_v18  }
 0xbf8   :  { %866 = vperm.xlu1 %1789, %v71_v38  }
 0xc46   :  { %v1473_v19 = vpop.permute.xlu1 %1472 }
 0xc47   :  { %v1475_v20 = vpop.permute.xlu0 %1474 }
 0xc48   :  { %v1476_v39 = vsel %vm181_vm4, %v1473_v19, %v1475_v20  ;;  %v1477_v54 = vsel %vm181_vm4, %v1475_v20, %v1473_v19 }
 0xc49   :  { %v1478_v58 = vmul.f32 %v1477_v54, %v2143_v48  ;;  %v1479_v60 = vmul.f32 %v1476_v39, %v2140_v47 }
 0xc4a   :  { %v1481_v55 = vpop.permute.xlu1 %1480 }
 0xc4b   :  { %v1483_v34 = vpop.permute.xlu0 %1482 }
 0xc4c   :  { %v1484_v56 = vsel %vm201_vm2, %v1481_v55, %v1483_v34  ;;  %v1485_v29 = vsel %vm201_vm2, %v1483_v34, %v1481_v55 }
 0xc4d   :  { %v1486_v7 = vmul.f32 %v1485_v29, %v2124_v42  ;;  %v1487_v33 = vmul.f32 %v1484_v56, %v2121_v41 }
 0xc4e   :  { %v1489_v57 = vpop.permute.xlu1 %1488 }
 0xc4f   :  { %v1536_v61 = vpack.c.bf16 %v1486_v7, %v1478_v58  ;;  %v1491_v22 = vpop.permute.xlu0 %1490  ;;  %v1537_v24 = vpack.c.bf16 %v1487_v33, %v1479_v60  ;;  %v1546_v60 = vld [vmem:[%s2993_s10] sm:$0xf] }
 0xc50   :  { %v1492_v28 = vsel %vm221_vm3, %v1489_v57, %v1491_v22  ;;  %v1493_v44 = vsel %vm221_vm3, %v1491_v22, %v1489_v57 }
 0xc51   :  { %1562 = vmatprep.subr.bf16.mxu0 %v1537_v24  ;;  %v1494_v42 = vmul.f32 %v1493_v44, %v2171_v0  ;;  %v1495_v52 = vmul.f32 %v1492_v28, %v2146_v49 }
 0xc52   :  { %1563 = vmatpush1.bf16.msra.mxu0 %v1536_v61  ;;  %v1497_v45 = vpop.permute.xlu1 %1496 }
 0xc53   :  { %v1499_v48 = vpop.permute.xlu0 %1498 }
 0xc54   :  { %v1500_v47 = vsel %vm241_vm5, %v1497_v45, %v1499_v48  ;;  %v1501_v41 = vsel %vm241_vm5, %v1499_v48, %v1497_v45 }
 0xc55   :  { %v1502_v63 = vmul.f32 %v1501_v41, %v2149_v50  ;;  %v1503_v1 = vmul.f32 %v1500_v47, %v2137_v46 }
 0xc56   :  { %v1505_v2 = vpop.permute.xlu1 %1504 }
 0xc57   :  { %v1538_v4 = vpack.c.bf16 %v1502_v63, %v1494_v42  ;;  %v1507_v5 = vpop.permute.xlu0 %1506  ;;  %v1539_v36 = vpack.c.bf16 %v1503_v1, %v1495_v52 }
 0xc58   :  { %v1508_v12 = vsel %vm261_vm6, %v1505_v2, %v1507_v5  ;;  %v1509_v35 = vsel %vm261_vm6, %v1507_v5, %v1505_v2 }
 0xc59   :  { %v1510_v8 = vmul.f32 %v1508_v12, %v2180_v14  ;;  %v1511_v0 = vmul.f32 %v1509_v35, %v2153_v53  ;;  %1564 = vmatprep.subr.bf16.mxu0 %v1539_v36  ;;  %v1003_v12 = vadd.f32 %v2549_v10, %v2541_v43  ;;  %v1001_v35 = vadd.f32 %v2547_v62, %v2541_v43 }
 0xc5a   :  { %1565 = vmatpush1.bf16.msra.mxu0 %v1538_v4  ;;  %v1513_v49 = vpop.permute.xlu1 %1512 }
 0xc5b   :  { %v1540_v50 = vpack.c.bf16 %v1510_v8, %v2843_v3  ;;  %v1515_v46 = vpop.permute.xlu0 %1514  ;;  %v1541_v13 = vpack.c.bf16 %v1511_v0, %v2845_v17  ;;  %v1753_v8 = vmul.f32 -1.442695, %v1003_v12  ;;  %v1752_v0 = vmul.f32 -1.442695, %v1001_v35 }
 0xc5c   :  { %v1516_v15 = vsel %vm281_vm7, %v1513_v49, %v1515_v46  ;;  %v1517_v16 = vsel %vm281_vm7, %v1515_v46, %v1513_v49 }
 0xc5d   :  { %1566 = vmatprep.subr.bf16.mxu0 %v1541_v13  ;;  %v1518_v3 = vmul.f32 %v1516_v15, %v2195_v26  ;;  %v1519_v17 = vmul.f32 %v1517_v16, %v2198_v27 }
 0xc5e   :  { %1567 = vmatpush1.bf16.msra.mxu0 %v1540_v50  ;;  %v1521_v18 = vpop.permute.xlu1 %1520 }
 0xc5f   :  { %v1523_v14 = vpop.permute.xlu0 %1522 }
 0xc60   :  { %v1524_v53 = vsel %vm301_vm8, %v1521_v18, %v1523_v14  ;;  %v1525_v38 = vsel %vm301_vm8, %v1523_v14, %v1521_v18 }
 0xc61   :  { %v1526_v19 = vmul.f32 %v1524_v53, %v2205_v31  ;;  %v1527_v20 = vmul.f32 %v1525_v38, %v2208_v32 }
 0xc62   :  { %v1529_v39 = vpop.permute.xlu1 %1528 }
 0xc63   :  { %v1542_v54 = vpack.c.bf16 %v1526_v19, %v1518_v3  ;;  %v1531_v55 = vpop.permute.xlu0 %1530  ;;  %v1543_v34 = vpack.c.bf16 %v1527_v20, %v1519_v17 }
 0xc64   :  { %v1532_v56 = vsel %vm321_vm9, %v1529_v39, %v1531_v55  ;;  %v1533_v29 = vsel %vm321_vm9, %v1531_v55, %v1529_v39 }
 0xc65   :  { %v1534_v58 = vmul.f32 %v1532_v56, %v2225_v51  ;;  %v1535_v26 = vmul.f32 %v1533_v29, %v2217_v40  ;;  %1568 = vmatprep.subr.bf16.mxu0 %v1543_v34 }
 0xc66   :  { %1569 = vmatpush1.bf16.msra.mxu0 %v1542_v54 }
 0xc67   :  { %v1544_v27 = vpack.c.bf16 %v1534_v58, %v1534_v58  ;;  %v1545_v31 = vpack.c.bf16 %v1535_v26, %v1535_v26 }
 0xc69   :  { %1768 = vmatprep.subr.msk.bf16.mxu0 %vm358_vm10, %v1545_v31  ;;  %v1557_v32 = vsel %vm358_vm10, %v1544_v27, 0 }
 0xc6a   :  { %1571 = vmatpush1.bf16.msra.mxu0 %v1557_v32 }
 0xc6d   :  { %1769 = vmatmul.mubr.msk.bf16.vlgmr.msra.gmra.mrb[20].mxu0 %vm354_vm11, %v1546_v60  ;;  %v1923_v60 = vld [vmem:[%s2995_s12] sm:$0xff]   ;;  %s1957_s12 = smov [#allocation2]  }
 0xc6e   :  { %s1702_s24 = sshll.u32 %s1957_s12, 4  ;;  %s1703_s24 = int_to_ptr.vmem [resolvable:$true] %s1702_s24 }
 0xc6f   :  { %s1924_s25 = scalar_lea.vmem %s1703_s24, 1024  ;;  %p1929_p1 = scmp.lt.s32.totalorder %s1703_s24, %s1703_s24 }
 0xc70   :  { %p1925_p0 = scmp.ne.s32.totalorder %s1703_s24, %s1924_s25  ;;  %p1930_p2 = scmp.lt.s32.totalorder %s1924_s25, %s1924_s25 }
 0xc72   :  { %p1931_p3 = por %p1930_p2, %p1929_p1 }
 0xc73   :  { %v1551_v30 = vpop.permute.xlu1 %1550 }
 0xc74   :  { %v2942_v7 = vpop.permute.xlu0 %861  ;;  %p1932_p4 = pnand %p1931_p3, %p1925_p0 }
 0xc75   :  { %v913_v40 = vadd.f32 %v2658_v9, %v2942_v7  ;;  %v915_v51 = vadd.f32 %v2660_v21, %v2942_v7 }
 0xc77   :  { %v1745_v33 = vmul.f32 -1.442695, %v913_v40  ;;  %v1746_v57 = vmul.f32 -1.442695, %v915_v51  ;;  %v2948_v61 = vpop.permute.xlu1 %866 }
 0xc78   :  { %v917_v22 = vadd.f32 %v2662_v23, %v2948_v61  ;;  %v919_v24 = vadd.f32 %v2664_v25, %v2948_v61 }
 0xc79   :  { %1874 = vpow2.f32 %v1745_v33 }
 0xc7a   :  { %1876 = vpow2.f32 %v1746_v57  ;;  %v1747_v28 = vmul.f32 -1.442695, %v917_v22  ;;  %v1748_v44 = vmul.f32 -1.442695, %v919_v24 }
 0xc7c   :  { %1878 = vpow2.f32 %v1747_v28 }
 0xc7d   :  { %1880 = vpow2.f32 %v1748_v44 }
 0xc83   :  { %v1875_v9 = vpop.eup %1874 }
 0xc84   :  { %v1877_v45 = vpop.eup %1876  ;;  %v933_v48 = vadd.f32 1.0, %v1875_v9 }
 0xc85   :  { %v934_v21 = vadd.f32 1.0, %v1877_v45 }
 0xc86   :  { %v1879_v47 = vpop.eup %1878  ;;  %1882 = vrcp.f32 %v933_v48 }
 0xc87   :  { %v1881_v41 = vpop.eup %1880  ;;  %1884 = vrcp.f32 %v934_v21  ;;  %v935_v42 = vadd.f32 1.0, %v1879_v47 }
 0xc88   :  { %v936_v52 = vadd.f32 1.0, %v1881_v41 }
 0xc89   :  { %1886 = vrcp.f32 %v935_v42 }
 0xc8a   :  { %1888 = vrcp.f32 %v936_v52 }
 0xc8b   :  { %1890 = vpow2.f32 %v1753_v8 }
 0xc8c   :  { %1892 = vpow2.f32 %v1752_v0 }
 0xc90   :  { %v1883_v23 = vpop.eup %1882 }
 0xc91   :  { %v1885_v25 = vpop.eup %1884  ;;  %v945_v63 = vmul.f32 %v1883_v23, %v913_v40 }
 0xc92   :  { %v946_v1 = vmul.f32 %v1885_v25, %v915_v51 }
 0xc93   :  { %v1887_v2 = vpop.eup %1886  ;;  %949 = vst [vmem:[#allocation2] sm:$0xff] %v945_v63 }
 0xc94   :  { %v1889_v4 = vpop.eup %1888  ;;  %950 = vst [vmem:[#allocation2 + $0x8] sm:$0xff] %v946_v1  ;;  %v947_v5 = vmul.f32 %v1887_v2, %v917_v22 }
 0xc95   :  { %v948_v36 = vmul.f32 %v1889_v4, %v919_v24  ;;  %v1891_v53 = vpop.eup %1890 }
 0xc96   :  { %951 = vst [vmem:[#allocation2 + $0x10] sm:$0xff] %v947_v5  ;;  %v1022_v38 = vadd.f32 1.0, %v1891_v53  ;;  %v1893_v10 = vpop.eup %1892 }
 0xc97   :  { %952 = vst [vmem:[#allocation2 + $0x18] sm:$0xff] %v948_v36  ;;  %v1021_v19 = vadd.f32 1.0, %v1893_v10 }
 0xd40   :  { %v1596_v49 = vpop.f32.mrb[20].mxu0 }
 0xd41   :  { %v1597_v50 = vadd.f32 %v1596_v49, %v1551_v30  ;;  %v1598_v46 = vpop.f32.mrb[21].mxu0 }
 0xd42   :  { %v1599_v13 = vadd.f32 %v1598_v46, %v1551_v30  ;;  %v1600_v15 = vpop.f32.mrb[22].mxu0 }
 0xd43   :  { %v1770_v16 = vmul.f32 -1.442695, %v1597_v50  ;;  %v1601_v18 = vpop.f32.mrb[23].mxu0 }
 0xd44   :  { %v1771_v14 = vmul.f32 -1.442695, %v1599_v13 }
 0xd45   :  { %1894 = vpow2.f32 %v1770_v16 }
 0xd46   :  { %1896 = vpow2.f32 %v1771_v14 }
 0xd47   :  { %1898 = vrcp.f32 %v1022_v38 }
 0xd4f   :  { %v1895_v3 = vpop.eup %1894 }
 0xd50   :  { %v1897_v17 = vpop.eup %1896  ;;  %v1609_v43 = vadd.f32 1.0, %v1895_v3 }
 0xd51   :  { %v1610_v62 = vadd.f32 1.0, %v1897_v17  ;;  %v1899_v20 = vpop.eup %1898 }
 0xd52   :  { %1900 = vrcp.f32 %v1609_v43  ;;  %v1034_v29 = vmul.f32 %v1899_v20, %v1003_v12 }
 0xd53   :  { %1902 = vrcp.f32 %v1610_v62 }
 0xd54   :  { %1904 = vrcp.f32 %v1021_v19  ;;  %v1620_v27 = vpack.c.bf16 %v1034_v29, %v2562_v37 }
 0xd5c   :  { %v1901_v39 = vpop.eup %1900 }
 0xd5d   :  { %v1903_v54 = vpop.eup %1902  ;;  %v1615_v55 = vmul.f32 %v1901_v39, %v1597_v50 }
 0xd5e   :  { %v1616_v34 = vmul.f32 %v1903_v54, %v1599_v13  ;;  %v1905_v56 = vpop.eup %1904 }
 0xd5f   :  { %v1617_v26 = vpack.c.bf16 %v2749_v6, %v1615_v55  ;;  %v1033_v31 = vmul.f32 %v1905_v56, %v1001_v35 }
 0xd60   :  { %v1618_v58 = vpack.c.bf16 %v2751_v11, %v1616_v34 }
 0xd61   :  { %v1619_v32 = vpack.c.bf16 %v1033_v31, %v2560_v59 }
 0xd62   :  { %1621 = vmatprep.subr.bf16.mxu1 %v1618_v58 }
 0xd63   :  { %1622 = vmatpush1.bf16.msra.mxu1 %v1617_v26 }
 0xd64   :  { %1623 = vmatprep.subr.bf16.mxu1 %v1620_v27 }
 0xd67   :  { %1624 = vmatpush1.bf16.msra.mxu1 %v1619_v32 }
 0xd6a   :  { %1772 = vmatmul.mubr.msk.bf16.vlgmr.msra.gmra.mrb[20].mxu1 %vm874_vm12, %v1923_v60 }
 0xe3d   :  { %v1655_v30 = vpop.f32.mrb[20].mxu1 }
 0xe3e   :  { %v1656_v11 = vadd.f32 %v1655_v30, %v2942_v7  ;;  %v1657_v40 = vpop.f32.mrb[21].mxu1 }
 0xe3f   :  { %v1658_v6 = vadd.f32 %v1657_v40, %v2942_v7  ;;  %v1659_v51 = vpop.f32.mrb[22].mxu1 }
 0xe40   :  { %v1773_v37 = vmul.f32 -1.442695, %v1656_v11  ;;  %v1660_v33 = vadd.f32 %v1659_v51, %v2948_v61  ;;  %v1661_v57 = vpop.f32.mrb[23].mxu1 }
 0xe41   :  { %v1774_v22 = vmul.f32 -1.442695, %v1658_v6  ;;  %v1662_v59 = vadd.f32 %v1661_v57, %v2948_v61 }
 0xe42   :  { %1906 = vpow2.f32 %v1773_v37  ;;  %v1775_v24 = vmul.f32 -1.442695, %v1660_v33 }
 0xe43   :  { %1908 = vpow2.f32 %v1774_v22  ;;  %v1776_v28 = vmul.f32 -1.442695, %v1662_v59 }
 0xe44   :  { %1910 = vpow2.f32 %v1775_v24 }
 0xe45   :  { %1912 = vpow2.f32 %v1776_v28 }
 0xe4c   :  { %v1907_v44 = vpop.eup %1906 }
 0xe4d   :  { %v1909_v9 = vpop.eup %1908  ;;  %v1676_v45 = vadd.f32 1.0, %v1907_v44 }
 0xe4e   :  { %v1911_v48 = vpop.eup %1910  ;;  %v1677_v21 = vadd.f32 1.0, %v1909_v9 }
 0xe4f   :  { %v1913_v7 = vpop.eup %1912  ;;  %1914 = vrcp.f32 %v1676_v45  ;;  %v1678_v47 = vadd.f32 1.0, %v1911_v48 }
 0xe50   :  { %1916 = vrcp.f32 %v1677_v21  ;;  %v1679_v41 = vadd.f32 1.0, %v1913_v7 }
 0xe51   :  { %1918 = vrcp.f32 %v1678_v47 }
 0xe52   :  { %1920 = vrcp.f32 %v1679_v41 }
 0xe59   :  { %v1915_v42 = vpop.eup %1914 }
 0xe5a   :  { %v1917_v61 = vpop.eup %1916  ;;  %v1688_v52 = vmul.f32 %v1915_v42, %v1656_v11 }
 0xe5b   :  { %v1919_v23 = vpop.eup %1918  ;;  %v1689_v25 = vmul.f32 %v1917_v61, %v1658_v6 }
 0xe5c   :  { %v1921_v63 = vpop.eup %1920  ;;  %1693 = vst [vmem:[#allocation2 + $0x20] sm:$0xff] %v1688_v52  ;;  %v1690_v1 = vmul.f32 %v1919_v23, %v1660_v33 }
 0xe5d   :  { %1694 = vst [vmem:[#allocation2 + $0x28] sm:$0xff] %v1689_v25  ;;  %v1691_v2 = vmul.f32 %v1921_v63, %v1662_v59 }
 0xe5e   :  { %1695 = vst [vmem:[#allocation2 + $0x30] sm:$0xff] %v1690_v1 }
 0xe5f   :  { %1696 = vst [vmem:[#allocation2 + $0x38] sm:$0xff] %v1691_v2 }
 0xe60   :  { %1935 = shalt.err (!%p1932_p4)
}
 0xe61   :  { %s1936_s1 = scalar_lea.hbm %s2997_s14, 1024 }
 0xe62   :  { %p1937_p5 = scmp.ne.s32.totalorder %s2997_s14, %s1936_s1  ;;  %p1940_p6 = scmp.lt.u32.totalorder %s1936_s1, %s2997_s14 }
 0xe64   :  { %p1942_p7 = pnand %p1940_p6, %p1937_p5 }
 0xe66   :  { %1945 = shalt.err (!%p1942_p7)
}
 0xe67   :  { %s1958_s27 = smov 256  }
 0xe68   :  { %1708 = dma.vmem_to_hbm [thread:$0]  %s1703_s24, 1024, %s2997_s14, [#allocation3], %s1958_s27, %s1958_s27, %s1949_s2  }
 0xe69   :  { %1946 = dma.done.wait [#allocation3], 1024  }
 0xe6a   :  { %1947 = vsyncadd [#allocation3], 4294966272 }
 0xe6b   :  { %1712 = vsyncpa [#allocation3], 1 }

</bundles_post_ra>
